<compile_context>
chip_gen: v7x
topology: tpu7x:2x2x1
jax: 0.10.0
libtpu: 0.0.40
codegen_flags: <defaults>
</compile_context>

<pallas_src>
import functools

import jax
import jax.numpy as jnp
from jax.experimental import pallas as pl
from jax.experimental.pallas import tpu as pltpu


def _round_up(x, m):
    return (x + m - 1) // m * m


# --------------------------------------------------------------------------- #
# Kernel A: implicit-GEMM conv over space-to-depth packed, haloed row tiles
#           + per-tile BN partial sums
# --------------------------------------------------------------------------- #
def _conv_group_kernel(x_ref, w_ref, b_ref, m_ref, y_ref, st_ref, *,
                       n_g, Wp2, rows):
    """x_ref : (1, 1, rows_in, Ck)   bf16  packed, haloed, row-flattened tile
       w_ref : (n_g*n_g, Ck, Cout_p) bf16  per-(pi,pj) tap-group weights
       b_ref : (1, Cout_p)           f32   conv bias
       m_ref : (rows, 1)             f32   1.0 on valid output columns
       y_ref : (1, rows, Cout_p)     bf16  conv + bias (pre-BN)
       st_ref: (1, 1, 2, Cout_p)     f32   per-tile [sum, sum_sq] (pre-bias)"""
    cout_p = y_ref.shape[-1]
    acc = jnp.zeros((rows, cout_p), jnp.float32)
    for pi in range(n_g):
        for pj in range(n_g):
            start = pi * Wp2 + pj                      # static per tap group
            sl = x_ref[0, 0, pl.ds(start, rows), :]
            acc = acc + jnp.dot(sl, w_ref[pi * n_g + pj],
                                preferred_element_type=jnp.float32)

    # BN batch statistics over the *valid* output columns only, computed on the
    # pre-bias accumulator (bias shifts the mean, not the variance; it is
    # re-added analytically in the finalize kernel -> less cancellation).
    am = acc * m_ref[...]                              # single masked pass
    s = jnp.sum(am, axis=0, keepdims=True)             # (1, Cout_p)
    ss = jnp.sum(am * acc, axis=0, keepdims=True)      # reuse masked product
    st_ref[0, 0] = jnp.concatenate([s, ss], axis=0)    # (2, Cout_p)

    y_ref[0] = (acc + b_ref[...]).astype(y_ref.dtype)


# --------------------------------------------------------------------------- #
# Kernel B: fold partial sums into fused BN scale / shift (single step, tiny)
# --------------------------------------------------------------------------- #
def _bn_finalize_kernel(st_ref, b_ref, g_ref, bt_ref, o_ref, *, inv_m, eps):
    s = jnp.sum(st_ref[...], axis=0)                  # (2, Cout_p)
    mean_nb = s[0:1, :] * inv_m                       # conv-only (pre-bias) mean
    var = s[1:2, :] * inv_m - mean_nb * mean_nb       # biased variance
    inv_std = jax.lax.rsqrt(var + eps)
    scale = g_ref[...] * inv_std                      # (1, Cout_p)
    shift = bt_ref[...] - (mean_nb + b_ref[...]) * scale
    o_ref[...] = jnp.concatenate([scale, shift], axis=0)


# --------------------------------------------------------------------------- #
# Kernel C: y * scale + shift, then ELU (alpha = 1), bf16 out
# --------------------------------------------------------------------------- #
def _bn_elu_kernel(y_ref, ss_ref, o_ref):
    z = y_ref[0].astype(jnp.float32) * ss_ref[0:1, :] + ss_ref[1:2, :]
    o_ref[0] = jnp.where(z > 0, z,
                         jnp.exp(jnp.minimum(z, 0.0)) - 1.0).astype(o_ref.dtype)


# --------------------------------------------------------------------------- #
# VMEM budgeting / tile selection (generation aware)
# --------------------------------------------------------------------------- #
def _vmem_capacity_bytes():
    try:
        info = pltpu.get_tpu_info()
        for attr in ("vmem_capacity_bytes", "vmem_size_bytes", "vmem_bytes"):
            val = getattr(info, attr, None)
            if val:
                return int(val)
    except Exception:
        pass
    return 64 * 1024 * 1024          # conservative default: v7x per-TC VMEM


def _kernel_a_vmem_bytes(t_oh, Wp2, Ck, Cout_p, n_g2, g):
    rows = t_oh * Wp2
    rows_in = (t_oh + g + 1) * Wp2
    x_blk = _round_up(rows_in, 16) * _round_up(Ck, 128) * 2      # bf16, lane pad
    w_blk = n_g2 * _round_up(Ck, 16) * Cout_p * 2
    m_blk = _round_up(rows, 8) * 128 * 4
    y_blk = _round_up(rows, 16) * Cout_p * 2
    small = 2 * 8 * Cout_p * 4
    acc = _round_up(rows, 8) * Cout_p * 4
    # inputs/outputs double buffered; f32 acc + VPU temporaries on top
    return 2 * (x_blk + w_blk + m_blk + y_blk + small) + 3 * acc


def _pick_t_oh(OH, Wp2, Ck, Cout_p, n_g2, g, budget):
    cands = [t for t in range(1, OH + 1)
             if OH % t == 0 and (t == OH or (t * Wp2) % 16 == 0)]
    fits = [t for t in cands
            if _kernel_a_vmem_bytes(t, Wp2, Ck, Cout_p, n_g2, g) <= budget]
    if fits:
        return max(fits)
    # TODO(synk): no legal row-tile fits the VMEM budget (huge Wp2*Cout_p);
    # fall back to the smallest legal tile instead of the whole image.
    return min(cands)


# --------------------------------------------------------------------------- #
# Wrapper
# --------------------------------------------------------------------------- #
@functools.partial(jax.jit, static_argnames=("stride", "eps", "t_oh"))
def conv_bn_elu(x_nchw, weight, bias, gamma, beta, *, stride, eps=1e-5,
                t_oh=None):
    """Forward of the PyTorch `conv` module (training-mode BN). NCHW in/out."""
    N, Cin, H, W = x_nchw.shape
    Cout, _, k, _ = weight.shape
    pad = (k - 1) // 2
    OH = (H + 2 * pad - k) // stride + 1
    OW = (W + 2 * pad - k) // stride + 1
    Hp, Wp = H + 2 * pad, W + 2 * pad
    Cout_p = _round_up(Cout, 128)

    f = stride                        # space-to-depth factor (f=1: plain taps)
    g = (k - 1) // f                  # max packed tap-group offset
    n_g = g + 1
    Ck = f * f * Cin
    Hp_e, Wp_e = _round_up(Hp, f), _round_up(Wp, f)
    Hp2, Wp2 = Hp_e // f, Wp_e // f

    cap = _vmem_capacity_bytes()
    vmem_limit = min(cap * 3 // 4, 112 * 1024 * 1024)
    if t_oh is None:
        T_OH = _pick_t_oh(OH, Wp2, Ck, Cout_p, n_g * n_g, g,
                          (vmem_limit * 4) // 5)
    else:
        T_OH = t_oh
        if OH % T_OH or (T_OH != OH and (T_OH * Wp2) % 16):
            raise ValueError("illegal t_oh override")
    n_t = OH // T_OH
    rows = T_OH * Wp2
    T_IMG = T_OH + g + 1
    rows_in = T_IMG * Wp2

    # ---- glue: NCHW->NHWC, zero pad, space-to-depth pack, haloed row tiles ---
    x = jnp.transpose(x_nchw, (0, 2, 3, 1)).astype(jnp.bfloat16)
    xp = jnp.pad(x, ((0, 0), (pad, pad + Hp_e - Hp),
                     (pad, pad + Wp_e - Wp), (0, 0)))
    if f > 1:
        xp = xp.reshape(N, Hp2, f, Wp2, f, Cin)
        xp = xp.transpose(0, 1, 3, 2, 4, 5).reshape(N, Hp2, Wp2, Ck)
    need_rows = OH + g + 1            # rows needed incl. last tile halo/wrap
    if need_rows > Hp2:
        xp = jnp.pad(xp, ((0, 0), (0, need_rows - Hp2), (0, 0), (0, 0)))
    x_tiles = jnp.stack([xp[:, t * T_OH: t * T_OH + T_IMG] for t in range(n_t)],
                        axis=1).reshape(N, n_t, rows_in, Ck)

    # ---- glue: per-(pi,pj) tap-group weights with K = f*f*Cin ----------------
    kk = n_g * f
    w_sp = jnp.transpose(weight, (2, 3, 1, 0))                   # (k,k,Cin,Cout)
    w_sp = jnp.pad(w_sp, ((0, kk - k), (0, kk - k), (0, 0), (0, 0)))
    w_g = w_sp.reshape(n_g, f, n_g, f, Cin, Cout).transpose(0, 2, 1, 3, 4, 5)
    w_g = w_g.reshape(n_g * n_g, Ck, Cout)
    w_g = jnp.pad(w_g, ((0, 0), (0, 0),
                        (0, Cout_p - Cout))).astype(jnp.bfloat16)

    b_row = jnp.pad(bias.astype(jnp.float32), (0, Cout_p - Cout)).reshape(1, Cout_p)
    g_row = jnp.pad(gamma.astype(jnp.float32), (0, Cout_p - Cout)).reshape(1, Cout_p)
    bt_row = jnp.pad(beta.astype(jnp.float32), (0, Cout_p - Cout)).reshape(1, Cout_p)

    # Valid-output-column mask (flat rows cover Wp2 extended columns / out row).
    col_mask = ((jnp.arange(rows) % Wp2) < OW).astype(jnp.float32).reshape(rows, 1)

    cparams = pltpu.CompilerParams(
        dimension_semantics=("parallel", "parallel"),
        vmem_limit_bytes=int(vmem_limit))

    cost_a = pl.CostEstimate(
        flops=int(2 * N * OH * Wp2 * Cout_p * n_g * n_g * Ck),
        transcendentals=0,
        bytes_accessed=int(x_tiles.size * 2 + w_g.size * 2
                           + N * OH * Wp2 * Cout_p * 2
                           + N * n_t * 2 * Cout_p * 4))

    # ---- kernel A: implicit-GEMM conv + per-tile BN partial sums -------------
    y_ext, stats = pl.pallas_call(
        functools.partial(_conv_group_kernel, n_g=n_g, Wp2=Wp2, rows=rows),
        out_shape=(jax.ShapeDtypeStruct((N, OH * Wp2, Cout_p), jnp.bfloat16),
                   jax.ShapeDtypeStruct((N, n_t, 2, Cout_p), jnp.float32)),
        grid_spec=pltpu.PrefetchScalarGridSpec(
            num_scalar_prefetch=0,
            grid=(N, n_t),
            in_specs=[
                pl.BlockSpec((1, 1, rows_in, Ck), lambda n, t: (n, t, 0, 0)),
                pl.BlockSpec((n_g * n_g, Ck, Cout_p), lambda n, t: (0, 0, 0)),
                pl.BlockSpec((1, Cout_p), lambda n, t: (0, 0)),
                pl.BlockSpec((rows, 1), lambda n, t: (0, 0)),
            ],
            out_specs=[
                pl.BlockSpec((1, rows, Cout_p), lambda n, t: (n, t, 0)),
                pl.BlockSpec((1, 1, 2, Cout_p), lambda n, t: (n, t, 0, 0)),
            ]),
        compiler_params=cparams,
        cost_estimate=cost_a,
    )(x_tiles, w_g, b_row, col_mask)

    # ---- kernel B: fold partial stats into fused BN scale / shift ------------
    stats2 = stats.reshape(N * n_t, 2, Cout_p)
    scale_shift = pl.pallas_call(
        functools.partial(_bn_finalize_kernel,
                          inv_m=1.0 / float(N * OH * OW), eps=float(eps)),
        out_shape=jax.ShapeDtypeStruct((2, Cout_p), jnp.float32),
        compiler_params=pltpu.CompilerParams(vmem_limit_bytes=int(vmem_limit)),
    )(stats2, b_row, g_row, bt_row)

    # ---- kernel C: z = y*scale + shift, ELU, bf16 out -------------------------
    cost_c = pl.CostEstimate(
        flops=int(4 * N * OH * Wp2 * Cout_p),
        transcendentals=int(N * OH * Wp2 * Cout_p),
        bytes_accessed=int(N * OH * Wp2 * Cout_p * 4 + 2 * Cout_p * 4))

    out_ext = pl.pallas_call(
        _bn_elu_kernel,
        out_shape=jax.ShapeDtypeStruct((N, OH * Wp2, Cout_p), jnp.bfloat16),
        grid_spec=pltpu.PrefetchScalarGridSpec(
            num_scalar_prefetch=0,
            grid=(N, n_t),
            in_specs=[pl.BlockSpec((1, rows, Cout_p), lambda n, t: (n, t, 0)),
                      pl.BlockSpec((2, Cout_p), lambda n, t: (0, 0))],
            out_specs=pl.BlockSpec((1, rows, Cout_p), lambda n, t: (n, t, 0))),
        compiler_params=cparams,
        cost_estimate=cost_c,
    )(y_ext, scale_shift)

    # ---- glue: drop garbage cols / channel pad, back to NCHW f32 (one pass) --
    out = out_ext.reshape(N, OH, Wp2, Cout_p)[:, :, :OW, :Cout]
    return jnp.transpose(out, (0, 3, 1, 2)).astype(jnp.float32)


# --------------------------------------------------------------------------- #
# Pure-JAX reference (same semantics as the PyTorch module in training mode)
# --------------------------------------------------------------------------- #
def _reference(x, weight, bias, gamma, beta, *, stride, eps=1e-5):
    pad = (weight.shape[2] - 1) // 2
    y = jax.lax.conv_general_dilated(
        x, weight, window_strides=(stride, stride),
        padding=((pad, pad), (pad, pad)),
        dimension_numbers=("NCHW", "OIHW", "NCHW"))
    y = y + bias.reshape(1, -1, 1, 1)
    mean = y.mean(axis=(0, 2, 3), keepdims=True)
    var = jnp.mean((y - mean) ** 2, axis=(0, 2, 3), keepdims=True)   # biased
    z = (y - mean) * jax.lax.rsqrt(var + eps)
    z = z * gamma.reshape(1, -1, 1, 1) + beta.reshape(1, -1, 1, 1)
    return jnp.where(z > 0, z, jnp.exp(z) - 1.0)


if __name__ == "__main__":
    def run_case(N, Cin, H, W, Cout, k, stride, t_oh=None):
        key = jax.random.PRNGKey(0)
        kx, kw, kb, kg, kbt = jax.random.split(key, 5)
        x = jax.random.normal(kx, (N, Cin, H, W), dtype=jnp.float32)
        weight = 0.1 * jax.random.normal(kw, (Cout, Cin, k, k), dtype=jnp.float32)
        bias = 0.1 * jax.random.normal(kb, (Cout,), dtype=jnp.float32)
        gamma = 1.0 + 0.1 * jax.random.normal(kg, (Cout,), dtype=jnp.float32)
        beta = 0.1 * jax.random.normal(kbt, (Cout,), dtype=jnp.float32)

        out = conv_bn_elu(x, weight, bias, gamma, beta, stride=stride, t_oh=t_oh)
        out = jax.block_until_ready(out)
        ref = _reference(x, weight, bias, gamma, beta, stride=stride)
        assert out.shape == ref.shape, (out.shape, ref.shape)
        err = float(jnp.max(jnp.abs(out - ref)))
        # bf16 matmul inputs + bf16 y + bf16 epilogue output vs f32 reference.
        assert jnp.allclose(out, ref, atol=5e-2, rtol=5e-2), (
            f"case Cin={Cin} H={H} k={k} s={stride}: max abs diff {err}")

    run_case(2, 4, 16, 16, 8, 3, 1)            # base 3x3 / stride 1
    run_case(2, 4, 16, 16, 8, 3, 2)            # 3x3 / stride 2 (space-to-depth)
    run_case(2, 8, 16, 16, 16, 3, 1, t_oh=8)   # forced multi-tile (halo path)
    run_case(2, 3, 18, 18, 8, 7, 2)            # 7x7 / stride 2 (encoder conv1)
    print("KERNEL_OK")
</pallas_src>

<mosaic_0001>
module attributes {stable_mosaic.version = 11 : i64} {
  func.func @_conv_group_kernel(%arg0: i32, %arg1: i32, %arg2: memref<1x1x342x4xbf16, #tpu.memory_space<vmem>>, %arg3: memref<9x4x128xbf16, #tpu.memory_space<vmem>>, %arg4: memref<1x128xf32, #tpu.memory_space<vmem>>, %arg5: memref<288x1xf32, #tpu.memory_space<vmem>>, %arg6: memref<1x288x128xbf16, #tpu.memory_space<vmem>>, %arg7: memref<1x1x2x128xf32, #tpu.memory_space<vmem>>) attributes {dimension_semantics = [#tpu.dimension_semantics<parallel>, #tpu.dimension_semantics<parallel>], iteration_bounds = array<i64: 2, 1>, scalar_prefetch = 0 : i64, scratch_operands = 0 : i64, tpu.core_type = #tpu.core_type<tc>, window_params = [{transform_indices = @transform_0, window_bounds = array<i64: 1, 1, 342, 4>}, {pipeline_mode = #tpu.pipeline_mode<synchronous>, transform_indices = @transform_1, window_bounds = array<i64: 9, 4, 128>}, {pipeline_mode = #tpu.pipeline_mode<synchronous>, transform_indices = @transform_2, window_bounds = array<i64: 1, 128>}, {pipeline_mode = #tpu.pipeline_mode<synchronous>, transform_indices = @transform_3, window_bounds = array<i64: 288, 1>}, {transform_indices = @transform_4, window_bounds = array<i64: 1, 288, 128>}, {transform_indices = @transform_5, window_bounds = array<i64: 1, 1, 2, 128>}]} {
    %cst = arith.constant 0.000000e+00 : f32
    %0 = vector.broadcast %cst : f32 to vector<288x128xf32>
    %c0 = arith.constant 0 : index
    %c0_0 = arith.constant 0 : index
    %c0_1 = arith.constant 0 : index
    %c0_2 = arith.constant 0 : index
    %1 = vector.load %arg2[%c0, %c0_0, %c0_1, %c0_2] : memref<1x1x342x4xbf16, #tpu.memory_space<vmem>>, vector<1x1x288x4xbf16>
    %2 = vector.shape_cast %1 : vector<1x1x288x4xbf16> to vector<288x4xbf16>
    %c0_3 = arith.constant 0 : index
    %c0_4 = arith.constant 0 : index
    %c0_5 = arith.constant 0 : index
    %3 = vector.load %arg3[%c0_3, %c0_4, %c0_5] : memref<9x4x128xbf16, #tpu.memory_space<vmem>>, vector<1x4x128xbf16>
    %4 = vector.shape_cast %3 : vector<1x4x128xbf16> to vector<4x128xbf16>
    %cst_6 = arith.constant dense<0.000000e+00> : vector<288x128xf32>
    %5 = tpu.matmul %2, %4, %cst_6 {dimension_numbers = #tpu.dot_dimension_numbers<[1], [0], [0], [1], [0, 0, 1, 1], [], []>} : vector<288x4xbf16>, vector<4x128xbf16>, vector<288x128xf32> -> vector<288x128xf32>
    %6 = arith.addf %0, %5 : vector<288x128xf32>
    %c0_7 = arith.constant 0 : index
    %c0_8 = arith.constant 0 : index
    %c1 = arith.constant 1 : index
    %c0_9 = arith.constant 0 : index
    %7 = vector.load %arg2[%c0_7, %c0_8, %c1, %c0_9] : memref<1x1x342x4xbf16, #tpu.memory_space<vmem>>, vector<1x1x288x4xbf16>
    %8 = vector.shape_cast %7 : vector<1x1x288x4xbf16> to vector<288x4xbf16>
    %c1_10 = arith.constant 1 : index
    %c0_11 = arith.constant 0 : index
    %c0_12 = arith.constant 0 : index
    %9 = vector.load %arg3[%c1_10, %c0_11, %c0_12] : memref<9x4x128xbf16, #tpu.memory_space<vmem>>, vector<1x4x128xbf16>
    %10 = vector.shape_cast %9 : vector<1x4x128xbf16> to vector<4x128xbf16>
    %cst_13 = arith.constant dense<0.000000e+00> : vector<288x128xf32>
    %11 = tpu.matmul %8, %10, %cst_13 {dimension_numbers = #tpu.dot_dimension_numbers<[1], [0], [0], [1], [0, 0, 1, 1], [], []>} : vector<288x4xbf16>, vector<4x128xbf16>, vector<288x128xf32> -> vector<288x128xf32>
    %12 = arith.addf %6, %11 : vector<288x128xf32>
    %c0_14 = arith.constant 0 : index
    %c0_15 = arith.constant 0 : index
    %c2 = arith.constant 2 : index
    %c0_16 = arith.constant 0 : index
    %13 = vector.load %arg2[%c0_14, %c0_15, %c2, %c0_16] : memref<1x1x342x4xbf16, #tpu.memory_space<vmem>>, vector<1x1x288x4xbf16>
    %14 = vector.shape_cast %13 : vector<1x1x288x4xbf16> to vector<288x4xbf16>
    %c2_17 = arith.constant 2 : index
    %c0_18 = arith.constant 0 : index
    %c0_19 = arith.constant 0 : index
    %15 = vector.load %arg3[%c2_17, %c0_18, %c0_19] : memref<9x4x128xbf16, #tpu.memory_space<vmem>>, vector<1x4x128xbf16>
    %16 = vector.shape_cast %15 : vector<1x4x128xbf16> to vector<4x128xbf16>
    %cst_20 = arith.constant dense<0.000000e+00> : vector<288x128xf32>
    %17 = tpu.matmul %14, %16, %cst_20 {dimension_numbers = #tpu.dot_dimension_numbers<[1], [0], [0], [1], [0, 0, 1, 1], [], []>} : vector<288x4xbf16>, vector<4x128xbf16>, vector<288x128xf32> -> vector<288x128xf32>
    %18 = arith.addf %12, %17 : vector<288x128xf32>
    %c0_21 = arith.constant 0 : index
    %c0_22 = arith.constant 0 : index
    %c18 = arith.constant 18 : index
    %c0_23 = arith.constant 0 : index
    %19 = vector.load %arg2[%c0_21, %c0_22, %c18, %c0_23] : memref<1x1x342x4xbf16, #tpu.memory_space<vmem>>, vector<1x1x288x4xbf16>
    %20 = vector.shape_cast %19 : vector<1x1x288x4xbf16> to vector<288x4xbf16>
    %c3 = arith.constant 3 : index
    %c0_24 = arith.constant 0 : index
    %c0_25 = arith.constant 0 : index
    %21 = vector.load %arg3[%c3, %c0_24, %c0_25] : memref<9x4x128xbf16, #tpu.memory_space<vmem>>, vector<1x4x128xbf16>
    %22 = vector.shape_cast %21 : vector<1x4x128xbf16> to vector<4x128xbf16>
    %cst_26 = arith.constant dense<0.000000e+00> : vector<288x128xf32>
    %23 = tpu.matmul %20, %22, %cst_26 {dimension_numbers = #tpu.dot_dimension_numbers<[1], [0], [0], [1], [0, 0, 1, 1], [], []>} : vector<288x4xbf16>, vector<4x128xbf16>, vector<288x128xf32> -> vector<288x128xf32>
    %24 = arith.addf %18, %23 : vector<288x128xf32>
    %c0_27 = arith.constant 0 : index
    %c0_28 = arith.constant 0 : index
    %c19 = arith.constant 19 : index
    %c0_29 = arith.constant 0 : index
    %25 = vector.load %arg2[%c0_27, %c0_28, %c19, %c0_29] : memref<1x1x342x4xbf16, #tpu.memory_space<vmem>>, vector<1x1x288x4xbf16>
    %26 = vector.shape_cast %25 : vector<1x1x288x4xbf16> to vector<288x4xbf16>
    %c4 = arith.constant 4 : index
    %c0_30 = arith.constant 0 : index
    %c0_31 = arith.constant 0 : index
    %27 = vector.load %arg3[%c4, %c0_30, %c0_31] : memref<9x4x128xbf16, #tpu.memory_space<vmem>>, vector<1x4x128xbf16>
    %28 = vector.shape_cast %27 : vector<1x4x128xbf16> to vector<4x128xbf16>
    %cst_32 = arith.constant dense<0.000000e+00> : vector<288x128xf32>
    %29 = tpu.matmul %26, %28, %cst_32 {dimension_numbers = #tpu.dot_dimension_numbers<[1], [0], [0], [1], [0, 0, 1, 1], [], []>} : vector<288x4xbf16>, vector<4x128xbf16>, vector<288x128xf32> -> vector<288x128xf32>
    %30 = arith.addf %24, %29 : vector<288x128xf32>
    %c0_33 = arith.constant 0 : index
    %c0_34 = arith.constant 0 : index
    %c20 = arith.constant 20 : index
    %c0_35 = arith.constant 0 : index
    %31 = vector.load %arg2[%c0_33, %c0_34, %c20, %c0_35] : memref<1x1x342x4xbf16, #tpu.memory_space<vmem>>, vector<1x1x288x4xbf16>
    %32 = vector.shape_cast %31 : vector<1x1x288x4xbf16> to vector<288x4xbf16>
    %c5 = arith.constant 5 : index
    %c0_36 = arith.constant 0 : index
    %c0_37 = arith.constant 0 : index
    %33 = vector.load %arg3[%c5, %c0_36, %c0_37] : memref<9x4x128xbf16, #tpu.memory_space<vmem>>, vector<1x4x128xbf16>
    %34 = vector.shape_cast %33 : vector<1x4x128xbf16> to vector<4x128xbf16>
    %cst_38 = arith.constant dense<0.000000e+00> : vector<288x128xf32>
    %35 = tpu.matmul %32, %34, %cst_38 {dimension_numbers = #tpu.dot_dimension_numbers<[1], [0], [0], [1], [0, 0, 1, 1], [], []>} : vector<288x4xbf16>, vector<4x128xbf16>, vector<288x128xf32> -> vector<288x128xf32>
    %36 = arith.addf %30, %35 : vector<288x128xf32>
    %c0_39 = arith.constant 0 : index
    %c0_40 = arith.constant 0 : index
    %c36 = arith.constant 36 : index
    %c0_41 = arith.constant 0 : index
    %37 = vector.load %arg2[%c0_39, %c0_40, %c36, %c0_41] : memref<1x1x342x4xbf16, #tpu.memory_space<vmem>>, vector<1x1x288x4xbf16>
    %38 = vector.shape_cast %37 : vector<1x1x288x4xbf16> to vector<288x4xbf16>
    %c6 = arith.constant 6 : index
    %c0_42 = arith.constant 0 : index
    %c0_43 = arith.constant 0 : index
    %39 = vector.load %arg3[%c6, %c0_42, %c0_43] : memref<9x4x128xbf16, #tpu.memory_space<vmem>>, vector<1x4x128xbf16>
    %40 = vector.shape_cast %39 : vector<1x4x128xbf16> to vector<4x128xbf16>
    %cst_44 = arith.constant dense<0.000000e+00> : vector<288x128xf32>
    %41 = tpu.matmul %38, %40, %cst_44 {dimension_numbers = #tpu.dot_dimension_numbers<[1], [0], [0], [1], [0, 0, 1, 1], [], []>} : vector<288x4xbf16>, vector<4x128xbf16>, vector<288x128xf32> -> vector<288x128xf32>
    %42 = arith.addf %36, %41 : vector<288x128xf32>
    %c0_45 = arith.constant 0 : index
    %c0_46 = arith.constant 0 : index
    %c37 = arith.constant 37 : index
    %c0_47 = arith.constant 0 : index
    %43 = vector.load %arg2[%c0_45, %c0_46, %c37, %c0_47] : memref<1x1x342x4xbf16, #tpu.memory_space<vmem>>, vector<1x1x288x4xbf16>
    %44 = vector.shape_cast %43 : vector<1x1x288x4xbf16> to vector<288x4xbf16>
    %c7 = arith.constant 7 : index
    %c0_48 = arith.constant 0 : index
    %c0_49 = arith.constant 0 : index
    %45 = vector.load %arg3[%c7, %c0_48, %c0_49] : memref<9x4x128xbf16, #tpu.memory_space<vmem>>, vector<1x4x128xbf16>
    %46 = vector.shape_cast %45 : vector<1x4x128xbf16> to vector<4x128xbf16>
    %cst_50 = arith.constant dense<0.000000e+00> : vector<288x128xf32>
    %47 = tpu.matmul %44, %46, %cst_50 {dimension_numbers = #tpu.dot_dimension_numbers<[1], [0], [0], [1], [0, 0, 1, 1], [], []>} : vector<288x4xbf16>, vector<4x128xbf16>, vector<288x128xf32> -> vector<288x128xf32>
    %48 = arith.addf %42, %47 : vector<288x128xf32>
    %c0_51 = arith.constant 0 : index
    %c0_52 = arith.constant 0 : index
    %c38 = arith.constant 38 : index
    %c0_53 = arith.constant 0 : index
    %49 = vector.load %arg2[%c0_51, %c0_52, %c38, %c0_53] : memref<1x1x342x4xbf16, #tpu.memory_space<vmem>>, vector<1x1x288x4xbf16>
    %50 = vector.shape_cast %49 : vector<1x1x288x4xbf16> to vector<288x4xbf16>
    %c8 = arith.constant 8 : index
    %c0_54 = arith.constant 0 : index
    %c0_55 = arith.constant 0 : index
    %51 = vector.load %arg3[%c8, %c0_54, %c0_55] : memref<9x4x128xbf16, #tpu.memory_space<vmem>>, vector<1x4x128xbf16>
    %52 = vector.shape_cast %51 : vector<1x4x128xbf16> to vector<4x128xbf16>
    %cst_56 = arith.constant dense<0.000000e+00> : vector<288x128xf32>
    %53 = tpu.matmul %50, %52, %cst_56 {dimension_numbers = #tpu.dot_dimension_numbers<[1], [0], [0], [1], [0, 0, 1, 1], [], []>} : vector<288x4xbf16>, vector<4x128xbf16>, vector<288x128xf32> -> vector<288x128xf32>
    %54 = arith.addf %48, %53 : vector<288x128xf32>
    %c0_57 = arith.constant 0 : index
    %c0_58 = arith.constant 0 : index
    %55 = vector.load %arg5[%c0_57, %c0_58] : memref<288x1xf32, #tpu.memory_space<vmem>>, vector<288x1xf32>
    %56 = vector.broadcast %55 : vector<288x1xf32> to vector<288x128xf32>
    %57 = arith.mulf %54, %56 : vector<288x128xf32>
    %cst_59 = arith.constant dense<0.000000e+00> : vector<128xf32>
    %58 = vector.multi_reduction <add>, %57, %cst_59 [0] : vector<288x128xf32> to vector<128xf32>
    %59 = vector.shape_cast %58 : vector<128xf32> to vector<1x128xf32>
    %60 = arith.mulf %57, %54 : vector<288x128xf32>
    %cst_60 = arith.constant dense<0.000000e+00> : vector<128xf32>
    %61 = vector.multi_reduction <add>, %60, %cst_60 [0] : vector<288x128xf32> to vector<128xf32>
    %62 = vector.shape_cast %61 : vector<128xf32> to vector<1x128xf32>
    %63 = tpu.concatenate %59, %62 in 0 : vector<1x128xf32>, vector<1x128xf32> -> vector<2x128xf32>
    %c0_61 = arith.constant 0 : index
    %c0_62 = arith.constant 0 : index
    %c0_63 = arith.constant 0 : index
    %c0_64 = arith.constant 0 : index
    %64 = vector.load %arg7[%c0_61, %c0_62, %c0_63, %c0_64] : memref<1x1x2x128xf32, #tpu.memory_space<vmem>>, vector<1x1x2x128xf32>
    %65 = vector.shape_cast %64 : vector<1x1x2x128xf32> to vector<2x128xf32>
    %66 = vector.shape_cast %63 : vector<2x128xf32> to vector<1x1x2x128xf32>
    tpu.vector_store %arg7[%c0_61, %c0_62, %c0_63, %c0_64], %66 {strides = array<i32>} : memref<1x1x2x128xf32, #tpu.memory_space<vmem>>, vector<1x1x2x128xf32>,
    %c0_65 = arith.constant 0 : index
    %c0_66 = arith.constant 0 : index
    %67 = vector.load %arg4[%c0_65, %c0_66] : memref<1x128xf32, #tpu.memory_space<vmem>>, vector<1x128xf32>
    %68 = vector.broadcast %67 : vector<1x128xf32> to vector<288x128xf32>
    %69 = arith.addf %54, %68 : vector<288x128xf32>
    %70 = arith.truncf %69 : vector<288x128xf32> to vector<288x128xbf16>
    %c0_67 = arith.constant 0 : index
    %c0_68 = arith.constant 0 : index
    %c0_69 = arith.constant 0 : index
    %71 = vector.load %arg6[%c0_67, %c0_68, %c0_69] : memref<1x288x128xbf16, #tpu.memory_space<vmem>>, vector<1x288x128xbf16>
    %72 = vector.shape_cast %71 : vector<1x288x128xbf16> to vector<288x128xbf16>
    %73 = vector.shape_cast %70 : vector<288x128xbf16> to vector<1x288x128xbf16>
    tpu.vector_store %arg6[%c0_67, %c0_68, %c0_69], %73 {strides = array<i32>} : memref<1x288x128xbf16, #tpu.memory_space<vmem>>, vector<1x288x128xbf16>,
    return
  }
  func.func @transform_0(%arg0: i32, %arg1: i32) -> (i32, i32, i32, i32) {
    %c0_i32 = arith.constant 0 : i32
    %c0_i32_0 = arith.constant 0 : i32
    %c0_i32_1 = arith.constant 0 : i32
    return %arg0, %arg1, %c0_i32, %c0_i32_0 : i32, i32, i32, i32
  }
  func.func @transform_1(%arg0: i32, %arg1: i32) -> (i32, i32, i32) {
    %c0_i32 = arith.constant 0 : i32
    %c0_i32_0 = arith.constant 0 : i32
    %c0_i32_1 = arith.constant 0 : i32
    %c0_i32_2 = arith.constant 0 : i32
    return %c0_i32, %c0_i32_0, %c0_i32_1 : i32, i32, i32
  }
  func.func @transform_2(%arg0: i32, %arg1: i32) -> (i32, i32) {
    %c0_i32 = arith.constant 0 : i32
    %c0_i32_0 = arith.constant 0 : i32
    %c0_i32_1 = arith.constant 0 : i32
    return %c0_i32, %c0_i32_0 : i32, i32
  }
  func.func @transform_3(%arg0: i32, %arg1: i32) -> (i32, i32) {
    %c0_i32 = arith.constant 0 : i32
    %c0_i32_0 = arith.constant 0 : i32
    %c0_i32_1 = arith.constant 0 : i32
    return %c0_i32, %c0_i32_0 : i32, i32
  }
  func.func @transform_4(%arg0: i32, %arg1: i32) -> (i32, i32, i32) {
    %c0_i32 = arith.constant 0 : i32
    %c0_i32_0 = arith.constant 0 : i32
    return %arg0, %arg1, %c0_i32 : i32, i32, i32
  }
  func.func @transform_5(%arg0: i32, %arg1: i32) -> (i32, i32, i32, i32) {
    %c0_i32 = arith.constant 0 : i32
    %c0_i32_0 = arith.constant 0 : i32
    %c0_i32_1 = arith.constant 0 : i32
    return %arg0, %arg1, %c0_i32, %c0_i32_0 : i32, i32, i32, i32
  }
}

module attributes {stable_mosaic.version = 11 : i64} {
  func.func @_bn_finalize_kernel(%arg0: memref<2x2x128xf32, #tpu.memory_space<vmem>>, %arg1: memref<1x128xf32, #tpu.memory_space<vmem>>, %arg2: memref<1x128xf32, #tpu.memory_space<vmem>>, %arg3: memref<1x128xf32, #tpu.memory_space<vmem>>, %arg4: memref<2x128xf32, #tpu.memory_space<vmem>>) attributes {dimension_semantics = [], scalar_prefetch = 0 : i64, scratch_operands = 0 : i64, tpu.core_type = #tpu.core_type<tc>} {
    %c0 = arith.constant 0 : index
    %c0_0 = arith.constant 0 : index
    %c0_1 = arith.constant 0 : index
    %0 = vector.load %arg0[%c0, %c0_0, %c0_1] : memref<2x2x128xf32, #tpu.memory_space<vmem>>, vector<2x2x128xf32>
    %cst = arith.constant dense<0.000000e+00> : vector<2x128xf32>
    %1 = vector.multi_reduction <add>, %0, %cst [0] : vector<2x2x128xf32> to vector<2x128xf32>
    %2 = vector.extract_strided_slice %1 {offsets = [0, 0], sizes = [1, 128], strides = [1, 1]} : vector<2x128xf32> to vector<1x128xf32>
    %cst_2 = arith.constant 0.001953125 : f32
    %3 = vector.broadcast %cst_2 : f32 to vector<1x128xf32>
    %4 = arith.mulf %2, %3 : vector<1x128xf32>
    %5 = vector.extract_strided_slice %1 {offsets = [1, 0], sizes = [1, 128], strides = [1, 1]} : vector<2x128xf32> to vector<1x128xf32>
    %cst_3 = arith.constant 0.001953125 : f32
    %6 = vector.broadcast %cst_3 : f32 to vector<1x128xf32>
    %7 = arith.mulf %5, %6 : vector<1x128xf32>
    %8 = arith.mulf %4, %4 : vector<1x128xf32>
    %9 = arith.subf %7, %8 : vector<1x128xf32>
    %cst_4 = arith.constant 9.99999974E-6 : f32
    %10 = vector.broadcast %cst_4 : f32 to vector<1x128xf32>
    %11 = arith.addf %9, %10 : vector<1x128xf32>
    %12 = math.rsqrt %11 : vector<1x128xf32>
    %c0_5 = arith.constant 0 : index
    %c0_6 = arith.constant 0 : index
    %13 = vector.load %arg2[%c0_5, %c0_6] : memref<1x128xf32, #tpu.memory_space<vmem>>, vector<1x128xf32>
    %14 = arith.mulf %13, %12 : vector<1x128xf32>
    %c0_7 = arith.constant 0 : index
    %c0_8 = arith.constant 0 : index
    %15 = vector.load %arg3[%c0_7, %c0_8] : memref<1x128xf32, #tpu.memory_space<vmem>>, vector<1x128xf32>
    %c0_9 = arith.constant 0 : index
    %c0_10 = arith.constant 0 : index
    %16 = vector.load %arg1[%c0_9, %c0_10] : memref<1x128xf32, #tpu.memory_space<vmem>>, vector<1x128xf32>
    %17 = arith.addf %4, %16 : vector<1x128xf32>
    %18 = arith.mulf %17, %14 : vector<1x128xf32>
    %19 = arith.subf %15, %18 : vector<1x128xf32>
    %20 = tpu.concatenate %14, %19 in 0 : vector<1x128xf32>, vector<1x128xf32> -> vector<2x128xf32>
    %c0_11 = arith.constant 0 : index
    %c0_12 = arith.constant 0 : index
    %21 = vector.load %arg4[%c0_11, %c0_12] : memref<2x128xf32, #tpu.memory_space<vmem>>, vector<2x128xf32>
    tpu.vector_store %arg4[%c0_11, %c0_12], %20 {strides = array<i32>} : memref<2x128xf32, #tpu.memory_space<vmem>>, vector<2x128xf32>,
    return
  }
}

module attributes {stable_mosaic.version = 11 : i64} {
  func.func @_bn_elu_kernel(%arg0: i32, %arg1: i32, %arg2: memref<1x288x128xbf16, #tpu.memory_space<vmem>>, %arg3: memref<2x128xf32, #tpu.memory_space<vmem>>, %arg4: memref<1x288x128xbf16, #tpu.memory_space<vmem>>) attributes {dimension_semantics = [#tpu.dimension_semantics<parallel>, #tpu.dimension_semantics<parallel>], iteration_bounds = array<i64: 2, 1>, scalar_prefetch = 0 : i64, scratch_operands = 0 : i64, tpu.core_type = #tpu.core_type<tc>, window_params = [{transform_indices = @transform_0, window_bounds = array<i64: 1, 288, 128>}, {pipeline_mode = #tpu.pipeline_mode<synchronous>, transform_indices = @transform_1, window_bounds = array<i64: 2, 128>}, {transform_indices = @transform_2, window_bounds = array<i64: 1, 288, 128>}]} {
    %c0 = arith.constant 0 : index
    %c0_0 = arith.constant 0 : index
    %c0_1 = arith.constant 0 : index
    %0 = vector.load %arg2[%c0, %c0_0, %c0_1] : memref<1x288x128xbf16, #tpu.memory_space<vmem>>, vector<1x288x128xbf16>
    %1 = vector.shape_cast %0 : vector<1x288x128xbf16> to vector<288x128xbf16>
    %2 = arith.extf %1 : vector<288x128xbf16> to vector<288x128xf32>
    %c0_2 = arith.constant 0 : index
    %c0_3 = arith.constant 0 : index
    %3 = vector.load %arg3[%c0_2, %c0_3] : memref<2x128xf32, #tpu.memory_space<vmem>>, vector<1x128xf32>
    %4 = vector.broadcast %3 : vector<1x128xf32> to vector<288x128xf32>
    %5 = arith.mulf %2, %4 : vector<288x128xf32>
    %c1 = arith.constant 1 : index
    %c0_4 = arith.constant 0 : index
    %6 = vector.load %arg3[%c1, %c0_4] : memref<2x128xf32, #tpu.memory_space<vmem>>, vector<1x128xf32>
    %7 = vector.broadcast %6 : vector<1x128xf32> to vector<288x128xf32>
    %8 = arith.addf %5, %7 : vector<288x128xf32>
    %cst = arith.constant 0.000000e+00 : f32
    %9 = vector.broadcast %cst : f32 to vector<288x128xf32>
    %10 = arith.cmpf ogt, %8, %9 : vector<288x128xf32>
    %cst_5 = arith.constant 0.000000e+00 : f32
    %11 = vector.broadcast %cst_5 : f32 to vector<288x128xf32>
    %12 = arith.minimumf %8, %11 : vector<288x128xf32>
    %13 = math.exp %12 : vector<288x128xf32>
    %cst_6 = arith.constant 1.000000e+00 : f32
    %14 = vector.broadcast %cst_6 : f32 to vector<288x128xf32>
    %15 = arith.subf %13, %14 : vector<288x128xf32>
    %16 = arith.select %10, %8, %15 : vector<288x128xi1>, vector<288x128xf32>
    %17 = arith.truncf %16 : vector<288x128xf32> to vector<288x128xbf16>
    %c0_7 = arith.constant 0 : index
    %c0_8 = arith.constant 0 : index
    %c0_9 = arith.constant 0 : index
    %18 = vector.load %arg4[%c0_7, %c0_8, %c0_9] : memref<1x288x128xbf16, #tpu.memory_space<vmem>>, vector<1x288x128xbf16>
    %19 = vector.shape_cast %18 : vector<1x288x128xbf16> to vector<288x128xbf16>
    %20 = vector.shape_cast %17 : vector<288x128xbf16> to vector<1x288x128xbf16>
    tpu.vector_store %arg4[%c0_7, %c0_8, %c0_9], %20 {strides = array<i32>} : memref<1x288x128xbf16, #tpu.memory_space<vmem>>, vector<1x288x128xbf16>,
    return
  }
  func.func @transform_0(%arg0: i32, %arg1: i32) -> (i32, i32, i32) {
    %c0_i32 = arith.constant 0 : i32
    %c0_i32_0 = arith.constant 0 : i32
    return %arg0, %arg1, %c0_i32 : i32, i32, i32
  }
  func.func @transform_1(%arg0: i32, %arg1: i32) -> (i32, i32) {
    %c0_i32 = arith.constant 0 : i32
    %c0_i32_0 = arith.constant 0 : i32
    %c0_i32_1 = arith.constant 0 : i32
    return %c0_i32, %c0_i32_0 : i32, i32
  }
  func.func @transform_2(%arg0: i32, %arg1: i32) -> (i32, i32, i32) {
    %c0_i32 = arith.constant 0 : i32
    %c0_i32_0 = arith.constant 0 : i32
    return %arg0, %arg1, %c0_i32 : i32, i32, i32
  }
}

</mosaic_0001>

<bundles_post_ra>
// kernel: conv_bn_elu.4
= control target key start
LH: loop header
LB: loop body
LE: loop exit
PB: predicated region body
PF: predicated region fallthrough
CT: control target
= control target key end

     0   :  { %vm19_vm0 = vcmask 1041408   ;;  %v71_v10 = vmov 1966171168   ;;  %v36_v12 = vlaneseq  ;;  %vm61_vm1 = vcmask 1040384   ;;  %s115_s0 = inlined_call_operand.vmem [shape: f32[2,2,128], index: 0, kind: input, shape index: {}]   ;;  %s116_s1 = inlined_call_operand.vmem [shape: f32[1,128], index: 1, kind: input, shape index: {}]   ;;  %s117_s2 = inlined_call_operand.vmem [shape: f32[1,128], index: 2, kind: input, shape index: {}]   ;;  %s118_s3 = inlined_call_operand.vmem [shape: f32[1,128], index: 3, kind: input, shape index: {}]   ;;  %s119_s4 = inlined_call_operand.vmem [shape: f32[2,128], index: 4, kind: output, shape index: {}]  }
   0x1   :  { %v17_v0 = vld [vmem:[%s115_s0] sm:$0x3]  ;;  %v18_v1 = vld [vmem:[%s115_s0 + $0x2] sm:$0x3]  ;;  %v34_v11 = vunpack.c.l.s4 %v71_v10 }
   0x2   :  { %v20_v2 = vsel %vm19_vm0, %v17_v0, 0.0  ;;  %v21_v3 = vsel %vm19_vm0, %v18_v1, 0.0  ;;  %v37_v14 = vshrl.u32 %v36_v12, 7  ;;  %v51_v18 = vld [vmem:[%s116_s1] sm:$0x1] }
   0x3   :  { %v22_v4 = vadd.f32 %v21_v3, %v20_v2  ;;  %v35_v13 = vunpack.c.0.s8 %v34_v11  ;;  %v31_v20 = vld [vmem:[%s117_s2] sm:$0x1] }
   0x4   :  { %v50_v24 = vld [vmem:[%s118_s3] sm:$0x1]  ;;  %v58_v26 = vsub.s32 0, %v37_v14 }
   0x5   :  { %v23_v5 = vmul.f32 0.001953125, %v22_v4  ;;  %v38_v15 = vsub.s32 %v35_v13, %v37_v14 }
   0x7   :  { %v24_v6 = vmul.f32 %v23_v5, %v23_v5  ;;  %v52_v22 = vadd.f32 %v51_v18, %v23_v5 }
   0x9   :  { %v26_v7 = vrot.slane %v24_v6, 7 }
   0xb   :  { %v28_v8 = vsub.f32 %v23_v5, %v26_v7 }
   0xd   :  { %v29_v9 = vadd.f32 1e-05, %v28_v8 }
   0xf   :  { %69 = vrsqrt.f32 %v29_v9 }
  0x19   :  { %v70_v16 = vpop.eup %69 }
  0x1a   :  { %v39_v17 = vrot.slane %v70_v16, %v38_v15 }
  0x1c   :  { %v40_v19 = vcombine.high %v39_v17, %v39_v17 }
  0x1e   :  { %v47_v21 = vrot.slane %v40_v19, %v38_v15 }
  0x20   :  { %v49_v23 = vmul.f32 %v47_v21, %v31_v20 }
  0x22   :  { %v53_v25 = vmul.f32 %v52_v22, %v49_v23 }
  0x24   :  { %v54_v27 = vsub.f32 %v50_v24, %v53_v25 }
  0x26   :  { %v59_v28 = vrot.slane %v54_v27, %v58_v26 }
  0x28   :  { %v62_v29 = vsel %vm61_vm1, %v49_v23, %v59_v28 }
  0x29   :  { %63 = vst [vmem:[%s119_s4] sm:$0x3] %v62_v29 }

// kernel: conv_bn_elu.5
= control target key start
LH: loop header
LB: loop body
LE: loop exit
PB: predicated region body
PF: predicated region fallthrough
CT: control target
= control target key end

     0   :  { %s1271_s9 = smov 0   ;;  %s1273_s10 = smov 0   ;;  %s1643_s0 = inlined_call_operand.vmem [shape: bf16[2,288,128], index: 0, kind: input, shape index: {}]   ;;  %s1644_s1 = inlined_call_operand.vmem [shape: f32[2,128], index: 1, kind: input, shape index: {}]   ;;  %s1645_s2 = inlined_call_operand.vmem [shape: bf16[2,288,128], index: 2, kind: output, shape index: {}]  }
   0x1   :  { %s1275_s11 = smov 0  }
   0x2 LB: > { %s24_s12 = sadd.s32 1, %s1250_s10  ;;  %p824_p0 = scmp.ge.s32.totalorder %s1254_s11, 1  ;;  %s1254_s11 = sphi %s1275_s11, %s12_s11   ;;  %s1250_s10 = sphi %s1273_s10, %s1647_s10   ;;  %s1246_s9 = sphi %s1271_s9, %s1646_s9  }
   0x3   : > { %p26_p1 = scmp.ge.s32.totalorder %s24_s12, 2  ;;  %p133_p2 = scmp.lt.s32.totalorder %s1254_s11, 3 }
   0x5   : > { %s1649_s12 = smov (%p26_p1, %s24_s12), 0  ;;  %p134_p3 = pnand %p824_p0, %p133_p2 }
   0x6   : > { %p164_p4 = scmp.lt.s32.totalorder (!%p134_p3), %s1246_s9, 1  ;;  %v1302_v0 = vld [vmem:[%s1644_s1] ss:$0 sm:$0xff] (!%p134_p3)  ;;  %v1311_v9 = vld [vmem:[%s1644_s1 + $0x1] ss:$0 sm:$0xff] (!%p134_p3) }
   0x7   : > { %137 = sbr.rel (%p134_p3) target bundleno = 117 (0x75), region = 28 }
   0xe   : > { %s1651_s9 = smov (!%p164_p4, %s1246_s9), 1 }
   0xf   : > { %s1135_s13 = smul.u32 144, %s1651_s9 }
  0x11   : > { %s1297_s16 = scalar_lea.vmem %s1643_s0, %s1135_s13  ;;  %s1402_s23 = scalar_lea.vmem %s1645_s2, %s1135_s13 }
  0x12   : > { %v940_v1 = vld [vmem:[%s1297_s16] sm:$0xff]   ;;  %v1101_v2 = vld [vmem:[%s1297_s16 + $0x8] sm:$0xff]   ;;  %v1102_v3 = vld [vmem:[%s1297_s16 + $0x10] sm:$0xff]  }
  0x13   : > { %v941_v4 = vunpack.c.l.bf16 %v940_v1  ;;  %v942_v5 = vunpack.c.h.bf16 %v940_v1  ;;  %v945_v6 = vunpack.c.l.bf16 %v1101_v2  ;;  %v946_v7 = vunpack.c.h.bf16 %v1101_v2  ;;  %v1103_v8 = vld [vmem:[%s1297_s16 + $0x18] sm:$0xff]   ;;  %v1104_v36 = vld [vmem:[%s1297_s16 + $0x20] sm:$0xff]   ;;  %v1105_v42 = vld [vmem:[%s1297_s16 + $0x28] sm:$0xff]  }
  0x14   : > { %v949_v10 = vunpack.c.l.bf16 %v1102_v3  ;;  %v950_v11 = vunpack.c.h.bf16 %v1102_v3  ;;  %v953_v12 = vunpack.c.l.bf16 %v1103_v8  ;;  %v954_v13 = vunpack.c.h.bf16 %v1103_v8  ;;  %v1106_v46 = vld [vmem:[%s1297_s16 + $0x30] sm:$0xff]  }
  0x15   : > { %v260_v14 = vmul.f32 %v941_v4, %v1302_v0  ;;  %v261_v15 = vmul.f32 %v942_v5, %v1302_v0  ;;  %v262_v16 = vmul.f32 %v945_v6, %v1302_v0  ;;  %v263_v17 = vmul.f32 %v946_v7, %v1302_v0  ;;  %v1107_v6 = vld [vmem:[%s1297_s16 + $0x38] sm:$0xff]  }
  0x16   : > { %v264_v18 = vmul.f32 %v949_v10, %v1302_v0  ;;  %v265_v19 = vmul.f32 %v950_v11, %v1302_v0  ;;  %v266_v20 = vmul.f32 %v953_v12, %v1302_v0  ;;  %v267_v21 = vmul.f32 %v954_v13, %v1302_v0 }
  0x17   : > { %v1322_v22 = vadd.f32 %v1311_v9, %v260_v14  ;;  %v1325_v23 = vadd.f32 %v1311_v9, %v261_v15  ;;  %v1328_v24 = vadd.f32 %v1311_v9, %v262_v16  ;;  %v1331_v25 = vadd.f32 %v1311_v9, %v263_v17 }
  0x18   : > { %v1334_v26 = vadd.f32 %v1311_v9, %v264_v18  ;;  %v1337_v27 = vadd.f32 %v1311_v9, %v265_v19  ;;  %v1342_v30 = vadd.f32 %v1311_v9, %v266_v20  ;;  %v1347_v33 = vadd.f32 %v1311_v9, %v267_v21 }
  0x19   : > { %v373_v28 = vmin.f32 %v1322_v22, 0.0  ;;  %v374_v29 = vmin.f32 %v1325_v23, 0.0  ;;  %v375_v31 = vmin.f32 %v1328_v24, 0.0  ;;  %v376_v32 = vmin.f32 %v1331_v25, 0.0 }
  0x1a   : > { %v377_v39 = vmin.f32 %v1334_v26, 0.0  ;;  %v378_v40 = vmin.f32 %v1337_v27, 0.0  ;;  %v379_v41 = vmin.f32 %v1342_v30, 0.0  ;;  %v380_v45 = vmin.f32 %v1347_v33, 0.0 }
  0x1b   : > { %v409_v34 = vmul.f32 1.442695, %v373_v28  ;;  %v411_v35 = vmul.f32 1.442695, %v374_v29  ;;  %v413_v37 = vmul.f32 1.442695, %v375_v31  ;;  %v957_v48 = vunpack.c.l.bf16 %v1104_v36 }
  0x1c   : > { %v415_v38 = vmul.f32 1.442695, %v376_v32  ;;  %v417_v43 = vmul.f32 1.442695, %v377_v39  ;;  %v419_v44 = vmul.f32 1.442695, %v378_v40  ;;  %v958_v49 = vunpack.c.h.bf16 %v1104_v36 }
  0x1d   : > { %1160 = vpow2.f32 %v409_v34  ;;  %vm337_vm0 = vcmp.gt.f32.partialorder %v1322_v22, 0.0  ;;  %v421_v47 = vmul.f32 1.442695, %v379_v41  ;;  %vm338_vm1 = vcmp.gt.f32.partialorder %v1325_v23, 0.0 }
  0x1e   : > { %1162 = vpow2.f32 %v411_v35  ;;  %v423_v50 = vmul.f32 1.442695, %v380_v45  ;;  %v961_v51 = vunpack.c.l.bf16 %v1105_v42  ;;  %v962_v52 = vunpack.c.h.bf16 %v1105_v42 }
  0x1f   : > { %1164 = vpow2.f32 %v413_v37  ;;  %v268_v53 = vmul.f32 %v957_v48, %v1302_v0  ;;  %v269_v54 = vmul.f32 %v958_v49, %v1302_v0  ;;  %v965_v55 = vunpack.c.l.bf16 %v1106_v46 }
  0x20   : > { %1166 = vpow2.f32 %v415_v38  ;;  %v270_v56 = vmul.f32 %v961_v51, %v1302_v0  ;;  %v271_v57 = vmul.f32 %v962_v52, %v1302_v0  ;;  %v966_v58 = vunpack.c.h.bf16 %v1106_v46 }
  0x21   : > { %1168 = vpow2.f32 %v417_v43  ;;  %v1363_v59 = vadd.f32 %v1311_v9, %v268_v53  ;;  %v1366_v60 = vadd.f32 %v1311_v9, %v269_v54  ;;  %v272_v61 = vmul.f32 %v965_v55, %v1302_v0 }
  0x22   : > { %1170 = vpow2.f32 %v419_v44  ;;  %v1370_v62 = vadd.f32 %v1311_v9, %v270_v56  ;;  %v1373_v63 = vadd.f32 %v1311_v9, %v271_v57  ;;  %v273_v1 = vmul.f32 %v966_v58, %v1302_v0 }
  0x23   : > { %1172 = vpow2.f32 %v421_v47  ;;  %vm339_vm2 = vcmp.gt.f32.partialorder %v1328_v24, 0.0  ;;  %vm340_vm3 = vcmp.gt.f32.partialorder %v1331_v25, 0.0  ;;  %v381_v2 = vmin.f32 %v1363_v59, 0.0  ;;  %v1108_v47 = vld [vmem:[%s1297_s16 + $0x40] sm:$0xff]  }
  0x24   : > { %1174 = vpow2.f32 %v423_v50  ;;  %v382_v3 = vmin.f32 %v1366_v60, 0.0  ;;  %vm341_vm4 = vcmp.gt.f32.partialorder %v1334_v26, 0.0  ;;  %vm342_vm5 = vcmp.gt.f32.partialorder %v1337_v27, 0.0  ;;  %v1109_v50 = vld [vmem:[%s1297_s16 + $0x48] sm:$0xff]  }
  0x25   : > { %v383_v4 = vmin.f32 %v1370_v62, 0.0  ;;  %v384_v5 = vmin.f32 %v1373_v63, 0.0  ;;  %v425_v8 = vmul.f32 1.442695, %v381_v2  ;;  %v1386_v11 = vadd.f32 %v1311_v9, %v272_v61 }
  0x26   : > { %v427_v10 = vmul.f32 1.442695, %v382_v3  ;;  %v1389_v12 = vadd.f32 %v1311_v9, %v273_v1  ;;  %vm343_vm6 = vcmp.gt.f32.partialorder %v1342_v30, 0.0  ;;  %vm344_vm7 = vcmp.gt.f32.partialorder %v1347_v33, 0.0 }
  0x27   : > { %v1161_v7 = vpop.eup %1160  ;;  %v429_v15 = vmul.f32 1.442695, %v383_v4  ;;  %v431_v16 = vmul.f32 1.442695, %v384_v5  ;;  %1176 = vpow2.f32 %v425_v8  ;;  %v969_v19 = vunpack.c.l.bf16 %v1107_v6 }
  0x28   : > { %v1163_v13 = vpop.eup %1162  ;;  %v829_v14 = vadd.f32 -1.0, %v1161_v7  ;;  %1178 = vpow2.f32 %v427_v10  ;;  %v385_v29 = vmin.f32 %v1386_v11, 0.0  ;;  %vm345_vm8 = vcmp.gt.f32.partialorder %v1363_v59, 0.0 }
  0x29   : > { %v1165_v17 = vpop.eup %1164  ;;  %v830_v18 = vadd.f32 -1.0, %v1163_v13  ;;  %1180 = vpow2.f32 %v429_v15  ;;  %vm346_vm9 = vcmp.gt.f32.partialorder %v1366_v60, 0.0  ;;  %v970_v46 = vunpack.c.h.bf16 %v1107_v6 }
  0x2a   : > { %v1167_v20 = vpop.eup %1166  ;;  %v517_v21 = vsel %vm337_vm0, %v1322_v22, %v829_v14  ;;  %v831_v28 = vadd.f32 -1.0, %v1165_v17  ;;  %v386_v22 = vmin.f32 %v1389_v12, 0.0  ;;  %1182 = vpow2.f32 %v431_v16 }
  0x2b   : > { %v1169_v31 = vpop.eup %1168  ;;  %v518_v32 = vsel %vm338_vm1, %v1325_v23, %v830_v18  ;;  %v832_v34 = vadd.f32 -1.0, %v1167_v20  ;;  %v433_v41 = vmul.f32 1.442695, %v385_v29  ;;  %v274_v49 = vmul.f32 %v969_v19, %v1302_v0 }
  0x2c   : > { %v1171_v35 = vpop.eup %1170  ;;  %v1014_v36 = vpack.c.bf16 %v518_v32, %v517_v21  ;;  %v519_v37 = vsel %vm339_vm2, %v1328_v24, %v831_v28  ;;  %v833_v38 = vadd.f32 -1.0, %v1169_v31  ;;  %v435_v42 = vmul.f32 1.442695, %v386_v22  ;;  %v1110_v28 = vld [vmem:[%s1297_s16 + $0x50] sm:$0xff]  }
  0x2d   : > { %v1173_v39 = vpop.eup %1172  ;;  %v520_v23 = vsel %vm340_vm3, %v1331_v25, %v832_v34  ;;  %v834_v40 = vadd.f32 -1.0, %v1171_v35  ;;  %1184 = vpow2.f32 %v433_v41  ;;  %v973_v54 = vunpack.c.l.bf16 %v1108_v47 }
  0x2e   : > { %v1175_v43 = vpop.eup %1174  ;;  %1015 = vst [vmem:[%s1402_s23] sm:$0xff] %v1014_v36   ;;  %v1019_v44 = vpack.c.bf16 %v520_v23, %v519_v37  ;;  %v521_v24 = vsel %vm341_vm4, %v1334_v26, %v833_v38  ;;  %v835_v45 = vadd.f32 -1.0, %v1173_v39  ;;  %1186 = vpow2.f32 %v435_v42 }
  0x2f   : > { %v522_v48 = vsel %vm342_vm5, %v1337_v27, %v834_v40  ;;  %v836_v25 = vadd.f32 -1.0, %v1175_v43  ;;  %v275_v26 = vmul.f32 %v970_v46, %v1302_v0  ;;  %v1435_v27 = vadd.f32 %v1311_v9, %v274_v49  ;;  %v1111_v43 = vld [vmem:[%s1297_s16 + $0x58] sm:$0xff]   ;;  %v1112_v46 = vld [vmem:[%s1297_s16 + $0x60] sm:$0xff]  }
  0x30   : > { %1118 = vst [vmem:[%s1402_s23 + $0x8] sm:$0xff] %v1019_v44   ;;  %v1024_v51 = vpack.c.bf16 %v522_v48, %v521_v24  ;;  %v523_v52 = vsel %vm343_vm6, %v1342_v30, %v835_v45  ;;  %v974_v55 = vunpack.c.h.bf16 %v1108_v47  ;;  %v977_v58 = vunpack.c.l.bf16 %v1109_v50 }
  0x31   : > { %v524_v53 = vsel %vm344_vm7, %v1347_v33, %v836_v25  ;;  %v1439_v57 = vadd.f32 %v1311_v9, %v275_v26  ;;  %v978_v30 = vunpack.c.h.bf16 %v1109_v50  ;;  %v1177_v61 = vpop.eup %1176  ;;  %vm347_vm10 = vcmp.gt.f32.partialorder %v1370_v62, 0.0 }
  0x32   : > { %1119 = vst [vmem:[%s1402_s23 + $0x10] sm:$0xff] %v1024_v51   ;;  %v1029_v56 = vpack.c.bf16 %v524_v53, %v523_v52  ;;  %v387_v1 = vmin.f32 %v1435_v27, 0.0  ;;  %v276_v2 = vmul.f32 %v973_v54, %v1302_v0  ;;  %v277_v33 = vmul.f32 %v974_v55, %v1302_v0  ;;  %v1179_v3 = vpop.eup %1178 }
  0x33   : > { %v837_v4 = vadd.f32 -1.0, %v1177_v61  ;;  %vm348_vm11 = vcmp.gt.f32.partialorder %v1373_v63, 0.0  ;;  %v388_v5 = vmin.f32 %v1439_v57, 0.0  ;;  %v278_v6 = vmul.f32 %v977_v58, %v1302_v0  ;;  %v1181_v7 = vpop.eup %1180 }
  0x34   : > { %1120 = vst [vmem:[%s1402_s23 + $0x18] sm:$0xff] %v1029_v56   ;;  %v838_v8 = vadd.f32 -1.0, %v1179_v3  ;;  %v437_v10 = vmul.f32 1.442695, %v387_v1  ;;  %v1450_v13 = vadd.f32 %v1311_v9, %v276_v2  ;;  %v1453_v14 = vadd.f32 %v1311_v9, %v277_v33  ;;  %v1183_v15 = vpop.eup %1182  ;;  %v1113_v3 = vld [vmem:[%s1297_s16 + $0x68] sm:$0xff]  }
  0x35   : > { %v525_v16 = vsel %vm345_vm8, %v1363_v59, %v837_v4  ;;  %v839_v17 = vadd.f32 -1.0, %v1181_v7  ;;  %v439_v18 = vmul.f32 1.442695, %v388_v5  ;;  %v279_v19 = vmul.f32 %v978_v30, %v1302_v0 }
  0x36   : > { %v526_v20 = vsel %vm346_vm9, %v1366_v60, %v838_v8  ;;  %v840_v21 = vadd.f32 -1.0, %v1183_v15  ;;  %vm349_vm12 = vcmp.gt.f32.partialorder %v1386_v11, 0.0  ;;  %1188 = vpow2.f32 %v437_v10 }
  0x37   : > { %v1034_v29 = vpack.c.bf16 %v526_v20, %v525_v16  ;;  %v527_v31 = vsel %vm347_vm10, %v1370_v62, %v839_v17  ;;  %vm350_vm13 = vcmp.gt.f32.partialorder %v1389_v12, 0.0  ;;  %1190 = vpow2.f32 %v439_v18  ;;  %v1185_v59 = vpop.eup %1184 }
  0x38   : > { %v528_v32 = vsel %vm348_vm11, %v1373_v63, %v840_v21  ;;  %v389_v60 = vmin.f32 %v1450_v13, 0.0  ;;  %v390_v34 = vmin.f32 %v1453_v14, 0.0  ;;  %v1474_v22 = vadd.f32 %v1311_v9, %v278_v6  ;;  %v1187_v35 = vpop.eup %1186 }
  0x39   : > { %1121 = vst [vmem:[%s1402_s23 + $0x20] sm:$0xff] %v1034_v29   ;;  %v1039_v62 = vpack.c.bf16 %v528_v32, %v527_v31  ;;  %v841_v36 = vadd.f32 -1.0, %v1185_v59  ;;  %v1478_v37 = vadd.f32 %v1311_v9, %v279_v19  ;;  %v981_v38 = vunpack.c.l.bf16 %v1110_v28 }
  0x3a   : > { %v842_v39 = vadd.f32 -1.0, %v1187_v35  ;;  %v441_v23 = vmul.f32 1.442695, %v389_v60  ;;  %v443_v63 = vmul.f32 1.442695, %v390_v34  ;;  %vm351_vm14 = vcmp.gt.f32.partialorder %v1435_v27, 0.0 }
  0x3b   : > { %1122 = vst [vmem:[%s1402_s23 + $0x28] sm:$0xff] %v1039_v62   ;;  %v529_v40 = vsel %vm349_vm12, %v1386_v11, %v841_v36  ;;  %v391_v41 = vmin.f32 %v1474_v22, 0.0  ;;  %v392_v42 = vmin.f32 %v1478_v37, 0.0  ;;  %v982_v24 = vunpack.c.h.bf16 %v1110_v28 }
  0x3c   : > { %v530_v44 = vsel %vm350_vm13, %v1389_v12, %v842_v39  ;;  %1192 = vpow2.f32 %v441_v23  ;;  %v280_v45 = vmul.f32 %v981_v38, %v1302_v0  ;;  %v985_v50 = vunpack.c.l.bf16 %v1111_v43  ;;  %v1114_v38 = vld [vmem:[%s1297_s16 + $0x70] sm:$0xff]  }
  0x3d   : > { %v1044_v47 = vpack.c.bf16 %v530_v44, %v529_v40  ;;  %1194 = vpow2.f32 %v443_v63  ;;  %v445_v11 = vmul.f32 1.442695, %v391_v41  ;;  %v447_v48 = vmul.f32 1.442695, %v392_v42  ;;  %v1115_v41 = vld [vmem:[%s1297_s16 + $0x78] sm:$0xff]  }
  0x3e   : > { %v281_v25 = vmul.f32 %v982_v24, %v1302_v0  ;;  %v1495_v49 = vadd.f32 %v1311_v9, %v280_v45  ;;  %v986_v51 = vunpack.c.h.bf16 %v1111_v43  ;;  %vm352_vm15 = vcmp.gt.f32.partialorder %v1439_v57, 0.0 }
  0x3f   : > { %1123 = vst [vmem:[%s1402_s23 + $0x30] sm:$0xff] %v1044_v47   ;;  %1196 = vpow2.f32 %v445_v11  ;;  %v989_v12 = vunpack.c.l.bf16 %v1112_v46  ;;  %v990_v52 = vunpack.c.h.bf16 %v1112_v46  ;;  %vm353_vm0 = vcmp.gt.f32.partialorder %v1450_v13, 0.0 }
  0x40   : > { %v1189_v26 = vpop.eup %1188  ;;  %1198 = vpow2.f32 %v447_v48  ;;  %v1501_v53 = vadd.f32 %v1311_v9, %v281_v25  ;;  %v393_v54 = vmin.f32 %v1495_v49, 0.0  ;;  %v282_v58 = vmul.f32 %v985_v50, %v1302_v0 }
  0x41   : > { %v1191_v55 = vpop.eup %1190  ;;  %v843_v56 = vadd.f32 -1.0, %v1189_v26  ;;  %v283_v30 = vmul.f32 %v986_v51, %v1302_v0  ;;  %v284_v61 = vmul.f32 %v989_v12, %v1302_v0  ;;  %vm354_vm1 = vcmp.gt.f32.partialorder %v1453_v14, 0.0 }
  0x42   : > { %v844_v1 = vadd.f32 -1.0, %v1191_v55  ;;  %v394_v2 = vmin.f32 %v1501_v53, 0.0  ;;  %v449_v33 = vmul.f32 1.442695, %v393_v54  ;;  %v1514_v5 = vadd.f32 %v1311_v9, %v282_v58 }
  0x43   : > { %v531_v4 = vsel %vm351_vm14, %v1435_v27, %v843_v56  ;;  %v1517_v6 = vadd.f32 %v1311_v9, %v283_v30  ;;  %v285_v7 = vmul.f32 %v990_v52, %v1302_v0  ;;  %v1524_v15 = vadd.f32 %v1311_v9, %v284_v61 }
  0x44   : > { %v532_v8 = vsel %vm352_vm15, %v1439_v57, %v844_v1  ;;  %1200 = vpow2.f32 %v449_v33  ;;  %v451_v10 = vmul.f32 1.442695, %v394_v2  ;;  %vm355_vm2 = vcmp.gt.f32.partialorder %v1474_v22, 0.0 }
  0x45   : > { %v1049_v16 = vpack.c.bf16 %v532_v8, %v531_v4  ;;  %v395_v27 = vmin.f32 %v1514_v5, 0.0  ;;  %v993_v17 = vunpack.c.l.bf16 %v1113_v3  ;;  %vm356_vm3 = vcmp.gt.f32.partialorder %v1478_v37, 0.0 }
  0x46   : > { %v1193_v18 = vpop.eup %1192  ;;  %1202 = vpow2.f32 %v451_v10  ;;  %v396_v19 = vmin.f32 %v1517_v6, 0.0  ;;  %v1531_v20 = vadd.f32 %v1311_v9, %v285_v7  ;;  %v397_v29 = vmin.f32 %v1524_v15, 0.0 }
  0x47   : > { %v1195_v57 = vpop.eup %1194  ;;  %1124 = vst [vmem:[%s1402_s23 + $0x38] sm:$0xff] %v1049_v16   ;;  %v845_v21 = vadd.f32 -1.0, %v1193_v18  ;;  %v453_v28 = vmul.f32 1.442695, %v395_v27  ;;  %v994_v31 = vunpack.c.h.bf16 %v1113_v3  ;;  %vm357_vm4 = vcmp.gt.f32.partialorder %v1495_v49, 0.0  ;;  %v1116_v3 = vld [vmem:[%s1297_s16 + $0x80] sm:$0xff]  }
  0x48   : > { %v846_v59 = vadd.f32 -1.0, %v1195_v57  ;;  %v455_v32 = vmul.f32 1.442695, %v396_v19  ;;  %v398_v60 = vmin.f32 %v1531_v20, 0.0  ;;  %v457_v62 = vmul.f32 1.442695, %v397_v29 }
  0x49   : > { %v1197_v34 = vpop.eup %1196  ;;  %v533_v35 = vsel %vm353_vm0, %v1450_v13, %v845_v21  ;;  %1204 = vpow2.f32 %v453_v28  ;;  %v286_v36 = vmul.f32 %v993_v17, %v1302_v0  ;;  %v287_v13 = vmul.f32 %v994_v31, %v1302_v0 }
  0x4a   : > { %v1199_v39 = vpop.eup %1198  ;;  %v534_v23 = vsel %vm354_vm1, %v1453_v14, %v846_v59  ;;  %v847_v63 = vadd.f32 -1.0, %v1197_v34  ;;  %1206 = vpow2.f32 %v455_v32  ;;  %v459_v40 = vmul.f32 1.442695, %v398_v60  ;;  %v1117_v59 = vld [vmem:[%s1297_s16 + $0x88] sm:$0xff]  }
  0x4b   : > { %v1054_v42 = vpack.c.bf16 %v534_v23, %v533_v35  ;;  %v848_v43 = vadd.f32 -1.0, %v1199_v39  ;;  %1208 = vpow2.f32 %v457_v62  ;;  %v1551_v24 = vadd.f32 %v1311_v9, %v286_v36 }
  0x4c   : > { %v535_v44 = vsel %vm355_vm2, %v1474_v22, %v847_v63  ;;  %1210 = vpow2.f32 %v459_v40  ;;  %v997_v45 = vunpack.c.l.bf16 %v1114_v38  ;;  %v1558_v46 = vadd.f32 %v1311_v9, %v287_v13 }
  0x4d   : > { %1125 = vst [vmem:[%s1402_s23 + $0x40] sm:$0xff] %v1054_v42   ;;  %v536_v14 = vsel %vm356_vm3, %v1478_v37, %v848_v43  ;;  %v998_v47 = vunpack.c.h.bf16 %v1114_v38  ;;  %v1001_v11 = vunpack.c.l.bf16 %v1115_v41  ;;  %vm358_vm5 = vcmp.gt.f32.partialorder %v1501_v53, 0.0 }
  0x4e   : > { %v1201_v48 = vpop.eup %1200  ;;  %v1059_v25 = vpack.c.bf16 %v536_v14, %v535_v44  ;;  %v399_v22 = vmin.f32 %v1551_v24, 0.0  ;;  %v288_v50 = vmul.f32 %v997_v45, %v1302_v0  ;;  %vm359_vm6 = vcmp.gt.f32.partialorder %v1514_v5, 0.0 }
  0x4f   : > { %v849_v51 = vadd.f32 -1.0, %v1201_v48  ;;  %v400_v12 = vmin.f32 %v1558_v46, 0.0  ;;  %v289_v37 = vmul.f32 %v998_v47, %v1302_v0  ;;  %v1002_v55 = vunpack.c.h.bf16 %v1115_v41 }
  0x50   : > { %v1203_v52 = vpop.eup %1202  ;;  %1126 = vst [vmem:[%s1402_s23 + $0x48] sm:$0xff] %v1059_v25   ;;  %v461_v26 = vmul.f32 1.442695, %v399_v22  ;;  %v1568_v54 = vadd.f32 %v1311_v9, %v288_v50  ;;  %v290_v56 = vmul.f32 %v1001_v11, %v1302_v0  ;;  %vm360_vm7 = vcmp.gt.f32.partialorder %v1517_v6, 0.0 }
  0x51   : > { %v850_v58 = vadd.f32 -1.0, %v1203_v52  ;;  %v537_v30 = vsel %vm357_vm4, %v1495_v49, %v849_v51  ;;  %v463_v61 = vmul.f32 1.442695, %v400_v12  ;;  %v1575_v1 = vadd.f32 %v1311_v9, %v289_v37 }
  0x52   : > { %1212 = vpow2.f32 %v461_v26  ;;  %v401_v2 = vmin.f32 %v1568_v54, 0.0  ;;  %v291_v33 = vmul.f32 %v1002_v55, %v1302_v0  ;;  %vm361_vm8 = vcmp.gt.f32.partialorder %v1524_v15, 0.0 }
  0x53   : > { %v1205_v4 = vpop.eup %1204  ;;  %v538_v7 = vsel %vm358_vm5, %v1501_v53, %v850_v58  ;;  %1214 = vpow2.f32 %v463_v61  ;;  %v402_v49 = vmin.f32 %v1575_v1, 0.0  ;;  %v1587_v17 = vadd.f32 %v1311_v9, %v290_v56 }
  0x54   : > { %v1207_v8 = vpop.eup %1206  ;;  %v1064_v10 = vpack.c.bf16 %v538_v7, %v537_v30  ;;  %v851_v16 = vadd.f32 -1.0, %v1205_v4  ;;  %v465_v27 = vmul.f32 1.442695, %v401_v2  ;;  %v1590_v21 = vadd.f32 %v1311_v9, %v291_v33 }
  0x55   : > { %v1209_v18 = vpop.eup %1208  ;;  %v852_v19 = vadd.f32 -1.0, %v1207_v8  ;;  %v467_v57 = vmul.f32 1.442695, %v402_v49  ;;  %v1005_v53 = vunpack.c.l.bf16 %v1116_v3  ;;  %vm362_vm9 = vcmp.gt.f32.partialorder %v1531_v20, 0.0 }
  0x56   : > { %v1211_v28 = vpop.eup %1210  ;;  %1127 = vst [vmem:[%s1402_s23 + $0x50] sm:$0xff] %v1064_v10   ;;  %v539_v29 = vsel %vm359_vm6, %v1514_v5, %v851_v16  ;;  %v853_v31 = vadd.f32 -1.0, %v1209_v18  ;;  %1216 = vpow2.f32 %v465_v27  ;;  %v403_v5 = vmin.f32 %v1587_v17, 0.0 }
  0x57   : > { %v540_v32 = vsel %vm360_vm7, %v1517_v6, %v852_v19  ;;  %v854_v60 = vadd.f32 -1.0, %v1211_v28  ;;  %1218 = vpow2.f32 %v467_v57  ;;  %v404_v62 = vmin.f32 %v1590_v21, 0.0 }
  0x58   : > { %v1069_v34 = vpack.c.bf16 %v540_v32, %v539_v29  ;;  %v541_v35 = vsel %vm361_vm8, %v1524_v15, %v853_v31  ;;  %v1006_v38 = vunpack.c.h.bf16 %v1116_v3  ;;  %v292_v39 = vmul.f32 %v1005_v53, %v1302_v0 }
  0x59   : > { %v542_v36 = vsel %vm362_vm9, %v1531_v20, %v854_v60  ;;  %v1009_v23 = vunpack.c.l.bf16 %v1117_v59  ;;  %v469_v63 = vmul.f32 1.442695, %v403_v5  ;;  %v471_v40 = vmul.f32 1.442695, %v404_v62 }
  0x5a   : > { %1128 = vst [vmem:[%s1402_s23 + $0x58] sm:$0xff] %v1069_v34   ;;  %v1074_v6 = vpack.c.bf16 %v542_v36, %v541_v35  ;;  %v1010_v41 = vunpack.c.h.bf16 %v1117_v59  ;;  %v293_v42 = vmul.f32 %v1006_v38, %v1302_v0  ;;  %v333_v15 = vadd.f32 %v1311_v9, %v292_v39 }
  0x5b   : > { %v294_v43 = vmul.f32 %v1009_v23, %v1302_v0  ;;  %vm363_vm10 = vcmp.gt.f32.partialorder %v1551_v24, 0.0  ;;  %1220 = vpow2.f32 %v469_v63  ;;  %vm364_vm11 = vcmp.gt.f32.partialorder %v1558_v46, 0.0 }
  0x5c   : > { %v1213_v13 = vpop.eup %1212  ;;  %1129 = vst [vmem:[%s1402_s23 + $0x60] sm:$0xff] %v1074_v6   ;;  %v295_v20 = vmul.f32 %v1010_v41, %v1302_v0  ;;  %1222 = vpow2.f32 %v471_v40  ;;  %v334_v14 = vadd.f32 %v1311_v9, %v293_v42  ;;  %v405_v11 = vmin.f32 %v333_v15, 0.0 }
  0x5d   : > { %v1215_v44 = vpop.eup %1214  ;;  %v855_v45 = vadd.f32 -1.0, %v1213_v13  ;;  %v335_v48 = vadd.f32 %v1311_v9, %v294_v43  ;;  %vm365_vm12 = vcmp.gt.f32.partialorder %v1568_v54, 0.0  ;;  %vm366_vm13 = vcmp.gt.f32.partialorder %v1575_v1, 0.0 }
  0x5e   : > { %v856_v47 = vadd.f32 -1.0, %v1215_v44  ;;  %v336_v25 = vadd.f32 %v1311_v9, %v295_v20  ;;  %v406_v50 = vmin.f32 %v334_v14, 0.0  ;;  %v473_v12 = vmul.f32 1.442695, %v405_v11 }
  0x5f   : > { %v543_v22 = vsel %vm363_vm10, %v1551_v24, %v855_v45  ;;  %v407_v56 = vmin.f32 %v335_v48, 0.0  ;;  %vm367_vm14 = vcmp.gt.f32.partialorder %v1587_v17, 0.0  ;;  %vm368_vm15 = vcmp.gt.f32.partialorder %v1590_v21, 0.0 }
  0x60   : > { %v1217_v51 = vpop.eup %1216  ;;  %v544_v0 = vsel %vm364_vm11, %v1558_v46, %v856_v47  ;;  %v475_v55 = vmul.f32 1.442695, %v406_v50  ;;  %1224 = vpow2.f32 %v473_v12  ;;  %v408_v9 = vmin.f32 %v336_v25, 0.0 }
  0x61   : > { %v1219_v37 = vpop.eup %1218  ;;  %v1079_v52 = vpack.c.bf16 %v544_v0, %v543_v22  ;;  %v857_v26 = vadd.f32 -1.0, %v1217_v51  ;;  %v477_v30 = vmul.f32 1.442695, %v407_v56  ;;  %vm369_vm0 = vcmp.gt.f32.partialorder %v333_v15, 0.0 }
  0x62   : > { %v858_v58 = vadd.f32 -1.0, %v1219_v37  ;;  %1226 = vpow2.f32 %v475_v55  ;;  %v479_v61 = vmul.f32 1.442695, %v408_v9  ;;  %vm370_vm1 = vcmp.gt.f32.partialorder %v334_v14, 0.0 }
  0x63   : > { %1130 = vst [vmem:[%s1402_s23 + $0x68] sm:$0xff] %v1079_v52   ;;  %v545_v24 = vsel %vm365_vm12, %v1568_v54, %v857_v26  ;;  %1228 = vpow2.f32 %v477_v30  ;;  %vm371_vm2 = vcmp.gt.f32.partialorder %v335_v48, 0.0  ;;  %vm372_vm3 = vcmp.gt.f32.partialorder %v336_v25, 0.0 }
  0x64   : > { %v546_v46 = vsel %vm366_vm13, %v1575_v1, %v858_v58  ;;  %1230 = vpow2.f32 %v479_v61 }
  0x65   : > { %v1084_v2 = vpack.c.bf16 %v546_v46, %v545_v24  ;;  %v1221_v33 = vpop.eup %1220 }
  0x66   : > { %v1223_v3 = vpop.eup %1222  ;;  %v859_v4 = vadd.f32 -1.0, %v1221_v33 }
  0x67   : > { %1131 = vst [vmem:[%s1402_s23 + $0x70] sm:$0xff] %v1084_v2   ;;  %v860_v7 = vadd.f32 -1.0, %v1223_v3 }
  0x68   : > { %v547_v54 = vsel %vm367_vm14, %v1587_v17, %v859_v4 }
  0x69   : > { %v548_v49 = vsel %vm368_vm15, %v1590_v21, %v860_v7 }
  0x6a   : > { %v1089_v8 = vpack.c.bf16 %v548_v49, %v547_v54  ;;  %v1225_v1 = vpop.eup %1224 }
  0x6b   : > { %v861_v16 = vadd.f32 -1.0, %v1225_v1 }
  0x6c   : > { %v1227_v10 = vpop.eup %1226  ;;  %1132 = vst [vmem:[%s1402_s23 + $0x78] sm:$0xff] %v1089_v8  }
  0x6d   : > { %v862_v27 = vadd.f32 -1.0, %v1227_v10  ;;  %v1229_v18 = vpop.eup %1228  ;;  %v549_v19 = vsel %vm369_vm0, %v333_v15, %v861_v16 }
  0x6e   : > { %v1231_v57 = vpop.eup %1230  ;;  %v863_v28 = vadd.f32 -1.0, %v1229_v18 }
  0x6f   : > { %v550_v53 = vsel %vm370_vm1, %v334_v14, %v862_v27  ;;  %v864_v29 = vadd.f32 -1.0, %v1231_v57 }
  0x70   : > { %v1094_v17 = vpack.c.bf16 %v550_v53, %v549_v19  ;;  %v551_v21 = vsel %vm371_vm2, %v335_v48, %v863_v28 }
  0x71   : > { %v552_v31 = vsel %vm372_vm3, %v336_v25, %v864_v29 }
  0x72   : > { %1133 = vst [vmem:[%s1402_s23 + $0x80] sm:$0xff] %v1094_v17   ;;  %v1099_v59 = vpack.c.bf16 %v552_v31, %v551_v21 }
  0x74   : > { %1134 = vst [vmem:[%s1402_s23 + $0x88] sm:$0xff] %v1099_v59  }
  0x75 PF: > { %s12_s11 = sadd.s32 1, %s1254_s11   ;;  %s1646_s9 = smov %s1250_s10 }
  0x76   : > { %p9_p5 = scmp.ge.s32.totalorder %s12_s11, 4   ;;  %s1647_s10 = smov %s1649_s12 }
  0x78   :  { %11 = sbr.rel (!%p9_p5) target bundleno = 2 (0x2), region = 58 }

// kernel: conv_bn_elu.3
= control target key start
LH: loop header
LB: loop body
LE: loop exit
PB: predicated region body
PF: predicated region fallthrough
CT: control target
= control target key end

     0   :  { %s5849_s18 = smov 0   ;;  %s5851_s19 = smov 0   ;;  %s6994_s0 = inlined_call_operand.vmem [shape: bf16[2,1,342,4], index: 0, kind: input, shape index: {}]   ;;  %s6995_s1 = inlined_call_operand.vmem [shape: bf16[9,4,128], index: 1, kind: input, shape index: {}]   ;;  %s6996_s2 = inlined_call_operand.vmem [shape: f32[1,128], index: 2, kind: input, shape index: {}]   ;;  %s6997_s3 = inlined_call_operand.vmem [shape: f32[288,1], index: 3, kind: input, shape index: {}]   ;;  %s6998_s4 = inlined_call_operand.vmem [shape: bf16[2,288,128], index: 4, kind: output, shape index: {0}]   ;;  %s6999_s5 = inlined_call_operand.vmem [shape: f32[2,1,2,128], index: 5, kind: output, shape index: {1}]  }
   0x1   :  { %s5853_s20 = smov 0  }
   0x2 LB: > { %s28_s21 = sadd.s32 1, %s5812_s19  ;;  %p4461_p0 = scmp.ge.s32.totalorder %s5816_s20, 1  ;;  %s5816_s20 = sphi %s5853_s20, %s16_s20   ;;  %s5812_s19 = sphi %s5851_s19, %s7001_s19   ;;  %s5808_s18 = sphi %s5849_s18, %s7000_s18  }
   0x3   : > { %p30_p1 = scmp.ge.s32.totalorder %s28_s21, 2  ;;  %p212_p2 = scmp.lt.s32.totalorder %s5816_s20, 3 }
   0x5   : > { %s7003_s21 = smov (%p30_p1, %s28_s21), 0  ;;  %p213_p3 = pnand %p4461_p0, %p212_p2 }
   0x6   : > { %vm619_vm0 = vcmask (!%p213_p3), 1041408   ;;  %v4579_v0 = vld [vmem:[%s6995_s1 + $0x8] sm:$0x3] (!%p213_p3)  ;;  %v4465_v1 = vld [vmem:[%s6995_s1 + $0x2] sm:$0x3] (!%p213_p3)  ;;  %p255_p4 = scmp.lt.s32.totalorder (!%p213_p3), %s5808_s18, 1 }
   0x7   : > { %216 = sbr.rel (%p213_p3) target bundleno = 593 (0x251), region = 36  ;;  %5686 = vmatprep.subr.msk.bf16.mxu0 (!%p213_p3), %vm619_vm0, %v4579_v0  ;;  %5682 = vmatprep.subr.msk.bf16.mxu1 (!%p213_p3), %vm619_vm0, %v4465_v1  ;;  %v5876_v2 = vsel (!%p213_p3), %vm619_vm0, %v4579_v0, 0  ;;  %v621_v3 = vsel (!%p213_p3), %vm619_vm0, %v4465_v1, 0  ;;  %v4599_v4 = vld [vmem:[%s6995_s1 + $0xa] sm:$0x3] (!%p213_p3)  ;;  %vm564_vm2 = vcmask (!%p213_p3), 31744  }
   0x8   : > { %5203 = vmatpush3.bf16.msra.mxu0 (!%p213_p3), %v5876_v2  ;;  %5051 = vmatpush3.bf16.msra.mxu1 (!%p213_p3), %v621_v3  ;;  %v318_v5 = vld [vmem:[%s6995_s1] sm:$0x3] (!%p213_p3)  ;;  %vm415_vm1 = vsmask.f32 (!%p213_p3), 7424  ;;  %v5897_v6 = vsel (!%p213_p3), %vm619_vm0, %v4599_v4, 0  ;;  %vm2222_vm4 = vcmask (!%p213_p3), 1045504  }
   0x9   : > { %5688 = vmatprep.subr.msk.bf16.mxu0 (!%p213_p3), %vm619_vm0, %v4599_v4  ;;  %5683 = vmatprep.subr.msk.bf16.mxu1 (!%p213_p3), %vm619_vm0, %v318_v5  ;;  %vm1775_vm3 = vsmask.f32 (!%p213_p3), 6400  ;;  %v837_v12 = vsel (!%p213_p3), %vm619_vm0, %v318_v5, 0  ;;  %v5945_v39 = vld [vmem:[%s6995_s1 + $0x4] sm:$0x3] (!%p213_p3)  ;;  %vm1022_vm5 = vcmask (!%p213_p3), 1046528  }
   0xa   : > { %v5979_v1 = vld [vmem:[%s6995_s1 + $0xc] sm:$0x3] (!%p213_p3)  ;;  %vm2975_vm6 = vsmask.f32 (!%p213_p3), 5376  ;;  %vm3422_vm7 = vcmask (!%p213_p3), 1044480   ;;  %vm4100_vm8 = vcmask (!%p213_p3), 1040384  }
   0xe   : > { %s7005_s18 = smov (!%p255_p4, %s5808_s18), 1 }
   0xf   : > { %s5692_s30 = smul.u32 172, %s7005_s18  ;;  %s4464_s22 = sshll.u32 %s7005_s18, 1 }
  0x10   : > { %s5693_s14 = smul.u32 144, %s7005_s18  ;;  %s280_s25 = scalar_lea.vmem %s6999_s5, %s4464_s22 }
  0x11   : > { %s5894_s8 = scalar_lea.vmem %s6994_s0, %s5692_s30 }
  0x12   : > { %v282_v7 = vld [vmem:[%s5894_s8] sm:$0xf]  ;;  %v5901_v8 = vld [vmem:[%s5894_s8 + $0x4] sm:$0xf]  ;;  %v5907_v10 = vld [vmem:[%s5894_s8 + $0x8] sm:$0xff]   ;;  %s6837_s17 = scalar_lea.vmem %s6998_s4, %s5693_s14 }
  0x13   : > { %v5904_v9 = vcombine.low %v282_v7, %v5901_v8  ;;  %v1330_v11 = vld [vmem:[%s5894_s8 + $0x8] sm:$0xe]  ;;  %v5912_v13 = vld [vmem:[%s5894_s8 + $0xc] sm:$0xf]  ;;  %v424_v16 = vshll.u32 %v5907_v10, 16  ;;  %v428_v17 = vshrl.u32 %v5907_v10, 16 }
  0x14   : > { %v5919_v18 = vld [vmem:[%s5894_s8 + $0x10] sm:$0xff]   ;;  %v5925_v20 = vcombine.low %v1330_v11, %v5912_v13  ;;  %v5933_v28 = vld [vmem:[%s5894_s8 + $0x18] sm:$0xff]   ;;  %v5939_v34 = vld [vmem:[%s5894_s8 + $0x20] sm:$0xff]  }
  0x15   : > { %v417_v14 = vshrl.u32 %v5904_v9, 16  ;;  %v419_v15 = vshll.u32 %v5904_v9, 16  ;;  %v5922_v19 = vld [vmem:[%s5894_s8 + $0x10] sm:$0xff]   ;;  %v426_v22 = vrot.slane %v424_v16, 1  ;;  %v1785_v23 = vshrl.u32 %v5919_v18, 16  ;;  %v5936_v33 = vld [vmem:[%s5894_s8 + $0x18] sm:$0xff]  }
  0x16   : > { %v1788_v24 = vshll.u32 %v5919_v18, 16  ;;  %v1777_v25 = vshrl.u32 %v5925_v20, 16  ;;  %v1780_v26 = vshll.u32 %v5925_v20, 16  ;;  %v432_v27 = vshll.u32 %v5922_v19, 16  ;;  %v5954_v48 = vld [vmem:[%s5894_s8 + $0x20] sm:$0xff]   ;;  %v5957_v49 = vld [vmem:[%s5894_s8 + $0x28] sm:$0xff]  }
  0x17   : > { %v421_v21 = vrot.slane %v419_v15, 1  ;;  %v430_v30 = vor.u32 %v428_v17, %v426_v22  ;;  %v1787_v31 = vrot.slane %v1785_v23, 1  ;;  %v1794_v38 = vshrl.u32 %v5933_v28, 16  ;;  %v5963_v54 = vld [vmem:[%s5894_s8 + $0x28] sm:$0xff]   ;;  %v5969_v59 = vld [vmem:[%s5894_s8 + $0x30] sm:$0xff]   ;;  %v5993_v23 = vld [vmem:[%s5894_s8 + $0x38] sm:$0xff]  }
  0x18   : > { %v1790_v32 = vrot.slane %v1788_v24, 2  ;;  %v1779_v35 = vrot.slane %v1777_v25, 1  ;;  %v1782_v36 = vrot.slane %v1780_v26, 2  ;;  %v434_v37 = vrot.slane %v432_v27, 1  ;;  %v5974_v0 = vld [vmem:[%s5894_s8 + $0x30] sm:$0xff]  }
  0x19   : > { %v422_v29 = vor.u32 %v421_v21, %v417_v14  ;;  %v1797_v42 = vshll.u32 %v5933_v28, 16  ;;  %v436_v43 = vshrl.u32 %v5922_v19, 16  ;;  %v1796_v46 = vrot.slane %v1794_v38, 1 }
  0x1a   : > { %v1791_v41 = vor.u32 %v1790_v32, %v1787_v31  ;;  %v1783_v44 = vor.u32 %v1782_v36, %v1779_v35  ;;  %v435_v45 = vsel %vm415_vm1, %v430_v30, %v434_v37  ;;  %v440_v47 = vshll.u32 %v5936_v33, 16  ;;  %v6002_v35 = vld [vmem:[%s5894_s8 + $0x38] sm:$0xff]  }
  0x1b   : > { %v427_v40 = vsel %vm415_vm1, %v422_v29, %v426_v22  ;;  %v1799_v50 = vrot.slane %v1797_v42, 2  ;;  %v438_v51 = vor.u32 %v436_v43, %v434_v37  ;;  %v1803_v52 = vshrl.u32 %v5939_v34, 16 }
  0x1c   : > { %5052 = vmatprep.mubr.msk.bf16.mxu1 %vm564_vm2, %v427_v40  ;;  %v1806_v53 = vshll.u32 %v5939_v34, 16  ;;  %v1792_v55 = vsel %vm1775_vm3, %v1783_v44, %v1791_v41  ;;  %v442_v56 = vrot.slane %v440_v47, 1  ;;  %v444_v57 = vshrl.u32 %v5936_v33, 16  ;;  %v6013_v44 = vld [vmem:[%s5894_s8 + $0x40] sm:$0xff]  }
  0x1d   : > { %5053 = vmatmul.mubr.msk.bf16.vlgmr.msra.gmra.mrb[0].mxu1 %vm564_vm2, %v435_v45  ;;  %v448_v58 = vshll.u32 %v5954_v48, 16  ;;  %5204 = vmatprep.mubr.msk.bf16.mxu0 %vm564_vm2, %v1792_v55  ;;  %v1800_v60 = vor.u32 %v1799_v50, %v1796_v46  ;;  %v1805_v61 = vrot.slane %v1803_v52, 1  ;;  %v1812_v63 = vshrl.u32 %v5957_v49, 16 }
  0x1e   : > { %5089 = vmatpush3.bf16.msra.mxu1 %v837_v12  ;;  %v1808_v62 = vrot.slane %v1806_v53, 2  ;;  %v443_v3 = vsel %vm415_vm1, %v438_v51, %v442_v56  ;;  %v446_v4 = vor.u32 %v444_v57, %v442_v56  ;;  %v1815_v7 = vshll.u32 %v5957_v49, 16  ;;  %v6018_v51 = vld [vmem:[%s5894_s8 + $0x40] sm:$0xff]  }
  0x1f   : > { %5684 = vmatprep.subr.msk.bf16.mxu1 %vm619_vm0, %v5945_v39  ;;  %v450_v5 = vrot.slane %v448_v58, 1  ;;  %v1801_v11 = vsel %vm1775_vm3, %v1791_v41, %v1800_v60  ;;  %5056 = vmatprep.mubr.msk.bf16.mxu1 %vm564_vm2, %v443_v3  ;;  %v1814_v14 = vrot.slane %v1812_v63, 1  ;;  %v452_v15 = vshrl.u32 %v5954_v48, 16  ;;  %v6029_v63 = vld [vmem:[%s5894_s8 + $0x48] sm:$0xff]  }
  0x20   : > { %v1809_v12 = vor.u32 %v1808_v62, %v1805_v61  ;;  %5205 = vmatmul.mubr.msk.bf16.vlgmr.msra.gmra.mrb[0].mxu0 %vm564_vm2, %v1801_v11  ;;  %v1817_v17 = vrot.slane %v1815_v7, 2  ;;  %v456_v21 = vshll.u32 %v5963_v54, 16  ;;  %v1821_v22 = vshrl.u32 %v5969_v59, 16  ;;  %v6026_v62 = vld [vmem:[%s5894_s8 + $0x48] sm:$0xff]  }
  0x21   : > { %v451_v16 = vsel %vm415_vm1, %v446_v4, %v450_v5  ;;  %5241 = vmatpush3.bf16.msra.mxu0 %v5897_v6  ;;  %v454_v25 = vor.u32 %v452_v15, %v450_v5  ;;  %v1824_v26 = vshll.u32 %v5969_v59, 16  ;;  %v460_v27 = vshrl.u32 %v5963_v54, 16 }
  0x22   : > { %v1810_v24 = vsel %vm1775_vm3, %v1800_v60, %v1809_v12  ;;  %v1818_v29 = vor.u32 %v1817_v17, %v1814_v14  ;;  %v458_v30 = vrot.slane %v456_v21, 1  ;;  %v1823_v31 = vrot.slane %v1821_v22, 1  ;;  %5689 = vmatprep.subr.msk.bf16.mxu0 %vm619_vm0, %v5979_v1  ;;  %v6038_v14 = vld [vmem:[%s5894_s8 + $0x50] sm:$0xff]  }
  0x23   : > { %5208 = vmatprep.mubr.msk.bf16.mxu0 %vm564_vm2, %v1810_v24  ;;  %v464_v32 = vshll.u32 %v5974_v0, 16  ;;  %v1826_v6 = vrot.slane %v1824_v26, 2  ;;  %v1830_v36 = vshrl.u32 %v5993_v23, 16  ;;  %v1833_v37 = vshll.u32 %v5993_v23, 16 }
  0x24   : > { %v468_v38 = vshrl.u32 %v5974_v0, 16  ;;  %v1819_v40 = vsel %vm1775_vm3, %v1809_v12, %v1818_v29  ;;  %v459_v41 = vsel %vm415_vm1, %v454_v25, %v458_v30  ;;  %v462_v42 = vor.u32 %v460_v27, %v458_v30  ;;  %v6046_v25 = vld [vmem:[%s5894_s8 + $0x50] sm:$0xff]  }
  0x25   : > { %5057 = vmatmul.mubr.msk.bf16.gmra.mrb[4].mxu1 %vm564_vm2, %v451_v16  ;;  %v466_v43 = vrot.slane %v464_v32, 1  ;;  %v1827_v45 = vor.u32 %v1826_v6, %v1823_v31  ;;  %v1832_v46 = vrot.slane %v1830_v36, 1  ;;  %v1835_v47 = vrot.slane %v1833_v37, 2 }
  0x26   : > { %5060 = vmatprep.mubr.msk.bf16.mxu1 %vm564_vm2, %v459_v41  ;;  %v472_v50 = vshll.u32 %v6002_v35, 16  ;;  %v1839_v55 = vshrl.u32 %v6013_v44, 16  ;;  %v1842_v56 = vshll.u32 %v6013_v44, 16  ;;  %v476_v61 = vshrl.u32 %v6002_v35, 16  ;;  %v6056_v41 = vld [vmem:[%s5894_s8 + $0x58] sm:$0xff]  }
  0x27   : > { %v467_v52 = vsel %vm415_vm1, %v462_v42, %v466_v43  ;;  %v470_v53 = vor.u32 %v468_v38, %v466_v43  ;;  %v1828_v57 = vsel %vm1775_vm3, %v1818_v29, %v1827_v45  ;;  %v1836_v58 = vor.u32 %v1835_v47, %v1832_v46  ;;  %v6051_v29 = vld [vmem:[%s5894_s8 + $0x58] sm:$0xff]  }
  0x28   : > { %v474_v60 = vrot.slane %v472_v50, 1  ;;  %5209 = vmatmul.mubr.msk.bf16.gmra.mrb[4].mxu0 %vm564_vm2, %v1819_v40  ;;  %v1841_v3 = vrot.slane %v1839_v55, 1  ;;  %v1844_v4 = vrot.slane %v1842_v56, 2  ;;  %v480_v5 = vshll.u32 %v6018_v51, 16 }
  0x29   : > { %v484_v7 = vshrl.u32 %v6018_v51, 16  ;;  %5212 = vmatprep.mubr.msk.bf16.mxu0 %vm564_vm2, %v1828_v57  ;;  %v1848_v12 = vshrl.u32 %v6026_v62, 16  ;;  %v1851_v16 = vshll.u32 %v6026_v62, 16  ;;  %v488_v17 = vshll.u32 %v6029_v63, 16  ;;  %v2216_v57 = vld [vmem:[%s5894_s8 + $0x8] sm:$0xc] }
  0x2a   : > { %v475_v11 = vsel %vm415_vm1, %v470_v53, %v474_v60  ;;  %v1845_v15 = vor.u32 %v1844_v4, %v1841_v3  ;;  %v482_v21 = vrot.slane %v480_v5, 1  ;;  %v1857_v22 = vshrl.u32 %v6038_v14, 16 }
  0x2b   : > { %v1860_v24 = vshll.u32 %v6038_v14, 16  ;;  %v1837_v26 = vsel %vm1775_vm3, %v1827_v45, %v1836_v58  ;;  %v478_v27 = vor.u32 %v476_v61, %v474_v60  ;;  %v1850_v30 = vrot.slane %v1848_v12, 1 }
  0x2c   : > { %v1853_v31 = vrot.slane %v1851_v16, 2  ;;  %v486_v32 = vor.u32 %v484_v7, %v482_v21  ;;  %v490_v6 = vrot.slane %v488_v17, 1  ;;  %v1846_v36 = vsel %vm1775_vm3, %v1836_v58, %v1845_v15  ;;  %v6070_v58 = vld [vmem:[%s5894_s8 + $0x60] sm:$0xff]  }
  0x2d   : > { %5061 = vmatmul.mubr.msk.bf16.gmra.mrb[8].mxu1 %vm564_vm2, %v467_v52  ;;  %v1859_v37 = vrot.slane %v1857_v22, 1  ;;  %v1862_v38 = vrot.slane %v1860_v24, 2  ;;  %v496_v40 = vshll.u32 %v6046_v25, 16  ;;  %v483_v42 = vsel %vm415_vm1, %v478_v27, %v482_v21 }
  0x2e   : > { %5064 = vmatprep.mubr.msk.bf16.mxu1 %vm564_vm2, %v475_v11  ;;  %v492_v43 = vshrl.u32 %v6029_v63, 16  ;;  %v1866_v45 = vshrl.u32 %v6051_v29, 16  ;;  %v1869_v46 = vshll.u32 %v6051_v29, 16  ;;  %v1854_v47 = vor.u32 %v1853_v31, %v1850_v30  ;;  %v6075_v11 = vld [vmem:[%s5894_s8 + $0x68] sm:$0xff]  }
  0x2f   : > { %v491_v50 = vsel %vm415_vm1, %v486_v32, %v490_v6  ;;  %v500_v52 = vshrl.u32 %v6046_v25, 16  ;;  %v504_v53 = vshll.u32 %v6056_v41, 16  ;;  %v1863_v55 = vor.u32 %v1862_v38, %v1859_v37  ;;  %v6092_v32 = vld [vmem:[%s5894_s8 + $0x70] sm:$0xff]  }
  0x30   : > { %5213 = vmatmul.mubr.msk.bf16.gmra.mrb[8].mxu0 %vm564_vm2, %v1837_v26  ;;  %v498_v56 = vrot.slane %v496_v40, 1  ;;  %v494_v60 = vor.u32 %v492_v43, %v490_v6  ;;  %v1868_v61 = vrot.slane %v1866_v45, 1  ;;  %v1871_v3 = vrot.slane %v1869_v46, 2  ;;  %v6098_v40 = vld [vmem:[%s5894_s8 + $0x78] sm:$0xff]  }
  0x31   : > { %5216 = vmatprep.mubr.msk.bf16.mxu0 %vm564_vm2, %v1846_v36  ;;  %v1855_v4 = vsel %vm1775_vm3, %v1845_v15, %v1854_v47  ;;  %v506_v7 = vrot.slane %v504_v53, 1  ;;  %v1864_v12 = vsel %vm1775_vm3, %v1854_v47, %v1863_v55  ;;  %v4600_v16 = vcombine.low %v2216_v57, %v5912_v13 }
  0x32   : > { %v502_v5 = vor.u32 %v500_v52, %v498_v56  ;;  %v512_v17 = vshll.u32 %v6070_v58, 16  ;;  %v499_v21 = vsel %vm415_vm1, %v494_v60, %v498_v56  ;;  %v508_v22 = vshrl.u32 %v6056_v41, 16  ;;  %v6113_v56 = vld [vmem:[%s5894_s8 + $0x80] sm:$0xff]  }
  0x33   : > { %v6084_v15 = vor.u32 %v1871_v3, %v1868_v61  ;;  %v516_v26 = vshrl.u32 %v6070_v58, 16  ;;  %v520_v27 = vshll.u32 %v6075_v11, 16  ;;  %v2223_v13 = vrot.slane %v4600_v16, 2 }
  0x34   : > { %v507_v24 = vsel %vm415_vm1, %v502_v5, %v506_v7  ;;  %v2224_v30 = vrot.slane %v5919_v18, 2  ;;  %v514_v31 = vrot.slane %v512_v17, 1  ;;  %v510_v6 = vor.u32 %v508_v22, %v506_v7 }
  0x35   : > { %5065 = vmatmul.mubr.msk.bf16.gmra.mrb[12].mxu1 %vm564_vm2, %v483_v42  ;;  %v1873_v36 = vsel %vm1775_vm3, %v1863_v55, %v6084_v15  ;;  %v522_v38 = vrot.slane %v520_v27, 1  ;;  %v528_v18 = vshll.u32 %v6092_v32, 16  ;;  %v2226_v45 = vrot.slane %v5933_v28, 2  ;;  %v6143_v27 = vld [vmem:[%s5894_s8 + $0x90] ss:$0 sps:$4 sm:$0x11]  }
  0x36   : > { %5068 = vmatprep.mubr.msk.bf16.mxu1 %vm564_vm2, %v491_v50  ;;  %v518_v37 = vor.u32 %v516_v26, %v514_v31  ;;  %v2225_v42 = vsel %vm2222_vm4, %v2223_v13, %v2224_v30  ;;  %v515_v43 = vsel %vm415_vm1, %v510_v6, %v514_v31  ;;  %v524_v46 = vshrl.u32 %v6075_v11, 16 }
  0x37   : > { %v532_v50 = vshrl.u32 %v6092_v32, 16  ;;  %v536_v52 = vshll.u32 %v6098_v40, 16  ;;  %v2228_v53 = vrot.slane %v5939_v34, 2  ;;  %v530_v55 = vrot.slane %v528_v18, 1  ;;  %v6126_v34 = vld [vmem:[%s6995_s1 + $0xe] sm:$0x3] }
  0x38   : > { %5217 = vmatmul.mubr.msk.bf16.gmra.mrb[12].mxu0 %vm564_vm2, %v1855_v4  ;;  %v523_v47 = vsel %vm415_vm1, %v518_v37, %v522_v38  ;;  %v2754_v28 = vsel %vm619_vm0, %v5979_v1, 0  ;;  %v526_v57 = vor.u32 %v524_v46, %v522_v38  ;;  %v2227_v60 = vsel %vm2222_vm4, %v2224_v30, %v2226_v45  ;;  %v6120_v4 = vld [vmem:[%s5894_s8 + $0x88] sm:$0xff]  }
  0x39   : > { %5220 = vmatprep.mubr.msk.bf16.mxu0 %vm564_vm2, %v1864_v12  ;;  %v534_v61 = vor.u32 %v532_v50, %v530_v55  ;;  %v538_v3 = vrot.slane %v536_v52, 1  ;;  %v2229_v5 = vsel %vm2222_vm4, %v2226_v45, %v2228_v53  ;;  %v544_v7 = vshll.u32 %v6113_v56, 16 }
  0x3a   : > { %v531_v1 = vsel %vm415_vm1, %v526_v57, %v530_v55  ;;  %v2230_v12 = vrot.slane %v5957_v49, 2  ;;  %v540_v16 = vshrl.u32 %v6098_v40, 16  ;;  %v552_v22 = vshll.u32 %v6120_v4, 16  ;;  %v6170_v55 = vld [vmem:[%s5894_s8 + $0x60] sm:$0xff]   ;;  %v6189_v57 = vld [vmem:[%s5894_s8 + $0x68] sm:$0xff]  }
  0x3b   : > { %v539_v17 = vsel %vm415_vm1, %v534_v61, %v538_v3  ;;  %v546_v26 = vrot.slane %v544_v7, 1  ;;  %v560_v37 = vshll.u32 %v6143_v27, 16  ;;  %v2234_v38 = vrot.slane %v5993_v23, 2  ;;  %v6207_v7 = vld [vmem:[%s5894_s8 + $0x78] sm:$0xff]  }
  0x3c   : > { %v542_v49 = vor.u32 %v540_v16, %v538_v3  ;;  %v2231_v13 = vsel %vm2222_vm4, %v2228_v53, %v2230_v12  ;;  %v554_v31 = vrot.slane %v552_v22, 1  ;;  %v2236_v18 = vrot.slane %v6013_v44, 2  ;;  %v6223_v22 = vld [vmem:[%s5894_s8 + $0x88] sm:$0xff]  }
  0x3d   : > { %5069 = vmatmul.mubr.msk.bf16.gmra.mrb[16].mxu1 %vm564_vm2, %v499_v21  ;;  %v548_v21 = vshrl.u32 %v6113_v56, 16  ;;  %v562_v45 = vrot.slane %v560_v37, 1  ;;  %v2238_v23 = vrot.slane %v6026_v62, 2  ;;  %v2240_v44 = vrot.slane %v6038_v14, 2 }
  0x3e   : > { %5072 = vmatprep.mubr.msk.bf16.mxu1 %vm564_vm2, %v507_v24  ;;  %v2232_v24 = vrot.slane %v5969_v59, 2  ;;  %v547_v59 = vsel %vm415_vm1, %v542_v49, %v546_v26  ;;  %v2242_v62 = vrot.slane %v6051_v29, 2  ;;  %v1115_v14 = vsel %vm619_vm0, %v5945_v39, 0 }
  0x3f   : > { %v550_v30 = vor.u32 %v548_v21, %v546_v26  ;;  %v2239_v52 = vsel %vm2222_vm4, %v2236_v18, %v2238_v23  ;;  %v2241_v53 = vsel %vm2222_vm4, %v2238_v23, %v2240_v44  ;;  %v2246_v61 = vrot.slane %v6189_v57, 2  ;;  %v6227_v26 = vld [vmem:[%s5894_s8 + $0x90] sm:$0xff]  }
  0x40   : > { %5221 = vmatmul.mubr.msk.bf16.gmra.mrb[16].mxu0 %vm564_vm2, %v1873_v36  ;;  %v2233_v6 = vsel %vm2222_vm4, %v2230_v12, %v2232_v24  ;;  %v556_v36 = vshrl.u32 %v6120_v4, 16  ;;  %v2235_v46 = vsel %vm2222_vm4, %v2232_v24, %v2234_v38  ;;  %v2243_v29 = vsel %vm2222_vm4, %v2240_v44, %v2242_v62  ;;  %v6211_v12 = vld [vmem:[%s5894_s8 + $0x80] sm:$0xff]  }
  0x41   : > { %5242 = vmatprep.mubr.msk.bf16.mxu0 %vm564_vm2, %v2225_v42  ;;  %v555_v42 = vsel %vm415_vm1, %v550_v30, %v554_v31  ;;  %v2250_v16 = vrot.slane %v6207_v7, 2  ;;  %v2254_v49 = vrot.slane %v6223_v22, 2  ;;  %v2530_v30 = vld [vmem:[%s5894_s8 + $0x10] sm:$0xc] }
  0x45   : > { %5073 = vmatmul.mubr.msk.bf16.gmra.mrb[20].mxu1 %vm564_vm2, %v515_v43  ;;  %v558_v43 = vor.u32 %v556_v36, %v554_v31  ;;  %v6237_v31 = vld [vmem:[%s5894_s8 + $0x14] sm:$0xf] }
  0x46   : > { %5076 = vmatprep.mubr.msk.bf16.mxu1 %vm564_vm2, %v523_v47  ;;  %v2237_v47 = vsel %vm2222_vm4, %v2234_v38, %v2236_v18  ;;  %v6247_v37 = vcombine.low %v2530_v30, %v6237_v31  ;;  %v6250_v38 = vld [vmem:[%s5894_s8 + $0x18] sm:$0xff]  }
  0x47   : > { %v563_v50 = vsel %vm415_vm1, %v558_v43, %v562_v45  ;;  %v2663_v43 = vrot.slane %v6250_v38, 2 }
  0x48   : > { %5243 = vmatmul.mubr.msk.bf16.vlgmr.msra.gmra.mrb[0].mxu0 %vm564_vm2, %v2227_v60  ;;  %v6195_v60 = vld [vmem:[%s5894_s8 + $0x70] sm:$0xff]   ;;  %v2662_v18 = vrot.slane %v6247_v37, 2 }
  0x49   : > { %5279 = vmatpush3.bf16.msra.mxu0 %v2754_v28  ;;  %5246 = vmatprep.mubr.msk.bf16.mxu0 %vm564_vm2, %v2229_v5  ;;  %v2244_v28 = vrot.slane %v6170_v55, 2  ;;  %v2248_v3 = vrot.slane %v6195_v60, 2 }
  0x4a   : > { %5690 = vmatprep.subr.msk.bf16.mxu0 %vm619_vm0, %v6126_v34 }
  0x4b   : > { %v2245_v39 = vsel %vm2222_vm4, %v2242_v62, %v2244_v28  ;;  %v2247_v5 = vsel %vm2222_vm4, %v2244_v28, %v2246_v61  ;;  %v2251_v21 = vsel %vm2222_vm4, %v2248_v3, %v2250_v16  ;;  %v3201_v62 = vsel %vm619_vm0, %v6126_v34, 0  ;;  %v6285_v28 = vld [vmem:[%s5894_s8 + $0x38] sm:$0xff]  }
  0x4d   : > { %5077 = vmatmul.mubr.msk.bf16.gmra.mrb[24].mxu1 %vm564_vm2, %v531_v1  ;;  %v2249_v1 = vsel %vm2222_vm4, %v2246_v61, %v2248_v3  ;;  %v2671_v61 = vrot.slane %v6285_v28, 2  ;;  %v6304_v3 = vld [vmem:[%s5894_s8 + $0x40] sm:$0xff]  }
  0x4e   : > { %5080 = vmatprep.mubr.msk.bf16.mxu1 %vm564_vm2, %v539_v17  ;;  %v2252_v17 = vrot.slane %v6211_v12, 2 }
  0x50   : > { %5247 = vmatmul.mubr.msk.bf16.gmra.mrb[4].mxu0 %vm564_vm2, %v2231_v13  ;;  %v2253_v24 = vsel %vm2222_vm4, %v2250_v16, %v2252_v17  ;;  %v2256_v13 = vrot.slane %v6227_v26, 2  ;;  %v1016_v16 = vld [vmem:[%s5894_s8] sm:$0xe] }
  0x51   : > { %5250 = vmatprep.mubr.msk.bf16.mxu0 %vm564_vm2, %v2233_v6  ;;  %v2255_v6 = vsel %vm2222_vm4, %v2252_v17, %v2254_v49  ;;  %v2673_v17 = vrot.slane %v6304_v3, 2 }
  0x52   : > { %v2257_v36 = vsel %vm2222_vm4, %v2254_v49, %v2256_v13 }
  0x53   : > { %v2674_v49 = vsel %vm2222_vm4, %v2671_v61, %v2673_v17 }
  0x55   : > { %5081 = vmatmul.mubr.msk.bf16.gmra.mrb[28].mxu1 %vm564_vm2, %v547_v59  ;;  %v6243_v59 = vld [vmem:[%s5894_s8 + $0x98] ss:$0 sps:$4 sm:$0x33]  }
  0x56   : > { %5084 = vmatprep.mubr.msk.bf16.mxu1 %vm564_vm2, %v555_v42  ;;  %v2258_v42 = vrot.slane %v6243_v59, 2 }
  0x58   : > { %5251 = vmatmul.mubr.msk.bf16.gmra.mrb[8].mxu0 %vm564_vm2, %v2235_v46  ;;  %v2259_v45 = vsel %vm2222_vm4, %v2256_v13, %v2258_v42  ;;  %v6263_v46 = vld [vmem:[%s5894_s8 + $0x20] sm:$0xff]   ;;  %v6322_v13 = vld [vmem:[%s5894_s8 + $0x50] sm:$0xff]  }
  0x59   : > { %5254 = vmatprep.mubr.msk.bf16.mxu0 %vm564_vm2, %v2237_v47  ;;  %v2664_v47 = vsel %vm2222_vm4, %v2662_v18, %v2663_v43  ;;  %v2665_v23 = vrot.slane %v6263_v46, 2  ;;  %v2677_v42 = vrot.slane %v6322_v13, 2 }
  0x5d   : > { %5085 = vmatmul.mubr.msk.bf16.gmra.mrb[32].mxu1 %vm564_vm2, %v563_v50  ;;  %v6267_v50 = vld [vmem:[%s5894_s8 + $0x28] sm:$0xff]  }
  0x5e   : > { %5090 = vmatprep.mubr.msk.bf16.mxu1 %vm564_vm2, %v5904_v9  ;;  %v6181_v9 = vld [vmem:[%s6995_s1 + $0x6] sm:$0x3]  ;;  %v2667_v44 = vrot.slane %v6267_v50, 2 }
  0x60   : > { %5255 = vmatmul.mubr.msk.bf16.gmra.mrb[12].mxu0 %vm564_vm2, %v2239_v52  ;;  %v2666_v52 = vsel %vm2222_vm4, %v2663_v43, %v2665_v23 }
  0x61   : > { %5258 = vmatprep.mubr.msk.bf16.mxu0 %vm564_vm2, %v2241_v53  ;;  %v6279_v53 = vld [vmem:[%s5894_s8 + $0x30] sm:$0xff]  }
  0x65   : > { %5091 = vmatmul.mubr.msk.bf16.vlgmr.msra.gmra.mrb[0].mxu1 %vm564_vm2, %v5907_v10 }
  0x66   : > { %5094 = vmatprep.mubr.msk.bf16.mxu1 %vm564_vm2, %v5922_v19  ;;  %5127 = vmatpush3.bf16.msra.mxu1 %v1115_v14  ;;  %v2668_v14 = vsel %vm2222_vm4, %v2665_v23, %v2667_v44  ;;  %v1028_v23 = vrot.slane %v5936_v33, 1 }
  0x67   : > { %5685 = vmatprep.subr.msk.bf16.mxu1 %vm619_vm0, %v6181_v9 }
  0x68   : > { %5259 = vmatmul.mubr.msk.bf16.gmra.mrb[16].mxu0 %vm564_vm2, %v2243_v29  ;;  %v6290_v29 = vld [vmem:[%s6995_s1 + $0x10] sm:$0x3] }
  0x69   : > { %5262 = vmatprep.mubr.msk.bf16.mxu0 %vm564_vm2, %v2245_v39  ;;  %v2669_v39 = vrot.slane %v6279_v53, 2 }
  0x6b   : > { %v2670_v34 = vsel %vm2222_vm4, %v2667_v44, %v2669_v39 }
  0x6d   : > { %5095 = vmatmul.mubr.msk.bf16.gmra.mrb[4].mxu1 %vm564_vm2, %v5936_v33 }
  0x6e   : > { %5098 = vmatprep.mubr.msk.bf16.mxu1 %vm564_vm2, %v5954_v48 }
  0x70   : > { %5263 = vmatmul.mubr.msk.bf16.gmra.mrb[20].mxu0 %vm564_vm2, %v2247_v5  ;;  %v2672_v5 = vsel %vm2222_vm4, %v2669_v39, %v2671_v61  ;;  %v1554_v39 = vsel %vm619_vm0, %v6181_v9, 0  ;;  %v5818_v61 = vmov 0   ;;  %v5783_v9 = vld [vmem:[%s6995_s1 + $0x8] sm:$0x3] }
  0x71   : > { %5266 = vmatprep.mubr.msk.bf16.mxu0 %vm564_vm2, %v2249_v1  ;;  %v6308_v1 = vld [vmem:[%s5894_s8 + $0x48] sm:$0xff]   ;;  %5719 = vset.pattern.permute.xlu0 %v5818_v61 }
  0x72   : > { %5720 = vset.pattern.permute.xlu1 %v5818_v61  ;;  %v3736_v61 = vld [vmem:[%s6997_s3 + $0x30] sm:$0xff] }
  0x75   : > { %5099 = vmatmul.mubr.msk.bf16.gmra.mrb[8].mxu1 %vm564_vm2, %v5963_v54 }
  0x76   : > { %5102 = vmatprep.mubr.msk.bf16.mxu1 %vm564_vm2, %v5974_v0 }
  0x78   : > { %5267 = vmatmul.mubr.msk.bf16.gmra.mrb[24].mxu0 %vm564_vm2, %v2251_v21  ;;  %v4522_v21 = vcombine.low %v1016_v16, %v5901_v8  ;;  %v6327_v8 = vld [vmem:[%s5894_s8 + $0x58] sm:$0xff]   ;;  %v6360_v16 = vld [vmem:[%s5894_s8 + $0x70] sm:$0xff]  }
  0x79   : > { %5270 = vmatprep.mubr.msk.bf16.mxu0 %vm564_vm2, %v2253_v24  ;;  %v2675_v24 = vrot.slane %v6308_v1, 2  ;;  %v2679_v43 = vrot.slane %v6327_v8, 2 }
  0x7a   : > { %v1023_v30 = vrot.slane %v4522_v21, 1 }
  0x7b   : > { %v2680_v44 = vsel %vm2222_vm4, %v2677_v42, %v2679_v43 }
  0x7d   : > { %5103 = vmatmul.mubr.msk.bf16.gmra.mrb[12].mxu1 %vm564_vm2, %v6002_v35 }
  0x7e   : > { %5106 = vmatprep.mubr.msk.bf16.mxu1 %vm564_vm2, %v6018_v51 }
  0x80   : > { %5271 = vmatmul.mubr.msk.bf16.gmra.mrb[28].mxu0 %vm564_vm2, %v2255_v6  ;;  %v1024_v6 = vrot.slane %v5907_v10, 1  ;;  %v1026_v10 = vrot.slane %v5922_v19, 1 }
  0x81   : > { %5274 = vmatprep.mubr.msk.bf16.mxu0 %vm564_vm2, %v2257_v36  ;;  %v2676_v36 = vsel %vm2222_vm4, %v2673_v17, %v2675_v24  ;;  %v1032_v17 = vrot.slane %v5963_v54, 1  ;;  %v3732_v54 = vld [vmem:[%s6997_s3 + $0x10] sm:$0xff] }
  0x82   : > { %v1025_v18 = vsel %vm1022_vm5, %v1023_v30, %v1024_v6  ;;  %v1029_v19 = vsel %vm1022_vm5, %v1026_v10, %v1028_v23  ;;  %v2685_v30 = vrot.slane %v6360_v16, 2  ;;  %3778 = vperm.xlu1 %5720, %v3732_v54   ;;  %v3738_v54 = vld [vmem:[%s6997_s3 + $0x40] sm:$0xff] }
  0x85   : > { %5107 = vmatmul.mubr.msk.bf16.gmra.mrb[16].mxu1 %vm564_vm2, %v6029_v63 }
  0x86   : > { %5110 = vmatprep.mubr.msk.bf16.mxu1 %vm564_vm2, %v6046_v25 }
  0x88   : > { %5275 = vmatmul.mubr.msk.bf16.gmra.mrb[32].mxu0 %vm564_vm2, %v2259_v45  ;;  %v2678_v45 = vsel %vm2222_vm4, %v2675_v24, %v2677_v42  ;;  %v6369_v24 = vld [vmem:[%s5894_s8 + $0x78] sm:$0xff]   ;;  %v3731_v42 = vld [vmem:[%s6997_s3 + $0x8] sm:$0xff] }
  0x89   : > { %5280 = vmatprep.mubr.msk.bf16.mxu0 %vm564_vm2, %v2664_v47  ;;  %v6340_v47 = vld [vmem:[%s5894_s8 + $0x60] sm:$0xff]  }
  0x8d   : > { %5111 = vmatmul.mubr.msk.bf16.gmra.mrb[20].mxu1 %vm564_vm2, %v6056_v41 }
  0x8e   : > { %5114 = vmatprep.mubr.msk.bf16.mxu1 %vm564_vm2, %v6070_v58 }
  0x90   : > { %5281 = vmatmul.mubr.msk.bf16.vlgmr.msra.gmra.mrb[0].mxu0 %vm564_vm2, %v2666_v52  ;;  %v6345_v52 = vld [vmem:[%s5894_s8 + $0x68] sm:$0xff]  }
  0x91   : > { %5317 = vmatpush3.bf16.msra.mxu0 %v3201_v62  ;;  %5284 = vmatprep.mubr.msk.bf16.mxu0 %vm564_vm2, %v2668_v14  ;;  %v1027_v62 = vsel %vm1022_vm5, %v1024_v6, %v1026_v10  ;;  %v2681_v14 = vrot.slane %v6340_v47, 2  ;;  %v2683_v33 = vrot.slane %v6345_v52, 2  ;;  %v6391_v10 = vld [vmem:[%s5894_s8 + $0x80] sm:$0xff]  }
  0x92   : > { %5691 = vmatprep.subr.msk.bf16.mxu0 %vm619_vm0, %v6290_v29 }
  0x93   : > { %v2684_v21 = vsel %vm2222_vm4, %v2681_v14, %v2683_v33 }
  0x95   : > { %5115 = vmatmul.mubr.msk.bf16.gmra.mrb[24].mxu1 %vm564_vm2, %v6075_v11 }
  0x96   : > { %5118 = vmatprep.mubr.msk.bf16.mxu1 %vm564_vm2, %v6092_v32 }
  0x98   : > { %5285 = vmatmul.mubr.msk.bf16.gmra.mrb[4].mxu0 %vm564_vm2, %v2670_v34  ;;  %v1030_v34 = vrot.slane %v5954_v48, 1 }
  0x99   : > { %5288 = vmatprep.mubr.msk.bf16.mxu0 %vm564_vm2, %v2672_v5  ;;  %v2682_v5 = vsel %vm2222_vm4, %v2679_v43, %v2681_v14  ;;  %v2686_v43 = vsel %vm2222_vm4, %v2683_v33, %v2685_v30  ;;  %v3734_v14 = vld [vmem:[%s6997_s3 + $0x20] sm:$0xff]  ;;  %v3735_v33 = vld [vmem:[%s6997_s3 + $0x28] sm:$0xff] }
  0x9a   : > { %v1031_v48 = vsel %vm1022_vm5, %v1028_v23, %v1030_v34  ;;  %v1033_v6 = vsel %vm1022_vm5, %v1030_v34, %v1032_v17  ;;  %v1038_v34 = vrot.slane %v6018_v51, 1  ;;  %v3737_v51 = vld [vmem:[%s6997_s3 + $0x38] sm:$0xff] }
  0x9d   : > { %5119 = vmatmul.mubr.msk.bf16.gmra.mrb[28].mxu1 %vm564_vm2, %v6098_v40 }
  0x9e   : > { %5122 = vmatprep.mubr.msk.bf16.mxu1 %vm564_vm2, %v6113_v56 }
  0xa0   : > { %5289 = vmatmul.mubr.msk.bf16.gmra.mrb[8].mxu0 %vm564_vm2, %v2674_v49  ;;  %v3730_v49 = vld [vmem:[%s6997_s3] sm:$0xff] }
  0xa1   : > { %5292 = vmatprep.mubr.msk.bf16.mxu0 %vm564_vm2, %v2676_v36  ;;  %3768 = vperm.xlu0 %5719, %v3730_v49   ;;  %v2687_v36 = vrot.slane %v6369_v24, 2 }
  0xa3   : > { %v2688_v23 = vsel %vm2222_vm4, %v2685_v30, %v2687_v36 }
  0xa5   : > { %5123 = vmatmul.mubr.msk.bf16.gmra.mrb[32].mxu1 %vm564_vm2, %v6120_v4  ;;  %3773 = vperm.xlu0 %5719, %v3731_v42   ;;  %v2980_v42 = vshll.u32 %v6247_v37, 16 }
  0xa6   : > { %5128 = vmatprep.mubr.msk.bf16.mxu1 %vm564_vm2, %v1025_v18  ;;  %v1034_v18 = vrot.slane %v5974_v0, 1  ;;  %v3733_v0 = vld [vmem:[%s6997_s3 + $0x18] sm:$0xff] }
  0xa7   : > { %3783 = vperm.xlu1 %5720, %v3733_v0  }
  0xa8   : > { %5293 = vmatmul.mubr.msk.bf16.gmra.mrb[12].mxu0 %vm564_vm2, %v2678_v45  ;;  %v1036_v45 = vrot.slane %v6002_v35, 1  ;;  %v2689_v35 = vrot.slane %v6391_v10, 2 }
  0xa9   : > { %5296 = vmatprep.mubr.msk.bf16.mxu0 %vm564_vm2, %v2680_v44  ;;  %v6396_v44 = vld [vmem:[%s5894_s8 + $0x88] sm:$0xff]   ;;  %3788 = vperm.xlu0 %5719, %v3734_v14   ;;  %v5779_v14 = vld [vmem:[%s5894_s8 + $0xa0] ss:$0 sps:$4 sm:$0x33]  }
  0xaa   : > { %v1039_v49 = vsel %vm1022_vm5, %v1036_v45, %v1038_v34 }
  0xab   : > { %3793 = vperm.xlu1 %5720, %v3735_v33   ;;  %v2982_v33 = vrot.slane %v2980_v42, 3  ;;  %v3744_v42 = vld [vmem:[%s6997_s3 + $0x70] sm:$0xff] }
  0xad   : > { %5129 = vmatmul.mubr.msk.bf16.vlgmr.msra.gmra.mrb[0].mxu1 %vm564_vm2, %v1027_v62  ;;  %v1035_v62 = vsel %vm1022_vm5, %v1032_v17, %v1034_v18  ;;  %v6421_v17 = vld [vmem:[%s5894_s8 + $0x90] sm:$0xff]   ;;  %3798 = vperm.xlu0 %5719, %v3736_v61  }
  0xae   : > { %5132 = vmatprep.mubr.msk.bf16.mxu1 %vm564_vm2, %v1029_v19  ;;  %5165 = vmatpush3.bf16.msra.mxu1 %v1554_v39  ;;  %v1037_v19 = vsel %vm1022_vm5, %v1034_v18, %v1036_v45  ;;  %v2691_v39 = vrot.slane %v6396_v44, 2  ;;  %v2985_v18 = vshrl.u32 %v6250_v38, 16  ;;  %v3739_v45 = vld [vmem:[%s6997_s3 + $0x48] sm:$0xff] }
  0xaf   : > { %5687 = vmatprep.subr.msk.bf16.mxu1 %vm619_vm0, %v5783_v9  ;;  %v1040_v9 = vrot.slane %v6029_v63, 1  ;;  %v2693_v63 = vrot.slane %v6421_v17, 2  ;;  %3803 = vperm.xlu1 %5720, %v3737_v51   ;;  %v2997_v51 = vshll.u32 %v6263_v46, 16 }
  0xb0   : > { %5297 = vmatmul.mubr.msk.bf16.gmra.mrb[16].mxu0 %vm564_vm2, %v2682_v5  ;;  %v2690_v5 = vsel %vm2222_vm4, %v2687_v36, %v2689_v35  ;;  %v2977_v36 = vshrl.u32 %v6247_v37, 16  ;;  %v2987_v61 = vrot.slane %v2985_v18, 2  ;;  %v1046_v18 = vrot.slane %v6070_v58, 1  ;;  %v3745_v58 = vld [vmem:[%s6997_s3 + $0x78] sm:$0xff] }
  0xb1   : > { %5300 = vmatprep.mubr.msk.bf16.mxu0 %vm564_vm2, %v2684_v21  ;;  %v6425_v21 = vld [vmem:[%s5894_s8 + $0x98] sm:$0xff]   ;;  %v1041_v30 = vsel %vm1022_vm5, %v1038_v34, %v1040_v9  ;;  %3808 = vperm.xlu0 %5719, %v3738_v54   ;;  %v2694_v37 = vsel %vm2222_vm4, %v2691_v39, %v2693_v63 }
  0xb3   : > { %3813 = vperm.xlu1 %5720, %v3739_v45  }
  0xb5   : > { %5133 = vmatmul.mubr.msk.bf16.gmra.mrb[4].mxu1 %vm564_vm2, %v1031_v48  ;;  %v2692_v48 = vsel %vm2222_vm4, %v2689_v35, %v2691_v39  ;;  %v1044_v35 = vrot.slane %v6056_v41, 1  ;;  %v3742_v39 = vld [vmem:[%s6997_s3 + $0x60] sm:$0xff]  ;;  %v2697_v41 = vrot.slane %v5779_v14, 2 }
  0xb6   : > { %5136 = vmatprep.mubr.msk.bf16.mxu1 %vm564_vm2, %v1033_v6  ;;  %v2695_v6 = vrot.slane %v6425_v21, 2 }
  0xb8   : > { %5301 = vmatmul.mubr.msk.bf16.gmra.mrb[20].mxu0 %vm564_vm2, %v2686_v43  ;;  %v2988_v43 = vshll.u32 %v6250_v38, 16  ;;  %v2696_v0 = vsel %vm2222_vm4, %v2693_v63, %v2695_v6  ;;  %v3003_v63 = vshrl.u32 %v6267_v50, 16 }
  0xb9   : > { %5304 = vmatprep.mubr.msk.bf16.mxu0 %vm564_vm2, %v2688_v23  ;;  %v3740_v23 = vld [vmem:[%s6997_s3 + $0x50] sm:$0xff] }
  0xba   : > { %v2990_v34 = vrot.slane %v2988_v43, 3  ;;  %3818 = vperm.xlu0 %5719, %v3740_v23   ;;  %v2698_v43 = vsel %vm2222_vm4, %v2695_v6, %v2697_v41  ;;  %v2999_v23 = vrot.slane %v2997_v51, 3  ;;  %v3746_v6 = vld [vmem:[%s6997_s3 + $0x80] sm:$0xff]  ;;  %v3748_v41 = vld [vmem:[%s6997_s3 + $0x90] sm:$0xff] }
  0xbd   : > { %5137 = vmatmul.mubr.msk.bf16.gmra.mrb[8].mxu1 %vm564_vm2, %v1035_v62  ;;  %v1042_v62 = vrot.slane %v6046_v25, 1  ;;  %v3741_v25 = vld [vmem:[%s6997_s3 + $0x58] sm:$0xff] }
  0xbe   : > { %5140 = vmatprep.mubr.msk.bf16.mxu1 %vm564_vm2, %v1037_v19  ;;  %v2979_v19 = vrot.slane %v2977_v36, 2  ;;  %3823 = vperm.xlu1 %5720, %v3741_v25   ;;  %v3743_v36 = vld [vmem:[%s6997_s3 + $0x68] sm:$0xff]  ;;  %v3024_v25 = vshll.u32 %v6285_v28, 16 }
  0xbf   : > { %3828 = vperm.xlu0 %5719, %v3742_v39   ;;  %v3747_v39 = vld [vmem:[%s6997_s3 + $0x88] sm:$0xff] }
  0xc0   : > { %5305 = vmatmul.mubr.msk.bf16.gmra.mrb[24].mxu0 %vm564_vm2, %v2690_v5  ;;  %v1043_v5 = vsel %vm1022_vm5, %v1040_v9, %v1042_v62  ;;  %v2983_v54 = vor.u32 %v2982_v33, %v2979_v19  ;;  %v2991_v9 = vor.u32 %v2990_v34, %v2987_v61  ;;  %v1047_v19 = vsel %vm1022_vm5, %v1044_v35, %v1046_v18 }
  0xc1   : > { %5308 = vmatprep.mubr.msk.bf16.mxu0 %vm564_vm2, %v2692_v48  ;;  %v1045_v48 = vsel %vm1022_vm5, %v1042_v62, %v1044_v35  ;;  %v1048_v62 = vrot.slane %v6075_v11, 1  ;;  %v3012_v61 = vshrl.u32 %v6279_v53, 16  ;;  %v3015_v34 = vshll.u32 %v6279_v53, 16 }
  0xc2   : > { %3833 = vperm.xlu1 %5720, %v3743_v36   ;;  %v3021_v35 = vshrl.u32 %v6285_v28, 16 }
  0xc3   : > { %3838 = vperm.xlu0 %5719, %v3744_v42   ;;  %v1049_v33 = vsel %vm1022_vm5, %v1046_v18, %v1048_v62  ;;  %v3014_v51 = vrot.slane %v3012_v61, 2  ;;  %v3026_v18 = vrot.slane %v3024_v25, 3  ;;  %v1056_v61 = vrot.slane %v6120_v4, 1 }
  0xc4   : > { %v3023_v42 = vrot.slane %v3021_v35, 2 }
  0xc5   : > { %5141 = vmatmul.mubr.msk.bf16.gmra.mrb[12].mxu1 %vm564_vm2, %v1039_v49  ;;  %v2994_v49 = vshrl.u32 %v6263_v46, 16 }
  0xc6   : > { %5144 = vmatprep.mubr.msk.bf16.mxu1 %vm564_vm2, %v1041_v30  ;;  %v3006_v30 = vshll.u32 %v6267_v50, 16  ;;  %3843 = vperm.xlu1 %5720, %v3745_v58   ;;  %v1054_v58 = vrot.slane %v6113_v56, 1  ;;  %v3753_v56 = vld [vmem:[%s6997_s3 + $0xb8] sm:$0xff] }
  0xc7   : > { %v2996_v45 = vrot.slane %v2994_v49, 2  ;;  %3848 = vperm.xlu0 %5719, %v3746_v6  }
  0xc8   : > { %5309 = vmatmul.mubr.msk.bf16.gmra.mrb[28].mxu0 %vm564_vm2, %v2694_v37  ;;  %v2992_v37 = vsel %vm2975_vm6, %v2983_v54, %v2991_v9  ;;  %v3008_v14 = vrot.slane %v3006_v30, 3  ;;  %v3017_v54 = vrot.slane %v3015_v34, 3  ;;  %v3515_v30 = vsel %vm619_vm0, %v6290_v29, 0  ;;  %v3750_v29 = vld [vmem:[%s6997_s3 + $0xa0] sm:$0xff] }
  0xc9   : > { %5312 = vmatprep.mubr.msk.bf16.mxu0 %vm564_vm2, %v2696_v0  ;;  %v3005_v0 = vrot.slane %v3003_v63, 2  ;;  %v3000_v11 = vor.u32 %v2999_v23, %v2996_v45  ;;  %v1052_v63 = vrot.slane %v6098_v40, 1  ;;  %v3749_v40 = vld [vmem:[%s6997_s3 + $0x98] sm:$0xff]  ;;  %v1057_v4 = vsel %vm1022_vm5, %v1054_v58, %v1056_v61 }
  0xca   : > { %3853 = vperm.xlu1 %5720, %v3747_v39   ;;  %v3018_v45 = vor.u32 %v3017_v54, %v3014_v51  ;;  %v3057_v54 = vshrl.u32 %v6327_v8, 16 }
  0xcb   : > { %v3001_v49 = vsel %vm2975_vm6, %v2991_v9, %v3000_v11  ;;  %3858 = vperm.xlu0 %5719, %v3748_v41   ;;  %v3033_v9 = vshll.u32 %v6304_v3, 16  ;;  %v1055_v39 = vsel %vm1022_vm5, %v1052_v63, %v1054_v58  ;;  %v3069_v58 = vshll.u32 %v6340_v47, 16 }
  0xcd   : > { %5145 = vmatmul.mubr.msk.bf16.gmra.mrb[16].mxu1 %vm564_vm2, %v1043_v5  ;;  %v3009_v5 = vor.u32 %v3008_v14, %v3005_v0  ;;  %v3042_v0 = vshll.u32 %v6308_v1, 16  ;;  %v3751_v14 = vld [vmem:[%s6997_s3 + $0xa8] sm:$0xff] }
  0xce   : > { %5148 = vmatprep.mubr.msk.bf16.mxu1 %vm564_vm2, %v1045_v48  ;;  %v1050_v48 = vrot.slane %v6092_v32, 1  ;;  %v3030_v32 = vshrl.u32 %v6304_v3, 16  ;;  %3863 = vperm.xlu1 %5720, %v3749_v40   ;;  %v5784_v40 = vld [vmem:[%s5894_s8 + $0x10] sm:$0xff]  }
  0xcf   : > { %v3010_v36 = vsel %vm2975_vm6, %v3000_v11, %v3009_v5  ;;  %3868 = vperm.xlu0 %5719, %v3750_v29   ;;  %v3035_v11 = vrot.slane %v3033_v9, 3  ;;  %v3044_v25 = vrot.slane %v3042_v0, 3  ;;  %v1462_v9 = vrot.slane %v5925_v20, 1 }
  0xd0   : > { %5313 = vmatmul.mubr.msk.bf16.gmra.mrb[32].mxu0 %vm564_vm2, %v2698_v43  ;;  %v1051_v43 = vsel %vm1022_vm5, %v1048_v62, %v1050_v48  ;;  %v1053_v23 = vsel %vm1022_vm5, %v1050_v48, %v1052_v63  ;;  %v3039_v62 = vshrl.u32 %v6308_v1, 16  ;;  %v3032_v6 = vrot.slane %v3030_v32, 2 }
  0xd1   : > { %5318 = vmatprep.mubr.msk.bf16.mxu0 %vm564_vm2, %v2992_v37  ;;  %v3027_v37 = vor.u32 %v3026_v18, %v3023_v42  ;;  %v3048_v48 = vshrl.u32 %v6322_v13, 16  ;;  %v3060_v63 = vshll.u32 %v6327_v8, 16  ;;  %v1058_v18 = vrot.slane %v6143_v27, 1  ;;  %v3758_v27 = vld [vmem:[%s6997_s3 + $0xe0] sm:$0xff] }
  0xd2   : > { %v3041_v35 = vrot.slane %v3039_v62, 2  ;;  %3873 = vperm.xlu1 %5720, %v3751_v14   ;;  %v3036_v41 = vor.u32 %v3035_v11, %v3032_v6  ;;  %v1463_v29 = vrot.slane %v5784_v40, 1  ;;  %v3075_v11 = vshrl.u32 %v6345_v52, 16 }
  0xd3   : > { %v3028_v34 = vsel %vm2975_vm6, %v3018_v45, %v3027_v37  ;;  %v3062_v62 = vrot.slane %v3060_v63, 3  ;;  %v1059_v20 = vsel %vm1022_vm5, %v1056_v61, %v1058_v18  ;;  %v3759_v61 = vld [vmem:[%s6997_s3 + $0xe8] sm:$0xff]  ;;  %v3761_v63 = vld [vmem:[%s6997_s3 + $0xf8] sm:$0xff]  ;;  %v3084_v18 = vshrl.u32 %v6360_v16, 16 }
  0xd4   : > { %v3045_v51 = vor.u32 %v3044_v25, %v3041_v35  ;;  %v3037_v42 = vsel %vm2975_vm6, %v3027_v37, %v3036_v41  ;;  %v3757_v37 = vld [vmem:[%s6997_s3 + $0xd8] sm:$0xff]  ;;  %v1464_v14 = vsel %vm1022_vm5, %v1462_v9, %v1463_v29  ;;  %v3093_v9 = vshrl.u32 %v6369_v24, 16 }
  0xd5   : > { %5149 = vmatmul.mubr.msk.bf16.gmra.mrb[20].mxu1 %vm564_vm2, %v1047_v19  ;;  %v3752_v19 = vld [vmem:[%s6997_s3 + $0xb0] sm:$0xff]  ;;  %v5785_v35 = vld [vmem:[%s5894_s8 + $0x18] sm:$0xff]   ;;  %v3096_v40 = vshll.u32 %v6369_v24, 16 }
  0xd6   : > { %5152 = vmatprep.mubr.msk.bf16.mxu1 %vm564_vm2, %v1049_v33  ;;  %v3019_v33 = vsel %vm2975_vm6, %v3009_v5, %v3018_v45  ;;  %3878 = vperm.xlu0 %5719, %v3752_v19   ;;  %v3754_v5 = vld [vmem:[%s6997_s3 + $0xc0] sm:$0xff]  ;;  %v3046_v45 = vsel %vm2975_vm6, %v3036_v41, %v3045_v51  ;;  %v3066_v19 = vshrl.u32 %v6340_v47, 16  ;;  %v1465_v25 = vrot.slane %v5785_v35, 1 }
  0xd7   : > { %3883 = vperm.xlu1 %5720, %v3753_v56   ;;  %v3071_v56 = vrot.slane %v3069_v58, 3  ;;  %v3095_v58 = vrot.slane %v3093_v9, 2  ;;  %v3105_v35 = vshll.u32 %v6391_v10, 16  ;;  %v3123_v9 = vshll.u32 %v6421_v17, 16 }
  0xd8   : > { %5319 = vmatmul.mubr.msk.bf16.vlgmr.msra.gmra.mrb[0].mxu0 %vm564_vm2, %v3001_v49  ;;  %v3051_v49 = vshll.u32 %v6322_v13, 16  ;;  %v3068_v41 = vrot.slane %v3066_v19, 2 }
  0xd9   : > { %5355 = vmatpush3.bf16.msra.mxu0 %v3515_v30  ;;  %5322 = vmatprep.mubr.msk.bf16.mxu0 %vm564_vm2, %v3010_v36  ;;  %v3755_v30 = vld [vmem:[%s6997_s3 + $0xc8] sm:$0xff]  ;;  %v3756_v36 = vld [vmem:[%s6997_s3 + $0xd0] sm:$0xff] }
  0xda   : > { %3888 = vperm.xlu0 %5719, %v3754_v5   ;;  %v3053_v32 = vrot.slane %v3051_v49, 3  ;;  %v5786_v5 = vld [vmem:[%s5894_s8 + $0x20] sm:$0xff]   ;;  %v3077_v49 = vrot.slane %v3075_v11, 2  ;;  %v3098_v11 = vrot.slane %v3096_v40, 3 }
  0xdb   : > { %3893 = vperm.xlu1 %5720, %v3755_v30   ;;  %v3762_v30 = vld [vmem:[%s6997_s3 + $0x100] sm:$0xff] }
  0xdd   : > { %5153 = vmatmul.mubr.msk.bf16.gmra.mrb[24].mxu1 %vm564_vm2, %v1051_v43  ;;  %v3050_v43 = vrot.slane %v3048_v48, 2 }
  0xde   : > { %5156 = vmatprep.mubr.msk.bf16.mxu1 %vm564_vm2, %v1053_v23  ;;  %v3059_v23 = vrot.slane %v3057_v54, 2  ;;  %3898 = vperm.xlu0 %5719, %v3756_v36   ;;  %v3072_v36 = vor.u32 %v3071_v56, %v3068_v41  ;;  %v3114_v41 = vshll.u32 %v6396_v44, 16  ;;  %v5789_v56 = vld [vmem:[%s5894_s8 + $0x38] sm:$0xff]  }
  0xdf   : > { %v3054_v0 = vor.u32 %v3053_v32, %v3050_v43  ;;  %3903 = vperm.xlu1 %5720, %v3757_v37   ;;  %v3087_v43 = vshll.u32 %v6360_v16, 16 }
  0xe0   : > { %5323 = vmatmul.mubr.msk.bf16.gmra.mrb[4].mxu0 %vm564_vm2, %v3019_v33  ;;  %v3063_v6 = vor.u32 %v3062_v62, %v3059_v23  ;;  %v3078_v33 = vshll.u32 %v6345_v52, 16  ;;  %v5787_v23 = vld [vmem:[%s5894_s8 + $0x28] sm:$0xff]  }
  0xe1   : > { %5326 = vmatprep.mubr.msk.bf16.mxu0 %vm564_vm2, %v3028_v34  ;;  %v3760_v34 = vld [vmem:[%s6997_s3 + $0xf0] sm:$0xff]  ;;  %v1469_v62 = vrot.slane %v5787_v23, 1  ;;  %v5791_v23 = vld [vmem:[%s5894_s8 + $0x48] sm:$0xff]  }
  0xe2   : > { %3908 = vperm.xlu0 %5719, %v3758_v27   ;;  %v3064_v48 = vsel %vm2975_vm6, %v3054_v0, %v3063_v6  ;;  %v3080_v54 = vrot.slane %v3078_v33, 3  ;;  %v3073_v37 = vsel %vm2975_vm6, %v3063_v6, %v3072_v36  ;;  %v3086_v27 = vrot.slane %v3084_v18, 2  ;;  %v3765_v33 = vld [vmem:[%s6997_s3 + $0x118] sm:$0xff] }
  0xe3   : > { %3913 = vperm.xlu1 %5720, %v3759_v61  }
  0xe4   : > { %v3081_v32 = vor.u32 %v3080_v54, %v3077_v49  ;;  %v3107_v49 = vrot.slane %v3105_v35, 3  ;;  %v5790_v54 = vld [vmem:[%s5894_s8 + $0x40] sm:$0xff]  }
  0xe5   : > { %5157 = vmatmul.mubr.msk.bf16.gmra.mrb[28].mxu1 %vm564_vm2, %v1055_v39  ;;  %v3055_v39 = vsel %vm2975_vm6, %v3045_v51, %v3054_v0  ;;  %v1466_v51 = vsel %vm1022_vm5, %v1463_v29, %v1465_v25  ;;  %v3763_v29 = vld [vmem:[%s6997_s3 + $0x108] sm:$0xff]  ;;  %v5788_v0 = vld [vmem:[%s5894_s8 + $0x30] sm:$0xff]  }
  0xe6   : > { %5160 = vmatprep.mubr.msk.bf16.mxu1 %vm564_vm2, %v1057_v4  ;;  %v1467_v4 = vrot.slane %v5786_v5, 1  ;;  %3918 = vperm.xlu0 %5719, %v3760_v34   ;;  %v3082_v19 = vsel %vm2975_vm6, %v3072_v36, %v3081_v32  ;;  %v3102_v34 = vshrl.u32 %v6391_v10, 16  ;;  %v1473_v5 = vrot.slane %v5789_v56, 1 }
  0xe7   : > { %3923 = vperm.xlu1 %5720, %v3761_v63   ;;  %v1475_v63 = vrot.slane %v5790_v54, 1  ;;  %v3116_v36 = vrot.slane %v3114_v41, 3  ;;  %v5793_v41 = vld [vmem:[%s5894_s8 + $0x58] sm:$0xff]  }
  0xe8   : > { %5327 = vmatmul.mubr.msk.bf16.gmra.mrb[8].mxu0 %vm564_vm2, %v3037_v42  ;;  %v1468_v42 = vsel %vm1022_vm5, %v1465_v25, %v1467_v4  ;;  %v3099_v25 = vor.u32 %v3098_v11, %v3095_v58  ;;  %v1481_v56 = vrot.slane %v5793_v41, 1  ;;  %v1884_v41 = vshrl.u32 %v6189_v57, 16 }
  0xe9   : > { %5330 = vmatprep.mubr.msk.bf16.mxu0 %vm564_vm2, %v3046_v45  ;;  %v3764_v45 = vld [vmem:[%s6997_s3 + $0x110] sm:$0xff] }
  0xea   : > { %3928 = vperm.xlu0 %5719, %v3762_v30  }
  0xeb   : > { %3933 = vperm.xlu1 %5720, %v3763_v29   ;;  %v3129_v29 = vshrl.u32 %v6425_v21, 16 }
  0xed   : > { %5161 = vmatmul.mubr.msk.bf16.gmra.mrb[32].mxu1 %vm564_vm2, %v1059_v20  ;;  %v3089_v20 = vrot.slane %v3087_v43, 3  ;;  %v1476_v43 = vsel %vm1022_vm5, %v1473_v5, %v1475_v63  ;;  %v3131_v11 = vrot.slane %v3129_v29, 2 }
  0xee   : > { %5166 = vmatprep.mubr.msk.bf16.mxu1 %vm564_vm2, %v1464_v14  ;;  %v1471_v14 = vrot.slane %v5788_v0, 1  ;;  %3938 = vperm.xlu0 %5719, %v3764_v45   ;;  %v3132_v45 = vshll.u32 %v6425_v21, 16  ;;  %v5792_v0 = vld [vmem:[%s5894_s8 + $0x50] sm:$0xff]  }
  0xef   : > { %v3090_v6 = vor.u32 %v3089_v20, %v3086_v27  ;;  %3943 = vperm.xlu1 %5720, %v3765_v33   ;;  %v3125_v20 = vrot.slane %v3123_v9, 3 }
  0xf0   : > { %5331 = vmatmul.mubr.msk.bf16.gmra.mrb[12].mxu0 %vm564_vm2, %v3055_v39  ;;  %v1472_v61 = vsel %vm1022_vm5, %v1469_v62, %v1471_v14  ;;  %v3111_v39 = vshrl.u32 %v6396_v44, 16  ;;  %v3134_v33 = vrot.slane %v3132_v45, 3  ;;  %v3428_v45 = vrot.slane %v6267_v50, 3 }
  0xf1   : > { %5334 = vmatprep.mubr.msk.bf16.mxu0 %vm564_vm2, %v3064_v48  ;;  %v3104_v48 = vrot.slane %v3102_v34, 2  ;;  %v3100_v30 = vsel %vm2975_vm6, %v3090_v6, %v3099_v25  ;;  %v3430_v50 = vrot.slane %v6279_v53, 3 }
  0xf3   : > { %v3108_v18 = vor.u32 %v3107_v49, %v3104_v48  ;;  %v1483_v49 = vrot.slane %v6170_v55, 1 }
  0xf5   : > { %5167 = vmatmul.mubr.msk.bf16.vlgmr.msra.gmra.mrb[0].mxu1 %vm564_vm2, %v1466_v51  ;;  %v3113_v51 = vrot.slane %v3111_v39, 2  ;;  %v3416_v39 = vld [vmem:[%s5894_s8 + $0x10] sm:$0x8] }
  0xf6   : > { %5170 = vmatprep.mubr.msk.bf16.mxu1 %vm564_vm2, %v1468_v42  ;;  %5393 = vmatpush3.bf16.msra.mxu1 %v5876_v2  ;;  %v1470_v2 = vsel %vm1022_vm5, %v1467_v4, %v1469_v62  ;;  %v3091_v4 = vsel %vm2975_vm6, %v3081_v32, %v3090_v6  ;;  %v1474_v42 = vsel %vm1022_vm5, %v1471_v14, %v1473_v5  ;;  %v3120_v32 = vshrl.u32 %v6421_v17, 16 }
  0xf7   : > { %v3117_v40 = vor.u32 %v3116_v36, %v3113_v51  ;;  %v1477_v62 = vrot.slane %v5791_v23, 1  ;;  %v1479_v14 = vrot.slane %v5792_v0, 1  ;;  %v1484_v36 = vsel %vm1022_vm5, %v1481_v56, %v1483_v49 }
  0xf8   : > { %5335 = vmatmul.mubr.msk.bf16.gmra.mrb[16].mxu0 %vm564_vm2, %v3073_v37  ;;  %v3109_v37 = vsel %vm2975_vm6, %v3099_v25, %v3108_v18  ;;  %v3122_v27 = vrot.slane %v3120_v32, 2  ;;  %v3135_v25 = vor.u32 %v3134_v33, %v3131_v11  ;;  %v1487_v32 = vrot.slane %v6195_v60, 1 }
  0xf9   : > { %5338 = vmatprep.mubr.msk.bf16.mxu0 %vm564_vm2, %v3082_v19  ;;  %v6648_v19 = vld [vmem:[%s5894_s8 + $0xa0] ss:$0 sps:$4 sm:$0x77]   ;;  %v3118_v58 = vsel %vm2975_vm6, %v3108_v18, %v3117_v40  ;;  %v3424_v18 = vrot.slane %v6250_v38, 3  ;;  %v3426_v38 = vrot.slane %v6263_v46, 3  ;;  %v1489_v23 = vrot.slane %v6207_v7, 1 }
  0xfa   : > { %v3126_v6 = vor.u32 %v3125_v20, %v3122_v27  ;;  %v3138_v34 = vshrl.u32 %v6648_v19, 16  ;;  %v3141_v35 = vshll.u32 %v6648_v19, 16  ;;  %v3432_v0 = vrot.slane %v6285_v28, 3 }
  0xfb   : > { %v3429_v27 = vsel %vm3422_vm7, %v3426_v38, %v3428_v45  ;;  %v1490_v46 = vsel %vm1022_vm5, %v1487_v32, %v1489_v23  ;;  %v1495_v11 = vrot.slane %v6227_v26, 1  ;;  %v1875_v33 = vshrl.u32 %v6170_v55, 16 }
  0xfc   : > { %v3127_v5 = vsel %vm2975_vm6, %v3117_v40, %v3126_v6  ;;  %v3143_v48 = vrot.slane %v3141_v35, 3  ;;  %v3136_v54 = vsel %vm2975_vm6, %v3126_v6, %v3135_v25  ;;  %v3433_v53 = vsel %vm3422_vm7, %v3430_v50, %v3432_v0  ;;  %v5782_v6 = vld [vmem:[%s5894_s8 + $0x98] ss:$0 sps:$4 sm:$0x11]  }
  0xfd   : > { %5171 = vmatmul.mubr.msk.bf16.gmra.mrb[4].mxu1 %vm564_vm2, %v1470_v2  ;;  %v1478_v2 = vsel %vm1022_vm5, %v1475_v63, %v1477_v62  ;;  %v4678_v63 = vcombine.low %v3416_v39, %v6237_v31  ;;  %v1877_v35 = vrot.slane %v1875_v33, 1  ;;  %v3436_v39 = vrot.slane %v6308_v1, 3 }
  0xfe   : > { %5174 = vmatprep.mubr.msk.bf16.mxu1 %vm564_vm2, %v1472_v61  ;;  %v1480_v61 = vsel %vm1022_vm5, %v1477_v62, %v1479_v14  ;;  %v3427_v62 = vsel %vm3422_vm7, %v3424_v18, %v3426_v38 }
 0x100   : > { %5339 = vmatmul.mubr.msk.bf16.gmra.mrb[20].mxu0 %vm564_vm2, %v3091_v4  ;;  %v3140_v4 = vrot.slane %v3138_v34, 2 }
 0x101   : > { %5342 = vmatprep.mubr.msk.bf16.mxu0 %vm564_vm2, %v3100_v30  ;;  %v1482_v30 = vsel %vm1022_vm5, %v1479_v14, %v1481_v56  ;;  %v1493_v14 = vrot.slane %v6223_v22, 1  ;;  %v1887_v56 = vshll.u32 %v6189_v57, 16 }
 0x102   : > { %v3144_v51 = vor.u32 %v3143_v48, %v3140_v4  ;;  %v1896_v48 = vshll.u32 %v6195_v60, 16 }
 0x103   : > { %v1496_v34 = vsel %vm1022_vm5, %v1493_v14, %v1495_v11 }
 0x104   : > { %v3145_v31 = vsel %vm2975_vm6, %v3135_v25, %v3144_v51 }
 0x105   : > { %5175 = vmatmul.mubr.msk.bf16.gmra.mrb[8].mxu1 %vm564_vm2, %v1474_v42  ;;  %v3423_v42 = vrot.slane %v4678_v63, 3  ;;  %v1889_v63 = vrot.slane %v1887_v56, 2 }
 0x106   : > { %5178 = vmatprep.mubr.msk.bf16.mxu1 %vm564_vm2, %v1476_v43  ;;  %v1485_v43 = vrot.slane %v6189_v57, 1 }
 0x107   : > { %v3425_v9 = vsel %vm3422_vm7, %v3423_v42, %v3424_v18  ;;  %v3440_v42 = vrot.slane %v6327_v8, 3  ;;  %v1902_v18 = vshrl.u32 %v6207_v7, 16 }
 0x108   : > { %5343 = vmatmul.mubr.msk.bf16.gmra.mrb[24].mxu0 %vm564_vm2, %v3109_v37  ;;  %v1486_v40 = vsel %vm1022_vm5, %v1483_v49, %v1485_v43  ;;  %v1488_v29 = vsel %vm1022_vm5, %v1485_v43, %v1487_v32  ;;  %v1491_v37 = vrot.slane %v6211_v12, 1  ;;  %v1905_v43 = vshll.u32 %v6207_v7, 16 }
 0x109   : > { %5346 = vmatprep.mubr.msk.bf16.mxu0 %vm564_vm2, %v3118_v58  ;;  %v3431_v58 = vsel %vm3422_vm7, %v3428_v45, %v3430_v50 }
 0x10a   : > { %v1492_v20 = vsel %vm1022_vm5, %v1489_v23, %v1491_v37  ;;  %v1494_v28 = vsel %vm1022_vm5, %v1491_v37, %v1493_v14  ;;  %v1907_v38 = vrot.slane %v1905_v43, 2  ;;  %v1920_v37 = vshrl.u32 %v6223_v22, 16 }
 0x10c   : > { %v1922_v14 = vrot.slane %v1920_v37, 1 }
 0x10d   : > { %5179 = vmatmul.mubr.msk.bf16.gmra.mrb[12].mxu1 %vm564_vm2, %v1478_v2  ;;  %v1878_v2 = vshll.u32 %v6170_v55, 16  ;;  %v1497_v55 = vrot.slane %v5782_v6, 1  ;;  %v1941_v6 = vshll.u32 %v6243_v59, 16 }
 0x10e   : > { %5182 = vmatprep.mubr.msk.bf16.mxu1 %vm564_vm2, %v1480_v61  ;;  %v3434_v61 = vrot.slane %v6304_v3, 3  ;;  %v1893_v3 = vshrl.u32 %v6195_v60, 16 }
 0x10f   : > { %v1880_v25 = vrot.slane %v1878_v2, 2  ;;  %v1498_v1 = vsel %vm1022_vm5, %v1495_v11, %v1497_v55  ;;  %v3446_v11 = vrot.slane %v6360_v16, 3 }
 0x110   : > { %5347 = vmatmul.mubr.msk.bf16.gmra.mrb[28].mxu0 %vm564_vm2, %v3127_v5  ;;  %v3435_v5 = vsel %vm3422_vm7, %v3432_v0, %v3434_v61  ;;  %v3437_v49 = vsel %vm3422_vm7, %v3434_v61, %v3436_v39  ;;  %v1895_v51 = vrot.slane %v1893_v3, 1  ;;  %v3456_v3 = vrot.slane %v6425_v21, 3 }
 0x111   : > { %5350 = vmatprep.mubr.msk.bf16.mxu0 %vm564_vm2, %v3136_v54  ;;  %v1881_v4 = vor.u32 %v1880_v25, %v1877_v35  ;;  %v1886_v54 = vrot.slane %v1884_v41, 1  ;;  %v3452_v41 = vrot.slane %v6396_v44, 3 }
 0x113   : > { %v1882_v57 = vsel %vm1775_vm3, %v6084_v15, %v1881_v4  ;;  %v1890_v60 = vor.u32 %v1889_v63, %v1886_v54  ;;  %v1914_v15 = vshll.u32 %v6211_v12, 16 }
 0x115   : > { %5183 = vmatmul.mubr.msk.bf16.gmra.mrb[16].mxu1 %vm564_vm2, %v1482_v30  ;;  %v3438_v30 = vrot.slane %v6322_v13, 3  ;;  %v1911_v13 = vshrl.u32 %v6211_v12, 16  ;;  %v1891_v8 = vsel %vm1775_vm3, %v1881_v4, %v1890_v60  ;;  %v1916_v23 = vrot.slane %v1914_v15, 2 }
 0x116   : > { %5186 = vmatprep.mubr.msk.bf16.mxu1 %vm564_vm2, %v1484_v36  ;;  %v1898_v36 = vrot.slane %v1896_v48, 2 }
 0x117   : > { %v1913_v45 = vrot.slane %v1911_v13, 1 }
 0x118   : > { %5351 = vmatmul.mubr.msk.bf16.gmra.mrb[32].mxu0 %vm564_vm2, %v3145_v31  ;;  %v3439_v31 = vsel %vm3422_vm7, %v3436_v39, %v3438_v30  ;;  %v1899_v32 = vor.u32 %v1898_v36, %v1895_v51  ;;  %v3450_v39 = vrot.slane %v6391_v10, 3  ;;  %v3454_v10 = vrot.slane %v6421_v17, 3 }
 0x119   : > { %5356 = vmatprep.mubr.msk.bf16.mxu0 %vm564_vm2, %v3425_v9  ;;  %v3441_v9 = vsel %vm3422_vm7, %v3438_v30, %v3440_v42  ;;  %v1917_v50 = vor.u32 %v1916_v23, %v1913_v45 }
 0x11a   : > { %v1900_v7 = vsel %vm1775_vm3, %v1890_v60, %v1899_v32  ;;  %v3455_v44 = vsel %vm3422_vm7, %v3452_v41, %v3454_v10  ;;  %v3457_v48 = vsel %vm3422_vm7, %v3454_v10, %v3456_v3  ;;  %v3779_v60 = vpop.permute.xlu1 %3778 }
 0x11d   : > { %5187 = vmatmul.mubr.msk.bf16.gmra.mrb[20].mxu1 %vm564_vm2, %v1486_v40  ;;  %v1904_v40 = vrot.slane %v1902_v18, 1 }
 0x11e   : > { %5190 = vmatprep.mubr.msk.bf16.mxu1 %vm564_vm2, %v1488_v29  ;;  %v3442_v29 = vrot.slane %v6340_v47, 3  ;;  %v1929_v47 = vshrl.u32 %v6227_v26, 16 }
 0x11f   : > { %v1908_v12 = vor.u32 %v1907_v38, %v1904_v40 }
 0x120   : > { %5357 = vmatmul.mubr.msk.bf16.vlgmr.msra.gmra.mrb[0].mxu0 %vm564_vm2, %v3427_v62  ;;  %v3444_v62 = vrot.slane %v6345_v52, 3  ;;  %v1931_v33 = vrot.slane %v1929_v47, 1  ;;  %v3769_v36 = vpop.permute.xlu0 %3768 }
 0x121   : > { %5360 = vmatprep.mubr.msk.bf16.mxu0 %vm564_vm2, %v3429_v27  ;;  %v1923_v27 = vshll.u32 %v6223_v22, 16  ;;  %v1909_v52 = vsel %vm1775_vm3, %v1899_v32, %v1908_v12  ;;  %v1918_v22 = vsel %vm1775_vm3, %v1908_v12, %v1917_v50 }
 0x122   : > { %v3445_v0 = vsel %vm3422_vm7, %v3442_v29, %v3444_v62  ;;  %v3447_v61 = vsel %vm3422_vm7, %v3444_v62, %v3446_v11 }
 0x124   : > { %v3774_v43 = vpop.permute.xlu0 %3773 }
 0x125   : > { %5191 = vmatmul.mubr.msk.bf16.gmra.mrb[24].mxu1 %vm564_vm2, %v1490_v46  ;;  %v3443_v46 = vsel %vm3422_vm7, %v3440_v42, %v3442_v29 }
 0x126   : > { %5194 = vmatprep.mubr.msk.bf16.mxu1 %vm564_vm2, %v1492_v20  ;;  %v1932_v20 = vshll.u32 %v6227_v26, 16  ;;  %v3784_v13 = vpop.permute.xlu1 %3783 }
 0x128   : > { %5361 = vmatmul.mubr.msk.bf16.gmra.mrb[4].mxu0 %vm564_vm2, %v3431_v58  ;;  %v1925_v58 = vrot.slane %v1923_v27, 2  ;;  %v1934_v2 = vrot.slane %v1932_v20, 2  ;;  %v3789_v15 = vpop.permute.xlu0 %3788 }
 0x129   : > { %5364 = vmatprep.mubr.msk.bf16.mxu0 %vm564_vm2, %v3433_v53  ;;  %v3448_v53 = vrot.slane %v6369_v24, 3  ;;  %v1943_v24 = vrot.slane %v1941_v6, 2 }
 0x12a   : > { %v1926_v26 = vor.u32 %v1925_v58, %v1922_v14  ;;  %v6799_v38 = vpop.permute.xlu1 %3793  ;;  %v6826_v58 = vld [vmem:[%s6996_s2] ss:$0 sm:$0xff] }
 0x12b   : > { %v3449_v16 = vsel %vm3422_vm7, %v3446_v11, %v3448_v53  ;;  %v3451_v56 = vsel %vm3422_vm7, %v3448_v53, %v3450_v39 }
 0x12c   : > { %v1927_v35 = vsel %vm1775_vm3, %v1917_v50, %v1926_v26 }
 0x12d   : > { %5195 = vmatmul.mubr.msk.bf16.gmra.mrb[28].mxu1 %vm564_vm2, %v1494_v28  ;;  %v1938_v28 = vshrl.u32 %v6243_v59, 16 }
 0x12e   : > { %5198 = vmatprep.mubr.msk.bf16.mxu1 %vm564_vm2, %v1496_v34  ;;  %v1935_v34 = vor.u32 %v1934_v2, %v1931_v33  ;;  %v6805_v23 = vpop.permute.xlu1 %3803 }
 0x12f   : > { %v1940_v25 = vrot.slane %v1938_v28, 1 }
 0x130   : > { %5365 = vmatmul.mubr.msk.bf16.gmra.mrb[8].mxu0 %vm564_vm2, %v3435_v5  ;;  %v1936_v55 = vsel %vm1775_vm3, %v1926_v26, %v1935_v34  ;;  %v3453_v5 = vsel %vm3422_vm7, %v3450_v39, %v3452_v41 }
 0x131   : > { %5368 = vmatprep.mubr.msk.bf16.mxu0 %vm564_vm2, %v3437_v49  ;;  %v1944_v59 = vor.u32 %v1943_v24, %v1940_v25  ;;  %v3458_v49 = vrot.slane %v6648_v19, 3 }
 0x133   : > { %v1945_v4 = vsel %vm1775_vm3, %v1935_v34, %v1944_v59 }
 0x135   : > { %5199 = vmatmul.mubr.msk.bf16.gmra.mrb[32].mxu1 %vm564_vm2, %v1498_v1  ;;  %v3459_v1 = vsel %vm3422_vm7, %v3456_v3, %v3458_v49 }
 0x136   : > { %5224 = vmatprep.mubr.msk.bf16.mxu1 %vm564_vm2, %v1882_v57 }
 0x138   : > { %5369 = vmatmul.mubr.msk.bf16.gmra.mrb[12].mxu0 %vm564_vm2, %v3439_v31 }
 0x139   : > { %5372 = vmatprep.mubr.msk.bf16.mxu0 %vm564_vm2, %v3441_v9 }
 0x13d   : > { %5225 = vmatmul.mubr.msk.bf16.vlgmr.msra.gmra.mrb[20].mxu1 %vm564_vm2, %v1891_v8 }
 0x13e   : > { %5228 = vmatprep.mubr.msk.bf16.mxu1 %vm564_vm2, %v1900_v7  ;;  %v3799_v7 = vpop.permute.xlu0 %3798 }
 0x140   : > { %5373 = vmatmul.mubr.msk.bf16.gmra.mrb[16].mxu0 %vm564_vm2, %v3443_v46  ;;  %v6815_v46 = vpop.permute.xlu1 %3813 }
 0x141   : > { %5376 = vmatprep.mubr.msk.bf16.mxu0 %vm564_vm2, %v3445_v0 }
 0x142   : > { %v6811_v37 = vpop.permute.xlu0 %3808 }
 0x144   : > { %v6819_v47 = vpop.permute.xlu1 %3823 }
 0x145   : > { %5229 = vmatmul.mubr.msk.bf16.gmra.mrb[24].mxu1 %vm564_vm2, %v1909_v52 }
 0x146   : > { %5232 = vmatprep.mubr.msk.bf16.mxu1 %vm564_vm2, %v1918_v22  ;;  %v6817_v50 = vpop.permute.xlu0 %3818 }
 0x148   : > { %5377 = vmatmul.mubr.msk.bf16.gmra.mrb[20].mxu0 %vm564_vm2, %v3447_v61  ;;  %v6831_v61 = vpop.permute.xlu1 %3833 }
 0x149   : > { %5380 = vmatprep.mubr.msk.bf16.mxu0 %vm564_vm2, %v3449_v16 }
 0x14a   : > { %v6821_v14 = vpop.permute.xlu0 %3828 }
 0x14d   : > { %5233 = vmatmul.mubr.msk.bf16.gmra.mrb[28].mxu1 %vm564_vm2, %v1927_v35 }
 0x14e   : > { %5236 = vmatprep.mubr.msk.bf16.mxu1 %vm564_vm2, %v1936_v55  ;;  %v6840_v55 = vpop.permute.xlu0 %3838 }
 0x150   : > { %5381 = vmatmul.mubr.msk.bf16.gmra.mrb[24].mxu0 %vm564_vm2, %v3451_v56 }
 0x151   : > { %5384 = vmatprep.mubr.msk.bf16.mxu0 %vm564_vm2, %v3453_v5 }
 0x155   : > { %5237 = vmatmul.mubr.msk.bf16.gmra.mrb[32].mxu1 %vm564_vm2, %v1945_v4 }
 0x158   : > { %5385 = vmatmul.mubr.msk.bf16.gmra.mrb[28].mxu0 %vm564_vm2, %v3455_v44 }
 0x159   : > { %5388 = vmatprep.mubr.msk.bf16.mxu0 %vm564_vm2, %v3457_v48 }
 0x160   : > { %5389 = vmatmul.mubr.msk.bf16.gmra.mrb[32].mxu0 %vm564_vm2, %v3459_v1 }
 0x1c8   : > { %v5168_v54 = vpop.f32.mrb[0].mxu1 }
 0x1c9   : > { %v1590_v17 = vpop.f32.mrb[1].mxu1 }
 0x1ca   : > { %v5169_v63 = vpop.f32.mrb[2].mxu1 }
 0x1cb   : > { %v1593_v21 = vpop.f32.mrb[3].mxu1 }
 0x1d0   : > { %v5172_v30 = vpop.f32.mrb[4].mxu1 }
 0x1d1   : > { %v1606_v57 = vpop.f32.mrb[5].mxu1 }
 0x1d2   : > { %v6781_v51 = vpop.f32.mrb[6].mxu1 }
 0x1d3   : > { %v6783_v42 = vpop.f32.mrb[7].mxu1 }
 0x1d8   : > { %v6785_v18 = vpop.f32.mrb[8].mxu1 }
 0x1d9   : > { %v6787_v19 = vpop.f32.mrb[9].mxu1 }
 0x1da   : > { %v6789_v31 = vpop.f32.mrb[10].mxu1 }
 0x1db   : > { %v6791_v32 = vpop.f32.mrb[11].mxu1 }
 0x1e0   : > { %v6793_v9 = vpop.f32.mrb[12].mxu1 }
 0x1e1   : > { %v6795_v8 = vpop.f32.mrb[13].mxu1 }
 0x1e2   : > { %v6797_v40 = vpop.f32.mrb[14].mxu1 }
 0x1e3   : > { %v6801_v29 = vpop.f32.mrb[15].mxu1 }
 0x1e8   : > { %v6803_v45 = vpop.f32.mrb[16].mxu1 }
 0x1e9   : > { %v6807_v62 = vpop.f32.mrb[17].mxu1 }
 0x1ea   : > { %v6809_v12 = vpop.f32.mrb[18].mxu1 }
 0x1eb   : > { %v6813_v27 = vpop.f32.mrb[19].mxu1 }
 0x1f3   : > { %v5358_v20 = vpop.f32.mrb[0].mxu0 }
 0x1f4   : > { %v5394_v0 = vadd.f32 %v5358_v20, %v5168_v54  ;;  %v3551_v52 = vpop.f32.mrb[1].mxu0 }
 0x1f5   : > { %v5395_v11 = vadd.f32 %v3551_v52, %v1590_v17  ;;  %v5359_v22 = vpop.f32.mrb[2].mxu0  ;;  %v6850_v52 = vpop.permute.xlu0 %3848 }
 0x1f6   : > { %v5396_v33 = vadd.f32 %v5359_v22, %v5169_v63  ;;  %v3554_v2 = vpop.f32.mrb[3].mxu0  ;;  %v4112_v28 = vadd.f32 %v5394_v0, %v6826_v58  ;;  %v3948_v34 = vmul.f32 %v5394_v0, %v3779_v60 }
 0x1f7   : > { %v3946_v53 = vmul.f32 %v5395_v11, %v3769_v36  ;;  %v5397_v26 = vadd.f32 %v3554_v2, %v1593_v21  ;;  %v4110_v16 = vadd.f32 %v5395_v11, %v6826_v58  ;;  %v6845_v21 = vpop.permute.xlu1 %3843 }
 0x1f8   : > { %v4113_v6 = vadd.f32 %v5396_v33, %v6826_v58  ;;  %v3949_v24 = vmul.f32 %v5396_v33, %v3784_v13  ;;  %v4025_v44 = vmul.f32 %v5394_v0, %v3948_v34 }
 0x1f9   : > { %v3947_v35 = vmul.f32 %v5397_v26, %v3774_v43  ;;  %v4111_v25 = vadd.f32 %v5397_v26, %v6826_v58  ;;  %v4023_v41 = vmul.f32 %v5395_v11, %v3946_v53 }
 0x1fa   : > { %v4780_v39 = vpack.c.bf16 %v4113_v6, %v4112_v28  ;;  %v4026_v36 = vmul.f32 %v5396_v33, %v3949_v24 }
 0x1fb   : > { %v3982_v59 = vadd.f32 %v3947_v35, %v3946_v53  ;;  %v4024_v56 = vmul.f32 %v5397_v26, %v3947_v35  ;;  %v4775_v5 = vpack.c.bf16 %v4111_v25, %v4110_v16  ;;  %v5362_v4 = vpop.f32.mrb[4].mxu0  ;;  %v6858_v25 = vpop.permute.xlu1 %3853 }
 0x1fc   : > { %4862 = vst [vmem:[%s6837_s17 + $0x8] sm:$0xff] %v4780_v39   ;;  %v5398_v10 = vadd.f32 %v5362_v4, %v5172_v30  ;;  %v3567_v3 = vpop.f32.mrb[5].mxu0 }
 0x1fd   : > { %v3983_v48 = vadd.f32 %v3982_v59, %v3948_v34  ;;  %v4059_v49 = vadd.f32 %v4024_v56, %v4023_v41  ;;  %4776 = vst [vmem:[%s6837_s17] sm:$0xff] %v4775_v5   ;;  %v5399_v1 = vadd.f32 %v3567_v3, %v1606_v57  ;;  %v5363_v54 = vpop.f32.mrb[6].mxu0  ;;  %v6862_v5 = vpop.permute.xlu0 %3858 }
 0x1fe   : > { %v5400_v17 = vadd.f32 %v5363_v54, %v6781_v51  ;;  %v3570_v63 = vpop.f32.mrb[7].mxu0  ;;  %v4116_v20 = vadd.f32 %v5398_v10, %v6826_v58  ;;  %v3952_v57 = vmul.f32 %v5398_v10, %v3799_v7 }
 0x1ff   : > { %v4060_v60 = vadd.f32 %v4059_v49, %v4025_v44  ;;  %v3950_v43 = vmul.f32 %v5399_v1, %v3789_v15  ;;  %v3984_v13 = vadd.f32 %v3983_v48, %v3949_v24  ;;  %v5401_v0 = vadd.f32 %v3570_v63, %v6783_v42 }
 0x200   : > { %v4117_v30 = vadd.f32 %v5400_v17, %v6826_v58  ;;  %v4114_v2 = vadd.f32 %v5399_v1, %v6826_v58  ;;  %v3953_v28 = vmul.f32 %v5400_v17, %v6805_v23 }
 0x201   : > { %v3985_v11 = vadd.f32 %v3984_v13, %v3950_v43  ;;  %v4027_v22 = vmul.f32 %v5399_v1, %v3950_v43  ;;  %v4061_v51 = vadd.f32 %v4060_v60, %v4026_v36  ;;  %v3951_v33 = vmul.f32 %v5401_v0, %v6799_v38 }
 0x202   : > { %v4790_v53 = vpack.c.bf16 %v4117_v30, %v4116_v20  ;;  %v4115_v15 = vadd.f32 %v5401_v0, %v6826_v58  ;;  %v4029_v38 = vmul.f32 %v5398_v10, %v3952_v57 }
 0x203   : > { %v4062_v26 = vadd.f32 %v4061_v51, %v4027_v22  ;;  %v5366_v6 = vpop.f32.mrb[8].mxu0  ;;  %v3986_v42 = vadd.f32 %v3985_v11, %v3951_v33  ;;  %v4028_v34 = vmul.f32 %v5401_v0, %v3951_v33 }
 0x204   : > { %4864 = vst [vmem:[%s6837_s17 + $0x18] sm:$0xff] %v4790_v53   ;;  %v4785_v16 = vpack.c.bf16 %v4115_v15, %v4114_v2  ;;  %v5402_v7 = vadd.f32 %v5366_v6, %v6785_v18  ;;  %v3583_v35 = vpop.f32.mrb[9].mxu0  ;;  %v4030_v18 = vmul.f32 %v5400_v17, %v3953_v28 }
 0x205   : > { %v5403_v24 = vadd.f32 %v3583_v35, %v6787_v19  ;;  %v5367_v39 = vpop.f32.mrb[10].mxu0  ;;  %v3987_v41 = vadd.f32 %v3986_v42, %v3952_v57  ;;  %v4063_v59 = vadd.f32 %v4062_v26, %v4028_v34  ;;  %v6877_v57 = vpop.permute.xlu0 %3868 }
 0x206   : > { %4863 = vst [vmem:[%s6837_s17 + $0x10] sm:$0xff] %v4785_v16   ;;  %v3586_v56 = vpop.f32.mrb[11].mxu0  ;;  %v5404_v4 = vadd.f32 %v5367_v39, %v6789_v31  ;;  %v3956_v48 = vmul.f32 %v5402_v7, %v6817_v50  ;;  %v4120_v19 = vadd.f32 %v5402_v7, %v6826_v58 }
 0x207   : > { %v3954_v23 = vmul.f32 %v5403_v24, %v6811_v37  ;;  %v5405_v3 = vadd.f32 %v3586_v56, %v6791_v32  ;;  %v4064_v44 = vadd.f32 %v4063_v59, %v4029_v38  ;;  %v3988_v49 = vadd.f32 %v3987_v41, %v3953_v28  ;;  %v6873_v32 = vpop.permute.xlu1 %3863 }
 0x208   : > { %v4121_v1 = vadd.f32 %v5404_v4, %v6826_v58  ;;  %v4118_v37 = vadd.f32 %v5403_v24, %v6826_v58  ;;  %v3957_v17 = vmul.f32 %v5404_v4, %v6819_v47  ;;  %v4033_v51 = vmul.f32 %v5402_v7, %v3956_v48 }
 0x209   : > { %v4031_v10 = vmul.f32 %v5403_v24, %v3954_v23  ;;  %v3955_v54 = vmul.f32 %v5405_v3, %v6815_v46  ;;  %v3989_v63 = vadd.f32 %v3988_v49, %v3954_v23  ;;  %v4065_v36 = vadd.f32 %v4064_v44, %v4030_v18  ;;  %v6901_v59 = vpop.permute.xlu0 %3878 }
 0x20a   : > { %v4119_v31 = vadd.f32 %v5405_v3, %v6826_v58  ;;  %v4800_v50 = vpack.c.bf16 %v4121_v1, %v4120_v19  ;;  %v4034_v6 = vmul.f32 %v5404_v4, %v3957_v17 }
 0x20b   : > { %v4032_v60 = vmul.f32 %v5405_v3, %v3955_v54  ;;  %v5370_v43 = vpop.f32.mrb[12].mxu0  ;;  %v4066_v13 = vadd.f32 %v4065_v36, %v4031_v10  ;;  %v3990_v20 = vadd.f32 %v3989_v63, %v3955_v54  ;;  %v6892_v7 = vpop.permute.xlu1 %3873 }
 0x20c   : > { %v4795_v30 = vpack.c.bf16 %v4119_v31, %v4118_v37  ;;  %v5406_v46 = vadd.f32 %v5370_v43, %v6793_v9  ;;  %v3599_v0 = vpop.f32.mrb[13].mxu0  ;;  %4866 = vst [vmem:[%s6837_s17 + $0x28] sm:$0xff] %v4800_v50  }
 0x20d   : > { %v5407_v11 = vadd.f32 %v3599_v0, %v6795_v8  ;;  %v5371_v22 = vpop.f32.mrb[14].mxu0  ;;  %v3991_v2 = vadd.f32 %v3990_v20, %v3956_v48  ;;  %v4067_v53 = vadd.f32 %v4066_v13, %v4032_v60 }
 0x20e   : > { %4865 = vst [vmem:[%s6837_s17 + $0x20] sm:$0xff] %v4795_v30   ;;  %v3602_v47 = vpop.f32.mrb[15].mxu0  ;;  %v5408_v26 = vadd.f32 %v5371_v22, %v6797_v40  ;;  %v3960_v8 = vmul.f32 %v5406_v46, %v6840_v55  ;;  %v4124_v35 = vadd.f32 %v5406_v46, %v6826_v58  ;;  %v6918_v30 = vpop.permute.xlu0 %3888 }
 0x20f   : > { %v3958_v15 = vmul.f32 %v5407_v11, %v6821_v14  ;;  %v5409_v9 = vadd.f32 %v3602_v47, %v6801_v29  ;;  %v4068_v42 = vadd.f32 %v4067_v53, %v4033_v51  ;;  %v3992_v34 = vadd.f32 %v3991_v2, %v3957_v17 }
 0x210   : > { %v6882_v33 = vpop.f32.mrb[20].mxu1  ;;  %v4125_v14 = vadd.f32 %v5408_v26, %v6826_v58  ;;  %v4122_v41 = vadd.f32 %v5407_v11, %v6826_v58  ;;  %v3961_v56 = vmul.f32 %v5408_v26, %v6845_v21  ;;  %v4037_v1 = vmul.f32 %v5406_v46, %v3960_v8  ;;  %v3884_v21 = vpop.permute.xlu1 %3883 }
 0x211   : > { %v6887_v28 = vpop.f32.mrb[21].mxu1  ;;  %v4035_v24 = vmul.f32 %v5407_v11, %v3958_v15  ;;  %v3959_v40 = vmul.f32 %v5409_v9, %v6831_v61  ;;  %v3993_v39 = vadd.f32 %v3992_v34, %v3958_v15  ;;  %v4069_v38 = vadd.f32 %v4068_v42, %v4034_v6 }
 0x212   : > { %v6890_v16 = vpop.f32.mrb[22].mxu1  ;;  %v4123_v55 = vadd.f32 %v5409_v9, %v6826_v58  ;;  %v4810_v23 = vpack.c.bf16 %v4125_v14, %v4124_v35  ;;  %v4038_v60 = vmul.f32 %v5408_v26, %v3961_v56 }
 0x213   : > { %v6897_v29 = vpop.f32.mrb[23].mxu1  ;;  %v4036_v4 = vmul.f32 %v5409_v9, %v3959_v40  ;;  %v5374_v3 = vpop.f32.mrb[16].mxu0  ;;  %v4070_v18 = vadd.f32 %v4069_v38, %v4035_v24  ;;  %v3994_v44 = vadd.f32 %v3993_v39, %v3959_v40 }
 0x214   : > { %v4805_v61 = vpack.c.bf16 %v4123_v55, %v4122_v41  ;;  %v5410_v48 = vadd.f32 %v5374_v3, %v6803_v45  ;;  %v3615_v49 = vpop.f32.mrb[17].mxu0  ;;  %4868 = vst [vmem:[%s6837_s17 + $0x38] sm:$0xff] %v4810_v23   ;;  %v3899_v38 = vpop.permute.xlu0 %3898 }
 0x215   : > { %v5411_v19 = vadd.f32 %v3615_v49, %v6807_v62  ;;  %v5375_v10 = vpop.f32.mrb[18].mxu0  ;;  %v3995_v54 = vadd.f32 %v3994_v44, %v3960_v8  ;;  %v4071_v63 = vadd.f32 %v4070_v18, %v4036_v4  ;;  %v3894_v8 = vpop.permute.xlu1 %3893 }
 0x216   : > { %4867 = vst [vmem:[%s6837_s17 + $0x30] sm:$0xff] %v4805_v61   ;;  %v3618_v36 = vpop.f32.mrb[19].mxu0  ;;  %v5412_v17 = vadd.f32 %v5375_v10, %v6809_v12  ;;  %v3964_v62 = vmul.f32 %v5410_v48, %v6862_v5  ;;  %v4128_v46 = vadd.f32 %v5410_v48, %v6826_v58 }
 0x217   : > { %v3962_v31 = vmul.f32 %v5411_v19, %v6850_v52  ;;  %v5413_v50 = vadd.f32 %v3618_v36, %v6813_v27  ;;  %v4072_v43 = vadd.f32 %v4071_v63, %v4037_v1  ;;  %v3996_v13 = vadd.f32 %v3995_v54, %v3961_v56 }
 0x218   : > { %v6908_v37 = vpop.f32.mrb[24].mxu1  ;;  %v4129_v52 = vadd.f32 %v5412_v17, %v6826_v58  ;;  %v4126_v51 = vadd.f32 %v5411_v19, %v6826_v58  ;;  %v3965_v2 = vmul.f32 %v5412_v17, %v6873_v32  ;;  %v4041_v24 = vmul.f32 %v5410_v48, %v3964_v62 }
 0x219   : > { %v6913_v45 = vpop.f32.mrb[25].mxu1  ;;  %v4039_v0 = vmul.f32 %v5411_v19, %v3962_v31  ;;  %v3963_v12 = vmul.f32 %v5413_v50, %v6858_v25  ;;  %v3997_v11 = vadd.f32 %v3996_v13, %v3962_v31  ;;  %v4073_v22 = vadd.f32 %v4072_v43, %v4038_v60  ;;  %v3909_v43 = vpop.permute.xlu0 %3908 }
 0x21a   : > { %v6916_v20 = vpop.f32.mrb[26].mxu1  ;;  %v4127_v5 = vadd.f32 %v5413_v50, %v6826_v58  ;;  %v4820_v53 = vpack.c.bf16 %v4129_v52, %v4128_v46  ;;  %v4042_v23 = vmul.f32 %v5412_v17, %v3965_v2 }
 0x21b   : > { %v6923_v27 = vpop.f32.mrb[27].mxu1  ;;  %v4040_v47 = vmul.f32 %v5413_v50, %v3963_v12  ;;  %v5378_v15 = vpop.f32.mrb[20].mxu0  ;;  %v4074_v26 = vadd.f32 %v4073_v22, %v4039_v0  ;;  %v3998_v9 = vadd.f32 %v3997_v11, %v3963_v12 }
 0x21c   : > { %v4815_v6 = vpack.c.bf16 %v4127_v5, %v4126_v51  ;;  %v5414_v25 = vadd.f32 %v5378_v15, %v6882_v33  ;;  %v3631_v42 = vpop.f32.mrb[21].mxu0  ;;  %4870 = vst [vmem:[%s6837_s17 + $0x48] sm:$0xff] %v4820_v53  }
 0x21d   : > { %v5415_v34 = vadd.f32 %v3631_v42, %v6887_v28  ;;  %v5379_v35 = vpop.f32.mrb[22].mxu0  ;;  %v3999_v14 = vadd.f32 %v3998_v9, %v3964_v62  ;;  %v4075_v40 = vadd.f32 %v4074_v26, %v4040_v47 }
 0x21e   : > { %4869 = vst [vmem:[%s6837_s17 + $0x40] sm:$0xff] %v4815_v6   ;;  %v3634_v32 = vpop.f32.mrb[23].mxu0  ;;  %v5416_v55 = vadd.f32 %v5379_v35, %v6890_v16  ;;  %v3968_v28 = vmul.f32 %v5414_v25, %v6901_v59  ;;  %v4132_v44 = vadd.f32 %v5414_v25, %v6826_v58  ;;  %v3904_v59 = vpop.permute.xlu1 %3903 }
 0x21f   : > { %v3966_v41 = vmul.f32 %v5415_v34, %v6877_v57  ;;  %v5417_v33 = vadd.f32 %v3634_v32, %v6897_v29  ;;  %v4076_v4 = vadd.f32 %v4075_v40, %v4041_v24  ;;  %v4000_v3 = vadd.f32 %v3999_v14, %v3965_v2  ;;  %v3919_v35 = vpop.permute.xlu0 %3918 }
 0x220   : > { %v6932_v39 = vpop.f32.mrb[28].mxu1  ;;  %v4133_v48 = vadd.f32 %v5416_v55, %v6826_v58  ;;  %v4130_v19 = vadd.f32 %v5415_v34, %v6826_v58  ;;  %v3969_v1 = vmul.f32 %v5416_v55, %v3884_v21  ;;  %v4045_v46 = vmul.f32 %v5414_v25, %v3968_v28 }
 0x221   : > { %v6937_v56 = vpop.f32.mrb[29].mxu1  ;;  %v4043_v61 = vmul.f32 %v5415_v34, %v3966_v41  ;;  %v3967_v57 = vmul.f32 %v5417_v33, %v6892_v7  ;;  %v4001_v16 = vadd.f32 %v4000_v3, %v3966_v41  ;;  %v4077_v29 = vadd.f32 %v4076_v4, %v4042_v23 }
 0x222   : > { %v6940_v18 = vpop.f32.mrb[30].mxu1  ;;  %v4131_v10 = vadd.f32 %v5417_v33, %v6826_v58  ;;  %v4830_v54 = vpack.c.bf16 %v4133_v48, %v4132_v44 }
 0x223   : > { %v6945_v49 = vpop.f32.mrb[31].mxu1  ;;  %v4044_v63 = vmul.f32 %v5417_v33, %v3967_v57  ;;  %v5382_v36 = vpop.f32.mrb[24].mxu0  ;;  %v4078_v31 = vadd.f32 %v4077_v29, %v4043_v61  ;;  %v4002_v17 = vadd.f32 %v4001_v16, %v3967_v57 }
 0x224   : > { %v4825_v50 = vpack.c.bf16 %v4131_v10, %v4130_v19  ;;  %v5418_v7 = vadd.f32 %v5382_v36, %v6908_v37  ;;  %v3647_v60 = vpop.f32.mrb[25].mxu0  ;;  %4872 = vst [vmem:[%s6837_s17 + $0x58] sm:$0xff] %v4830_v54   ;;  %v4046_v37 = vmul.f32 %v5416_v55, %v3969_v1 }
 0x225   : > { %v5419_v62 = vadd.f32 %v3647_v60, %v6913_v45  ;;  %v5383_v13 = vpop.f32.mrb[26].mxu0  ;;  %v4003_v0 = vadd.f32 %v4002_v17, %v3968_v28  ;;  %v4079_v52 = vadd.f32 %v4078_v31, %v4044_v63  ;;  %v3914_v45 = vpop.permute.xlu1 %3913 }
 0x226   : > { %4871 = vst [vmem:[%s6837_s17 + $0x50] sm:$0xff] %v4825_v50   ;;  %v3650_v21 = vpop.f32.mrb[27].mxu0  ;;  %v5420_v22 = vadd.f32 %v5383_v13, %v6916_v20  ;;  %v3972_v53 = vmul.f32 %v5418_v7, %v3899_v38  ;;  %v4136_v26 = vadd.f32 %v5418_v7, %v6826_v58 }
 0x227   : > { %v3970_v11 = vmul.f32 %v5419_v62, %v6918_v30  ;;  %v5421_v51 = vadd.f32 %v3650_v21, %v6923_v27  ;;  %v4080_v2 = vadd.f32 %v4079_v52, %v4045_v46  ;;  %v4004_v47 = vadd.f32 %v4003_v0, %v3969_v1  ;;  %v3929_v1 = vpop.permute.xlu0 %3928 }
 0x228   : > { %v5238_v12 = vpop.f32.mrb[32].mxu1  ;;  %v4137_v6 = vadd.f32 %v5420_v22, %v6826_v58  ;;  %v4134_v27 = vadd.f32 %v5419_v62, %v6826_v58  ;;  %v3973_v24 = vmul.f32 %v5420_v22, %v3904_v59  ;;  %v4049_v28 = vmul.f32 %v5418_v7, %v3972_v53 }
 0x229   : > { %v2165_v5 = vpop.f32.mrb[33].mxu1  ;;  %v4047_v9 = vmul.f32 %v5419_v62, %v3970_v11  ;;  %v3971_v25 = vmul.f32 %v5421_v51, %v3894_v8  ;;  %v4005_v42 = vadd.f32 %v4004_v47, %v3970_v11  ;;  %v4081_v20 = vadd.f32 %v4080_v2, %v4046_v37  ;;  %v3924_v48 = vpop.permute.xlu1 %3923 }
 0x22a   : > { %v6956_v15 = vpop.f32.mrb[34].mxu1  ;;  %v4135_v34 = vadd.f32 %v5421_v51, %v6826_v58  ;;  %v4840_v14 = vpack.c.bf16 %v4137_v6, %v4136_v26  ;;  %v4050_v19 = vmul.f32 %v5420_v22, %v3973_v24 }
 0x22b   : > { %v2168_v30 = vpop.f32.mrb[35].mxu1  ;;  %v4048_v40 = vmul.f32 %v5421_v51, %v3971_v25  ;;  %v5386_v32 = vpop.f32.mrb[28].mxu0  ;;  %v4082_v38 = vadd.f32 %v4081_v20, %v4047_v9  ;;  %v4006_v41 = vadd.f32 %v4005_v42, %v3971_v25 }
 0x22c   : > { %v4835_v55 = vpack.c.bf16 %v4135_v34, %v4134_v27  ;;  %v5422_v33 = vadd.f32 %v5386_v32, %v6932_v39  ;;  %v3663_v8 = vpop.f32.mrb[29].mxu0  ;;  %4874 = vst [vmem:[%s6837_s17 + $0x68] sm:$0xff] %v4840_v14   ;;  %v3939_v47 = vpop.permute.xlu0 %3938 }
 0x22d   : > { %v5423_v23 = vadd.f32 %v3663_v8, %v6937_v56  ;;  %v5387_v4 = vpop.f32.mrb[30].mxu0  ;;  %v4007_v3 = vadd.f32 %v4006_v41, %v3972_v53  ;;  %v4083_v44 = vadd.f32 %v4082_v38, %v4048_v40  ;;  %v3934_v21 = vpop.permute.xlu1 %3933 }
 0x22e   : > { %4873 = vst [vmem:[%s6837_s17 + $0x60] sm:$0xff] %v4835_v55   ;;  %v3666_v61 = vpop.f32.mrb[31].mxu0  ;;  %v5424_v16 = vadd.f32 %v5387_v4, %v6940_v18  ;;  %v3976_v59 = vmul.f32 %v5422_v33, %v3919_v35  ;;  %v4140_v54 = vadd.f32 %v5422_v33, %v6826_v58 }
 0x22f   : > { %v3974_v57 = vmul.f32 %v5423_v23, %v3909_v43  ;;  %v5425_v29 = vadd.f32 %v3666_v61, %v6945_v49  ;;  %v4084_v10 = vadd.f32 %v4083_v44, %v4049_v28  ;;  %v4008_v39 = vadd.f32 %v4007_v3, %v3973_v24 }
 0x230   : > { %v4141_v63 = vadd.f32 %v5424_v16, %v6826_v58  ;;  %v4138_v50 = vadd.f32 %v5423_v23, %v6826_v58  ;;  %v3977_v7 = vmul.f32 %v5424_v16, %v3924_v48  ;;  %v4053_v51 = vmul.f32 %v5422_v33, %v3976_v59 }
 0x231   : > { %v4051_v56 = vmul.f32 %v5423_v23, %v3974_v57  ;;  %v3975_v36 = vmul.f32 %v5425_v29, %v3914_v45  ;;  %v4009_v31 = vadd.f32 %v4008_v39, %v3974_v57  ;;  %v4085_v17 = vadd.f32 %v4084_v10, %v4050_v19 }
 0x232   : > { %v4139_v18 = vadd.f32 %v5425_v29, %v6826_v58  ;;  %v4850_v49 = vpack.c.bf16 %v4141_v63, %v4140_v54  ;;  %v4054_v6 = vmul.f32 %v5424_v16, %v3977_v7 }
 0x233   : > { %v4052_v60 = vmul.f32 %v5425_v29, %v3975_v36  ;;  %v5390_v43 = vpop.f32.mrb[32].mxu0  ;;  %v4086_v62 = vadd.f32 %v4085_v17, %v4051_v56  ;;  %v4010_v13 = vadd.f32 %v4009_v31, %v3975_v36 }
 0x234   : > { %v4845_v46 = vpack.c.bf16 %v4139_v18, %v4138_v50  ;;  %v5426_v0 = vadd.f32 %v5390_v43, %v5238_v12  ;;  %v3679_v52 = vpop.f32.mrb[33].mxu0  ;;  %4876 = vst [vmem:[%s6837_s17 + $0x78] sm:$0xff] %v4850_v49  }
 0x235   : > { %v5427_v11 = vadd.f32 %v3679_v52, %v2165_v5  ;;  %v5391_v22 = vpop.f32.mrb[34].mxu0  ;;  %v4011_v37 = vadd.f32 %v4010_v13, %v3976_v59  ;;  %v4087_v2 = vadd.f32 %v4086_v62, %v4052_v60 }
 0x236   : > { %4875 = vst [vmem:[%s6837_s17 + $0x70] sm:$0xff] %v4845_v46   ;;  %v3682_v53 = vpop.f32.mrb[35].mxu0  ;;  %v5428_v26 = vadd.f32 %v5391_v22, %v6956_v15  ;;  %v3980_v42 = vmul.f32 %v5426_v0, %v3939_v47  ;;  %v4144_v12 = vadd.f32 %v5426_v0, %v6826_v58  ;;  %v3944_v15 = vpop.permute.xlu1 %3943 }
 0x237   : > { %v3978_v45 = vmul.f32 %v5427_v11, %v3929_v1  ;;  %v5429_v9 = vadd.f32 %v3682_v53, %v2168_v30  ;;  %v4088_v25 = vadd.f32 %v4087_v2, %v4053_v51  ;;  %v4012_v20 = vadd.f32 %v4011_v37, %v3977_v7 }
 0x238   : > { %v4145_v5 = vadd.f32 %v5428_v26, %v6826_v58  ;;  %v4142_v14 = vadd.f32 %v5427_v11, %v6826_v58  ;;  %v3981_v41 = vmul.f32 %v5428_v26, %v3944_v15  ;;  %v4057_v8 = vmul.f32 %v5426_v0, %v3980_v42 }
 0x239   : > { %v4055_v27 = vmul.f32 %v5427_v11, %v3978_v45  ;;  %v3979_v34 = vmul.f32 %v5429_v9, %v3934_v21  ;;  %v4013_v35 = vadd.f32 %v4012_v20, %v3978_v45  ;;  %v4089_v24 = vadd.f32 %v4088_v25, %v4054_v6 }
 0x23a   : > { %v4143_v40 = vadd.f32 %v5429_v9, %v6826_v58  ;;  %v4860_v30 = vpack.c.bf16 %v4145_v5, %v4144_v12  ;;  %v4058_v28 = vmul.f32 %v5428_v26, %v3981_v41 }
 0x23b   : > { %v4056_v32 = vmul.f32 %v5429_v9, %v3979_v34  ;;  %v4090_v38 = vadd.f32 %v4089_v24, %v4055_v27  ;;  %v4014_v55 = vadd.f32 %v4013_v35, %v3979_v34 }
 0x23c   : > { %v4855_v33 = vpack.c.bf16 %v4143_v40, %v4142_v14  ;;  %4878 = vst [vmem:[%s6837_s17 + $0x88] sm:$0xff] %v4860_v30  }
 0x23d   : > { %v4015_v23 = vadd.f32 %v4014_v55, %v3980_v42  ;;  %v4091_v4 = vadd.f32 %v4090_v38, %v4056_v32 }
 0x23e   : > { %4877 = vst [vmem:[%s6837_s17 + $0x80] sm:$0xff] %v4855_v33  }
 0x23f   : > { %v4016_v3 = vadd.f32 %v4015_v23, %v3981_v41  ;;  %v4092_v44 = vadd.f32 %v4091_v4, %v4057_v8 }
 0x241   : > { %v4017_v61 = vrot.slane %v4016_v3, 4  ;;  %v4093_v48 = vadd.f32 %v4092_v44, %v4058_v28 }
 0x243   : > { %v4018_v57 = vadd.f32 %v4017_v61, %v4016_v3  ;;  %v4094_v58 = vrot.slane %v4093_v48, 4 }
 0x245   : > { %v4019_v16 = vrot.slane %v4018_v57, 2  ;;  %v4095_v29 = vadd.f32 %v4094_v58, %v4093_v48 }
 0x247   : > { %v4020_v19 = vadd.f32 %v4019_v16, %v4018_v57  ;;  %v4096_v10 = vrot.slane %v4095_v29, 2 }
 0x249   : > { %v4021_v59 = vrot.slane %v4020_v19, 1  ;;  %v4097_v39 = vadd.f32 %v4096_v10, %v4095_v29 }
 0x24b   : > { %v4098_v1 = vrot.slane %v4097_v39, 1  ;;  %v4022_v54 = vadd.f32 %v4021_v59, %v4020_v19 }
 0x24d   : > { %v4099_v56 = vadd.f32 %v4098_v1, %v4097_v39 }
 0x24f   : > { %v4101_v63 = vsel %vm4100_vm8, %v4022_v54, %v4099_v56 }
 0x250   : > { %4102 = vst [vmem:[%s280_s25] sm:$0x3] %v4101_v63 }
 0x251 PF: > { %s16_s20 = sadd.s32 1, %s5816_s20   ;;  %s7000_s18 = smov %s5812_s19 }
 0x252   : > { %p13_p5 = scmp.ge.s32.totalorder %s16_s20, 4   ;;  %s7001_s19 = smov %s7003_s21 }
 0x254   :  { %15 = sbr.rel (!%p13_p5) target bundleno = 2 (0x2), region = 86 }

</bundles_post_ra>
